<compile_context>
chip_gen: v7x
topology: tpu7x:2x2x1
jax: 0.10.0
libtpu: 0.0.40
codegen_flags: <defaults>
</compile_context>

<pallas_src>
import numpy as np
import jax
import jax.numpy as jnp
from jax.experimental import pallas as pl
from jax.experimental.pallas import tpu as pltpu


# ---------------------------------------------------------------------------
# Fused whole-network kernel: one grid step processes Bblk samples.
# Activation layout: position-major / sample-minor -> row = pos*Bblk + sample.
# ---------------------------------------------------------------------------
def _cnn_lstm_kernel(x_ref,                                     # (1, (L+2)*P, 1)
                     cw1_ref, cb1_ref, cw2_ref, cb2_ref,        # conv weights
                     cw3_ref, cb3_ref, cw4_ref, cb4_ref,
                     wih1_ref, whh1_ref, lb1_ref,               # lstm1 (gate-padded to 128)
                     wih2_ref, whh2_ref, lb2_ref,               # lstm2
                     fw1_ref, fb1_ref, fw2_ref, fb2_ref,        # fc head (fc3 padded to 128)
                     fw3_ref, fb3_ref,
                     o_ref,                                     # (P, 128) lane-dense logits
                     gx1_ref, gx2_ref, hs_ref):                 # VMEM scratch
    P = o_ref.shape[0]                    # samples per block == rows per position
    n_in = x_ref.shape[1] // P            # L + 2 zero-padded input positions
    T = hs_ref.shape[0] // P              # L + 2 LSTM time steps
    f32, bf16 = jnp.float32, jnp.bfloat16

    def conv(h, w_ref, b_ref):
        """Conv1d(k=2, padding=1) + ReLU on a (n_pos*P, Cin) position-major value.

        out[j] = x_pad[j] @ w[0] + x_pad[j+1] @ w[1]   with x_pad = [0, h, 0].
        Zero padding = one zero position-row concatenated on each side (8-row
        aligned, so the concat is layout-free).  Both taps feed one big bf16
        MXU matmul over the whole batch block.
        """
        z = jnp.zeros((P, h.shape[1]), f32)
        t0 = jnp.concatenate([z, h], axis=0).astype(bf16)        # x_pad[j]
        t1 = jnp.concatenate([h, z], axis=0).astype(bf16)        # x_pad[j+1]
        acc = jnp.dot(t0, w_ref[0], preferred_element_type=f32)
        acc = acc + jnp.dot(t1, w_ref[1], preferred_element_type=f32)
        return jnp.maximum(acc + b_ref[...], 0.0)                # (n_pos+1)*P rows

    def pool(h):
        """MaxPool1d(k=2, stride=1): out[j] = max(h[j], h[j+1])."""
        n = h.shape[0] // P
        return jnp.maximum(h[:(n - 1) * P, :], h[P:, :])

    # ---- conv1 (Cin=1): VPU broadcast multiply-add; input already zero padded
    x = x_ref[0]                                                 # ((L+2)*P, 1)
    t0 = x[:(n_in - 1) * P, :]
    t1 = x[P:, :]
    h = jnp.maximum(t0 * cw1_ref[0] + t1 * cw1_ref[1] + cb1_ref[...], 0.0)   # (L+1)pos x 64

    # ---- conv2 -> pool1 -> conv3 -> conv4 -> pool2 (values stay on-chip) ----
    h = conv(h, cw2_ref, cb2_ref)          # (L+2) pos x 128
    h = pool(h)                            # (L+1) pos x 128
    h = conv(h, cw3_ref, cb3_ref)          # (L+2) pos x 128
    h = conv(h, cw4_ref, cb4_ref)          # (L+3) pos x 256
    seq = pool(h)                          # (T=L+2) pos x 256, row = t*P + sample

    # ---- LSTMs (PyTorch gate order i, f, g, o) ------------------------------
    Hp = whh1_ref.shape[0]                 # 128 (lstm1 hidden 64, padded)
    H2 = whh2_ref.shape[0]                 # 128

    def gates(g, c, H):
        ig = jax.nn.sigmoid(g[:, 0 * H:1 * H])
        fg = jax.nn.sigmoid(g[:, 1 * H:2 * H])
        gg = jnp.tanh(g[:, 2 * H:3 * H])
        og = jax.nn.sigmoid(g[:, 3 * H:4 * H])
        c_new = fg * c + ig * gg
        return og * jnp.tanh(c_new), c_new

    # lstm1: input projection hoisted over all T steps and the whole block
    # (one MXU matmul); padded gate lanes see bias 0 so h/c pad lanes stay 0.
    gx1_ref[...] = (jnp.dot(seq.astype(bf16), wih1_ref[...],
                            preferred_element_type=f32) + lb1_ref[...])

    def step1(t, carry):
        h1, c1 = carry
        r = pl.multiple_of(t * P, P)
        g = gx1_ref[pl.ds(r, P), :] + jnp.dot(h1.astype(bf16), whh1_ref[...],
                                              preferred_element_type=f32)
        h1, c1 = gates(g, c1, Hp)
        hs_ref[pl.ds(r, P), :] = h1                    # aligned (P,128) block store
        return (h1, c1)

    z0 = jnp.zeros((P, Hp), f32)
    _ = jax.lax.fori_loop(0, T, step1, (z0, z0))

    # lstm2: input projection hoisted over lstm1's full (time-major) output.
    gx2_ref[...] = (jnp.dot(hs_ref[...].astype(bf16), wih2_ref[...],
                            preferred_element_type=f32) + lb2_ref[...])

    def step2(t, carry):
        h2, c2 = carry
        r = pl.multiple_of(t * P, P)
        g = gx2_ref[pl.ds(r, P), :] + jnp.dot(h2.astype(bf16), whh2_ref[...],
                                              preferred_element_type=f32)
        return gates(g, c2, H2)

    z0 = jnp.zeros((P, H2), f32)
    h2, _ = jax.lax.fori_loop(0, T, step2, (z0, z0))

    # ---- FC head on the final hidden state (M = Bblk) -----------------------
    z = jnp.maximum(jnp.dot(h2.astype(bf16), fw1_ref[...],
                            preferred_element_type=f32) + fb1_ref[...], 0.0)
    z = jnp.maximum(jnp.dot(z.astype(bf16), fw2_ref[...],
                            preferred_element_type=f32) + fb2_ref[...], 0.0)
    o_ref[...] = (jnp.dot(z.astype(bf16), fw3_ref[...],
                          preferred_element_type=f32) + fb3_ref[...])   # (P, 128)


# ---------------------------------------------------------------------------
# Wrapper: weight prep (tiny one-time XLA ops) + single pallas_call.
# ---------------------------------------------------------------------------
def cnn_lstm_forward(params, x, *, block_b=8):
    B, L = x.shape
    assert block_b % 8 == 0, "block_b must be a multiple of 8 (sublane tile)"
    nblk = (B + block_b - 1) // block_b
    Bpad = nblk * block_b
    T = L + 2
    Hp = 128                                  # lstm1 hidden 64 padded to 128 lanes/gate
    f32, bf16 = jnp.float32, jnp.bfloat16

    # ---- conv weights: (Cout, Cin, 2) -> (2, Cin, Cout); conv2..4 in bf16 ----
    def conv_w(w, b, dtype):
        return jnp.transpose(w, (2, 1, 0)).astype(dtype), b.reshape(1, -1).astype(f32)

    cw1, cb1 = conv_w(*params["conv1"], f32)   # conv1 is a VPU broadcast op: keep f32
    cw2, cb2 = conv_w(*params["conv2"], bf16)
    cw3, cb3 = conv_w(*params["conv3"], bf16)
    cw4, cb4 = conv_w(*params["conv4"], bf16)

    # ---- LSTM weights: transpose, fuse biases, pad lstm1 gates to 128 lanes --
    def gate_pad(w, h, hp):
        lead = w.shape[:-1]
        w = w.reshape(lead + (4, h))
        w = jnp.pad(w, [(0, 0)] * len(lead) + [(0, 0), (0, hp - h)])
        return w.reshape(lead + (4 * hp,))

    w_ih1, w_hh1, b_ih1, b_hh1 = params["lstm1"]
    wih1 = gate_pad(w_ih1.T, 64, Hp).astype(bf16)                              # (256, 512)
    whh1 = gate_pad(jnp.pad(w_hh1.T, ((0, Hp - 64), (0, 0))), 64, Hp).astype(bf16)  # (128, 512)
    lb1 = gate_pad((b_ih1 + b_hh1).reshape(1, -1), 64, Hp).astype(f32)         # (1, 512)

    w_ih2, w_hh2, b_ih2, b_hh2 = params["lstm2"]
    wih2 = jnp.pad(w_ih2.T, ((0, Hp - 64), (0, 0))).astype(bf16)               # (128, 512)
    whh2 = w_hh2.T.astype(bf16)                                                # (128, 512)
    lb2 = (b_ih2 + b_hh2).reshape(1, -1).astype(f32)                           # (1, 512)

    # ---- FC head: transpose; pad fc3 to a 128-lane dense output store --------
    fw1 = params["fc1"][0].T.astype(bf16); fb1 = params["fc1"][1].reshape(1, -1).astype(f32)
    fw2 = params["fc2"][0].T.astype(bf16); fb2 = params["fc2"][1].reshape(1, -1).astype(f32)
    fw3 = jnp.pad(params["fc3"][0].T, ((0, 0), (0, 128 - 4))).astype(bf16)     # (512, 128)
    fb3 = jnp.pad(params["fc3"][1], (0, 128 - 4)).reshape(1, -1).astype(f32)   # (1, 128)

    # ---- input: pad batch, add conv1 zero padding, interleave position-major -
    xb = jnp.pad(x.astype(f32), ((0, Bpad - B), (0, 0)))
    xp = jnp.pad(xb, ((0, 0), (1, 1)))                           # (Bpad, L+2)
    xi = (xp.reshape(nblk, block_b, L + 2)
            .transpose(0, 2, 1)                                  # row = pos*block_b + sample
            .reshape(nblk, (L + 2) * block_b, 1))

    weights = (cw1, cb1, cw2, cb2, cw3, cb3, cw4, cb4,
               wih1, whh1, lb1, wih2, whh2, lb2,
               fw1, fb1, fw2, fb2, fw3, fb3)

    def resident(arr):
        nd = arr.ndim
        return pl.BlockSpec(arr.shape, lambda b: (0,) * nd)      # DMA'd once, stays resident

    out = pl.pallas_call(
        _cnn_lstm_kernel,
        out_shape=jax.ShapeDtypeStruct((Bpad, 128), f32),
        grid=(nblk,),
        in_specs=[pl.BlockSpec((1, (L + 2) * block_b, 1), lambda b: (b, 0, 0))]
                 + [resident(w) for w in weights],
        out_specs=pl.BlockSpec((block_b, 128), lambda b: (b, 0)),
        scratch_shapes=[
            pltpu.VMEM((T * block_b, 4 * Hp), f32),   # lstm1 hoisted input projection
            pltpu.VMEM((T * block_b, 4 * 128), f32),  # lstm2 hoisted input projection
            pltpu.VMEM((T * block_b, Hp), f32),       # lstm1 hidden sequence (time-major)
        ],
        compiler_params=pltpu.CompilerParams(
            # Batch-parallel grid: with >= 2 programs this feeds both v7x TCs.
            dimension_semantics=("parallel",),
            # ~2.3 MiB bf16 weights + <1 MiB scratch: well under the v7x 64 MiB
            # physical / 32 MiB default scoped-VMEM ceiling.
            vmem_limit_bytes=32 * 1024 * 1024,
        ),
    )(xi, *weights)
    return out[:B, :4]


# ---------------------------------------------------------------------------
# Parameters (deterministic, PyTorch-style uniform init)
# ---------------------------------------------------------------------------
def _uniform(key, shape, bound):
    return jax.random.uniform(key, shape, jnp.float32, -bound, bound)


def init_params(key):
    keys = iter(jax.random.split(key, 40))
    p = {}

    def conv(cin, cout, k=2):
        b = 1.0 / np.sqrt(cin * k)
        return (_uniform(next(keys), (cout, cin, k), b),
                _uniform(next(keys), (cout,), b))

    def lstm(insz, h):
        b = 1.0 / np.sqrt(h)
        return (_uniform(next(keys), (4 * h, insz), b),
                _uniform(next(keys), (4 * h, h), b),
                _uniform(next(keys), (4 * h,), b),
                _uniform(next(keys), (4 * h,), b))

    def linear(insz, outsz):
        b = 1.0 / np.sqrt(insz)
        return (_uniform(next(keys), (outsz, insz), b),
                _uniform(next(keys), (outsz,), b))

    p["conv1"] = conv(1, 64)
    p["conv2"] = conv(64, 128)
    p["conv3"] = conv(128, 128)
    p["conv4"] = conv(128, 256)
    p["lstm1"] = lstm(256, 64)
    p["lstm2"] = lstm(64, 128)
    p["fc1"] = linear(128, 1024)
    p["fc2"] = linear(1024, 512)
    p["fc3"] = linear(512, 4)
    return p


# ---------------------------------------------------------------------------
# Pure-JAX f32 reference (same math) for a sanity check
# ---------------------------------------------------------------------------
def reference_forward(params, x):
    def conv(h, w, b):
        B, L, _ = h.shape
        hp = jnp.pad(h, ((0, 0), (1, 1), (0, 0)))
        a = hp[:, :L + 1, :]
        c = hp[:, 1:L + 2, :]
        out = (jnp.einsum("blc,oc->blo", a, w[:, :, 0])
               + jnp.einsum("blc,oc->blo", c, w[:, :, 1]) + b)
        return jax.nn.relu(out)

    def pool(h):
        return jnp.maximum(h[:, :-1, :], h[:, 1:, :])

    def lstm(h_tbi, w_ih, w_hh, b_ih, b_hh):
        _, B, _ = h_tbi.shape
        H = w_hh.shape[1]

        def step(carry, x_t):
            hprev, cprev = carry
            gates = x_t @ w_ih.T + hprev @ w_hh.T + b_ih + b_hh
            i, f, g, o = jnp.split(gates, 4, axis=-1)
            c = jax.nn.sigmoid(f) * cprev + jax.nn.sigmoid(i) * jnp.tanh(g)
            hh = jax.nn.sigmoid(o) * jnp.tanh(c)
            return (hh, c), hh

        init = (jnp.zeros((B, H), jnp.float32), jnp.zeros((B, H), jnp.float32))
        _, ys = jax.lax.scan(step, init, h_tbi)
        return ys

    h = x[:, :, None]
    h = conv(h, *params["conv1"]); h = conv(h, *params["conv2"]); h = pool(h)
    h = conv(h, *params["conv3"]); h = conv(h, *params["conv4"]); h = pool(h)
    h = jnp.transpose(h, (1, 0, 2))
    h = lstm(h, *params["lstm1"]); h = lstm(h, *params["lstm2"])
    last = h[-1]
    w1, b1 = params["fc1"]; w2, b2 = params["fc2"]; w3, b3 = params["fc3"]
    z = jax.nn.relu(last @ w1.T + b1)
    z = jax.nn.relu(z @ w2.T + b2)
    return z @ w3.T + b3


if __name__ == "__main__":
    key = jax.random.PRNGKey(0)
    pkey, xkey = jax.random.split(key)
    params = init_params(pkey)

    # 16 samples, 16 features each: 2 grid programs of 8 samples (keeps both
    # v7x TensorCores busy while still being a small demo shape).
    B, L = 16, 16
    x = jax.random.normal(xkey, (B, L), jnp.float32)

    fwd = jax.jit(lambda p, v: cnn_lstm_forward(p, v, block_b=8))
    out = jax.block_until_ready(fwd(params, x))
    assert out.shape == (B, 4)

    # bf16 MXU operands (f32 accumulation) vs. f32 reference -> loose-ish tol.
    ref = reference_forward(params, x)
    np.testing.assert_allclose(np.asarray(out), np.asarray(ref), rtol=3e-2, atol=3e-2)

    print("KERNEL_OK")
</pallas_src>

<mosaic_0001>
module attributes {stable_mosaic.version = 11 : i64} {
  func.func @_cnn_lstm_kernel(%arg0: i32, %arg1: memref<1x144x1xf32, #tpu.memory_space<vmem>>, %arg2: memref<2x1x64xf32, #tpu.memory_space<vmem>>, %arg3: memref<1x64xf32, #tpu.memory_space<vmem>>, %arg4: memref<2x64x128xbf16, #tpu.memory_space<vmem>>, %arg5: memref<1x128xf32, #tpu.memory_space<vmem>>, %arg6: memref<2x128x128xbf16, #tpu.memory_space<vmem>>, %arg7: memref<1x128xf32, #tpu.memory_space<vmem>>, %arg8: memref<2x128x256xbf16, #tpu.memory_space<vmem>>, %arg9: memref<1x256xf32, #tpu.memory_space<vmem>>, %arg10: memref<256x512xbf16, #tpu.memory_space<vmem>>, %arg11: memref<128x512xbf16, #tpu.memory_space<vmem>>, %arg12: memref<1x512xf32, #tpu.memory_space<vmem>>, %arg13: memref<128x512xbf16, #tpu.memory_space<vmem>>, %arg14: memref<128x512xbf16, #tpu.memory_space<vmem>>, %arg15: memref<1x512xf32, #tpu.memory_space<vmem>>, %arg16: memref<128x1024xbf16, #tpu.memory_space<vmem>>, %arg17: memref<1x1024xf32, #tpu.memory_space<vmem>>, %arg18: memref<1024x512xbf16, #tpu.memory_space<vmem>>, %arg19: memref<1x512xf32, #tpu.memory_space<vmem>>, %arg20: memref<512x128xbf16, #tpu.memory_space<vmem>>, %arg21: memref<1x128xf32, #tpu.memory_space<vmem>>, %arg22: memref<8x128xf32, #tpu.memory_space<vmem>>, %arg23: memref<144x512xf32, #tpu.memory_space<vmem>>, %arg24: memref<144x512xf32, #tpu.memory_space<vmem>>, %arg25: memref<144x128xf32, #tpu.memory_space<vmem>>) attributes {dimension_semantics = [#tpu.dimension_semantics<parallel>], iteration_bounds = array<i64: 2>, scalar_prefetch = 0 : i64, scratch_operands = 3 : i64, tpu.core_type = #tpu.core_type<tc>, window_params = [{transform_indices = @transform_0, window_bounds = array<i64: 1, 144, 1>}, {pipeline_mode = #tpu.pipeline_mode<synchronous>, transform_indices = @transform_1, window_bounds = array<i64: 2, 1, 64>}, {pipeline_mode = #tpu.pipeline_mode<synchronous>, transform_indices = @transform_2, window_bounds = array<i64: 1, 64>}, {pipeline_mode = #tpu.pipeline_mode<synchronous>, transform_indices = @transform_3, window_bounds = array<i64: 2, 64, 128>}, {pipeline_mode = #tpu.pipeline_mode<synchronous>, transform_indices = @transform_4, window_bounds = array<i64: 1, 128>}, {pipeline_mode = #tpu.pipeline_mode<synchronous>, transform_indices = @transform_5, window_bounds = array<i64: 2, 128, 128>}, {pipeline_mode = #tpu.pipeline_mode<synchronous>, transform_indices = @transform_6, window_bounds = array<i64: 1, 128>}, {pipeline_mode = #tpu.pipeline_mode<synchronous>, transform_indices = @transform_7, window_bounds = array<i64: 2, 128, 256>}, {pipeline_mode = #tpu.pipeline_mode<synchronous>, transform_indices = @transform_8, window_bounds = array<i64: 1, 256>}, {pipeline_mode = #tpu.pipeline_mode<synchronous>, transform_indices = @transform_9, window_bounds = array<i64: 256, 512>}, {pipeline_mode = #tpu.pipeline_mode<synchronous>, transform_indices = @transform_10, window_bounds = array<i64: 128, 512>}, {pipeline_mode = #tpu.pipeline_mode<synchronous>, transform_indices = @transform_11, window_bounds = array<i64: 1, 512>}, {pipeline_mode = #tpu.pipeline_mode<synchronous>, transform_indices = @transform_12, window_bounds = array<i64: 128, 512>}, {pipeline_mode = #tpu.pipeline_mode<synchronous>, transform_indices = @transform_13, window_bounds = array<i64: 128, 512>}, {pipeline_mode = #tpu.pipeline_mode<synchronous>, transform_indices = @transform_14, window_bounds = array<i64: 1, 512>}, {pipeline_mode = #tpu.pipeline_mode<synchronous>, transform_indices = @transform_15, window_bounds = array<i64: 128, 1024>}, {pipeline_mode = #tpu.pipeline_mode<synchronous>, transform_indices = @transform_16, window_bounds = array<i64: 1, 1024>}, {pipeline_mode = #tpu.pipeline_mode<synchronous>, transform_indices = @transform_17, window_bounds = array<i64: 1024, 512>}, {pipeline_mode = #tpu.pipeline_mode<synchronous>, transform_indices = @transform_18, window_bounds = array<i64: 1, 512>}, {pipeline_mode = #tpu.pipeline_mode<synchronous>, transform_indices = @transform_19, window_bounds = array<i64: 512, 128>}, {pipeline_mode = #tpu.pipeline_mode<synchronous>, transform_indices = @transform_20, window_bounds = array<i64: 1, 128>}, {transform_indices = @transform_21, window_bounds = array<i64: 8, 128>}]} {
    %c0 = arith.constant 0 : index
    %c0_0 = arith.constant 0 : index
    %c0_1 = arith.constant 0 : index
    %0 = vector.load %arg1[%c0, %c0_0, %c0_1] : memref<1x144x1xf32, #tpu.memory_space<vmem>>, vector<1x144x1xf32>
    %1 = vector.shape_cast %0 : vector<1x144x1xf32> to vector<144x1xf32>
    %2 = vector.extract_strided_slice %1 {offsets = [0, 0], sizes = [136, 1], strides = [1, 1]} : vector<144x1xf32> to vector<136x1xf32>
    %3 = vector.extract_strided_slice %1 {offsets = [8, 0], sizes = [136, 1], strides = [1, 1]} : vector<144x1xf32> to vector<136x1xf32>
    %c0_2 = arith.constant 0 : index
    %c0_3 = arith.constant 0 : index
    %c0_4 = arith.constant 0 : index
    %4 = vector.load %arg2[%c0_2, %c0_3, %c0_4] : memref<2x1x64xf32, #tpu.memory_space<vmem>>, vector<1x1x64xf32>
    %5 = vector.shape_cast %4 : vector<1x1x64xf32> to vector<1x64xf32>
    %6 = vector.broadcast %2 : vector<136x1xf32> to vector<136x64xf32>
    %7 = vector.broadcast %5 : vector<1x64xf32> to vector<136x64xf32>
    %8 = arith.mulf %6, %7 : vector<136x64xf32>
    %c1 = arith.constant 1 : index
    %c0_5 = arith.constant 0 : index
    %c0_6 = arith.constant 0 : index
    %9 = vector.load %arg2[%c1, %c0_5, %c0_6] : memref<2x1x64xf32, #tpu.memory_space<vmem>>, vector<1x1x64xf32>
    %10 = vector.shape_cast %9 : vector<1x1x64xf32> to vector<1x64xf32>
    %11 = vector.broadcast %3 : vector<136x1xf32> to vector<136x64xf32>
    %12 = vector.broadcast %10 : vector<1x64xf32> to vector<136x64xf32>
    %13 = arith.mulf %11, %12 : vector<136x64xf32>
    %14 = arith.addf %8, %13 : vector<136x64xf32>
    %c0_7 = arith.constant 0 : index
    %c0_8 = arith.constant 0 : index
    %15 = vector.load %arg3[%c0_7, %c0_8] : memref<1x64xf32, #tpu.memory_space<vmem>>, vector<1x64xf32>
    %16 = vector.broadcast %15 : vector<1x64xf32> to vector<136x64xf32>
    %17 = arith.addf %14, %16 : vector<136x64xf32>
    %cst = arith.constant 0.000000e+00 : f32
    %18 = vector.broadcast %cst : f32 to vector<136x64xf32>
    %19 = arith.maximumf %17, %18 : vector<136x64xf32>
    %cst_9 = arith.constant 0.000000e+00 : f32
    %20 = vector.broadcast %cst_9 : f32 to vector<8x64xf32>
    %21 = tpu.concatenate %20, %19 in 0 : vector<8x64xf32>, vector<136x64xf32> -> vector<144x64xf32>
    %22 = arith.truncf %21 : vector<144x64xf32> to vector<144x64xbf16>
    %23 = tpu.concatenate %19, %20 in 0 : vector<136x64xf32>, vector<8x64xf32> -> vector<144x64xf32>
    %24 = arith.truncf %23 : vector<144x64xf32> to vector<144x64xbf16>
    %c0_10 = arith.constant 0 : index
    %c0_11 = arith.constant 0 : index
    %c0_12 = arith.constant 0 : index
    %25 = vector.load %arg4[%c0_10, %c0_11, %c0_12] : memref<2x64x128xbf16, #tpu.memory_space<vmem>>, vector<1x64x128xbf16>
    %26 = vector.shape_cast %25 : vector<1x64x128xbf16> to vector<64x128xbf16>
    %cst_13 = arith.constant dense<0.000000e+00> : vector<144x128xf32>
    %27 = tpu.matmul %22, %26, %cst_13 {dimension_numbers = #tpu.dot_dimension_numbers<[1], [0], [0], [1], [0, 0, 1, 1], [], []>} : vector<144x64xbf16>, vector<64x128xbf16>, vector<144x128xf32> -> vector<144x128xf32>
    %c1_14 = arith.constant 1 : index
    %c0_15 = arith.constant 0 : index
    %c0_16 = arith.constant 0 : index
    %28 = vector.load %arg4[%c1_14, %c0_15, %c0_16] : memref<2x64x128xbf16, #tpu.memory_space<vmem>>, vector<1x64x128xbf16>
    %29 = vector.shape_cast %28 : vector<1x64x128xbf16> to vector<64x128xbf16>
    %cst_17 = arith.constant dense<0.000000e+00> : vector<144x128xf32>
    %30 = tpu.matmul %24, %29, %cst_17 {dimension_numbers = #tpu.dot_dimension_numbers<[1], [0], [0], [1], [0, 0, 1, 1], [], []>} : vector<144x64xbf16>, vector<64x128xbf16>, vector<144x128xf32> -> vector<144x128xf32>
    %31 = arith.addf %27, %30 : vector<144x128xf32>
    %c0_18 = arith.constant 0 : index
    %c0_19 = arith.constant 0 : index
    %32 = vector.load %arg5[%c0_18, %c0_19] : memref<1x128xf32, #tpu.memory_space<vmem>>, vector<1x128xf32>
    %33 = vector.broadcast %32 : vector<1x128xf32> to vector<144x128xf32>
    %34 = arith.addf %31, %33 : vector<144x128xf32>
    %cst_20 = arith.constant 0.000000e+00 : f32
    %35 = vector.broadcast %cst_20 : f32 to vector<144x128xf32>
    %36 = arith.maximumf %34, %35 : vector<144x128xf32>
    %37 = vector.extract_strided_slice %36 {offsets = [0, 0], sizes = [136, 128], strides = [1, 1]} : vector<144x128xf32> to vector<136x128xf32>
    %38 = vector.extract_strided_slice %36 {offsets = [8, 0], sizes = [136, 128], strides = [1, 1]} : vector<144x128xf32> to vector<136x128xf32>
    %39 = arith.maximumf %37, %38 : vector<136x128xf32>
    %cst_21 = arith.constant 0.000000e+00 : f32
    %40 = vector.broadcast %cst_21 : f32 to vector<8x128xf32>
    %41 = tpu.concatenate %40, %39 in 0 : vector<8x128xf32>, vector<136x128xf32> -> vector<144x128xf32>
    %42 = arith.truncf %41 : vector<144x128xf32> to vector<144x128xbf16>
    %43 = tpu.concatenate %39, %40 in 0 : vector<136x128xf32>, vector<8x128xf32> -> vector<144x128xf32>
    %44 = arith.truncf %43 : vector<144x128xf32> to vector<144x128xbf16>
    %c0_22 = arith.constant 0 : index
    %c0_23 = arith.constant 0 : index
    %c0_24 = arith.constant 0 : index
    %45 = vector.load %arg6[%c0_22, %c0_23, %c0_24] : memref<2x128x128xbf16, #tpu.memory_space<vmem>>, vector<1x128x128xbf16>
    %46 = vector.shape_cast %45 : vector<1x128x128xbf16> to vector<128x128xbf16>
    %cst_25 = arith.constant dense<0.000000e+00> : vector<144x128xf32>
    %47 = tpu.matmul %42, %46, %cst_25 {dimension_numbers = #tpu.dot_dimension_numbers<[1], [0], [0], [1], [0, 0, 1, 1], [], []>} : vector<144x128xbf16>, vector<128x128xbf16>, vector<144x128xf32> -> vector<144x128xf32>
    %c1_26 = arith.constant 1 : index
    %c0_27 = arith.constant 0 : index
    %c0_28 = arith.constant 0 : index
    %48 = vector.load %arg6[%c1_26, %c0_27, %c0_28] : memref<2x128x128xbf16, #tpu.memory_space<vmem>>, vector<1x128x128xbf16>
    %49 = vector.shape_cast %48 : vector<1x128x128xbf16> to vector<128x128xbf16>
    %cst_29 = arith.constant dense<0.000000e+00> : vector<144x128xf32>
    %50 = tpu.matmul %44, %49, %cst_29 {dimension_numbers = #tpu.dot_dimension_numbers<[1], [0], [0], [1], [0, 0, 1, 1], [], []>} : vector<144x128xbf16>, vector<128x128xbf16>, vector<144x128xf32> -> vector<144x128xf32>
    %51 = arith.addf %47, %50 : vector<144x128xf32>
    %c0_30 = arith.constant 0 : index
    %c0_31 = arith.constant 0 : index
    %52 = vector.load %arg7[%c0_30, %c0_31] : memref<1x128xf32, #tpu.memory_space<vmem>>, vector<1x128xf32>
    %53 = vector.broadcast %52 : vector<1x128xf32> to vector<144x128xf32>
    %54 = arith.addf %51, %53 : vector<144x128xf32>
    %cst_32 = arith.constant 0.000000e+00 : f32
    %55 = vector.broadcast %cst_32 : f32 to vector<144x128xf32>
    %56 = arith.maximumf %54, %55 : vector<144x128xf32>
    %cst_33 = arith.constant 0.000000e+00 : f32
    %57 = vector.broadcast %cst_33 : f32 to vector<8x128xf32>
    %58 = tpu.concatenate %57, %56 in 0 : vector<8x128xf32>, vector<144x128xf32> -> vector<152x128xf32>
    %59 = arith.truncf %58 : vector<152x128xf32> to vector<152x128xbf16>
    %60 = tpu.concatenate %56, %57 in 0 : vector<144x128xf32>, vector<8x128xf32> -> vector<152x128xf32>
    %61 = arith.truncf %60 : vector<152x128xf32> to vector<152x128xbf16>
    %c0_34 = arith.constant 0 : index
    %c0_35 = arith.constant 0 : index
    %c0_36 = arith.constant 0 : index
    %62 = vector.load %arg8[%c0_34, %c0_35, %c0_36] : memref<2x128x256xbf16, #tpu.memory_space<vmem>>, vector<1x128x256xbf16>
    %63 = vector.shape_cast %62 : vector<1x128x256xbf16> to vector<128x256xbf16>
    %cst_37 = arith.constant dense<0.000000e+00> : vector<152x256xf32>
    %64 = tpu.matmul %59, %63, %cst_37 {dimension_numbers = #tpu.dot_dimension_numbers<[1], [0], [0], [1], [0, 0, 1, 1], [], []>} : vector<152x128xbf16>, vector<128x256xbf16>, vector<152x256xf32> -> vector<152x256xf32>
    %c1_38 = arith.constant 1 : index
    %c0_39 = arith.constant 0 : index
    %c0_40 = arith.constant 0 : index
    %65 = vector.load %arg8[%c1_38, %c0_39, %c0_40] : memref<2x128x256xbf16, #tpu.memory_space<vmem>>, vector<1x128x256xbf16>
    %66 = vector.shape_cast %65 : vector<1x128x256xbf16> to vector<128x256xbf16>
    %cst_41 = arith.constant dense<0.000000e+00> : vector<152x256xf32>
    %67 = tpu.matmul %61, %66, %cst_41 {dimension_numbers = #tpu.dot_dimension_numbers<[1], [0], [0], [1], [0, 0, 1, 1], [], []>} : vector<152x128xbf16>, vector<128x256xbf16>, vector<152x256xf32> -> vector<152x256xf32>
    %68 = arith.addf %64, %67 : vector<152x256xf32>
    %c0_42 = arith.constant 0 : index
    %c0_43 = arith.constant 0 : index
    %69 = vector.load %arg9[%c0_42, %c0_43] : memref<1x256xf32, #tpu.memory_space<vmem>>, vector<1x256xf32>
    %70 = vector.broadcast %69 : vector<1x256xf32> to vector<152x256xf32>
    %71 = arith.addf %68, %70 : vector<152x256xf32>
    %cst_44 = arith.constant 0.000000e+00 : f32
    %72 = vector.broadcast %cst_44 : f32 to vector<152x256xf32>
    %73 = arith.maximumf %71, %72 : vector<152x256xf32>
    %74 = vector.extract_strided_slice %73 {offsets = [0, 0], sizes = [144, 256], strides = [1, 1]} : vector<152x256xf32> to vector<144x256xf32>
    %75 = vector.extract_strided_slice %73 {offsets = [8, 0], sizes = [144, 256], strides = [1, 1]} : vector<152x256xf32> to vector<144x256xf32>
    %76 = arith.maximumf %74, %75 : vector<144x256xf32>
    %77 = arith.truncf %76 : vector<144x256xf32> to vector<144x256xbf16>
    %c0_45 = arith.constant 0 : index
    %c0_46 = arith.constant 0 : index
    %78 = vector.load %arg10[%c0_45, %c0_46] : memref<256x512xbf16, #tpu.memory_space<vmem>>, vector<256x512xbf16>
    %cst_47 = arith.constant dense<0.000000e+00> : vector<144x512xf32>
    %79 = tpu.matmul %77, %78, %cst_47 {dimension_numbers = #tpu.dot_dimension_numbers<[1], [0], [0], [1], [0, 0, 1, 1], [], []>} : vector<144x256xbf16>, vector<256x512xbf16>, vector<144x512xf32> -> vector<144x512xf32>
    %c0_48 = arith.constant 0 : index
    %c0_49 = arith.constant 0 : index
    %80 = vector.load %arg12[%c0_48, %c0_49] : memref<1x512xf32, #tpu.memory_space<vmem>>, vector<1x512xf32>
    %81 = vector.broadcast %80 : vector<1x512xf32> to vector<144x512xf32>
    %82 = arith.addf %79, %81 : vector<144x512xf32>
    %c0_50 = arith.constant 0 : index
    %c0_51 = arith.constant 0 : index
    %83 = vector.load %arg23[%c0_50, %c0_51] : memref<144x512xf32, #tpu.memory_space<vmem>>, vector<144x512xf32>
    tpu.vector_store %arg23[%c0_50, %c0_51], %82 {strides = array<i32>} : memref<144x512xf32, #tpu.memory_space<vmem>>, vector<144x512xf32>,
    %cst_52 = arith.constant 0.000000e+00 : f32
    %84 = vector.broadcast %cst_52 : f32 to vector<8x128xf32>
    %c0_i32 = arith.constant 0 : i32
    %c18_i32 = arith.constant 18 : i32
    %85 = arith.addi %c0_i32, %c18_i32 : i32
    %c1_i32 = arith.constant 1 : i32
    %86:2 = scf.for %arg26 = %c0_i32 to %85 step %c1_i32 iter_args(%arg27 = %84, %arg28 = %84) -> (vector<8x128xf32>, vector<8x128xf32>)  : i32 {
      %c8_i32 = arith.constant 8 : i32
      %121 = arith.muli %arg26, %c8_i32 : i32
      %122 = tpu.assume_multiple %121, 8 : i32
      %123 = arith.index_cast %122 : i32 to index
      %c0_87 = arith.constant 0 : index
      %124 = vector.load %arg23[%123, %c0_87] : memref<144x512xf32, #tpu.memory_space<vmem>>, vector<8x512xf32>
      %125 = arith.truncf %arg27 : vector<8x128xf32> to vector<8x128xbf16>
      %c0_88 = arith.constant 0 : index
      %c0_89 = arith.constant 0 : index
      %126 = vector.load %arg11[%c0_88, %c0_89] : memref<128x512xbf16, #tpu.memory_space<vmem>>, vector<128x512xbf16>
      %cst_90 = arith.constant dense<0.000000e+00> : vector<8x512xf32>
      %127 = tpu.matmul %125, %126, %cst_90 {dimension_numbers = #tpu.dot_dimension_numbers<[1], [0], [0], [1], [0, 0, 1, 1], [], []>} : vector<8x128xbf16>, vector<128x512xbf16>, vector<8x512xf32> -> vector<8x512xf32>
      %128 = arith.addf %124, %127 : vector<8x512xf32>
      %129 = vector.extract_strided_slice %128 {offsets = [0, 0], sizes = [8, 128], strides = [1, 1]} : vector<8x512xf32> to vector<8x128xf32>
      %130 = arith.negf %129 : vector<8x128xf32>
      %131 = math.exp %130 : vector<8x128xf32>
      %cst_91 = arith.constant 1.000000e+00 : f32
      %132 = vector.broadcast %cst_91 : f32 to vector<8x128xf32>
      %133 = arith.addf %132, %131 : vector<8x128xf32>
      %134 = arith.divf %132, %133 : vector<8x128xf32>
      %135 = vector.extract_strided_slice %128 {offsets = [0, 128], sizes = [8, 128], strides = [1, 1]} : vector<8x512xf32> to vector<8x128xf32>
      %136 = arith.negf %135 : vector<8x128xf32>
      %137 = math.exp %136 : vector<8x128xf32>
      %cst_92 = arith.constant 1.000000e+00 : f32
      %138 = vector.broadcast %cst_92 : f32 to vector<8x128xf32>
      %139 = arith.addf %138, %137 : vector<8x128xf32>
      %140 = arith.divf %138, %139 : vector<8x128xf32>
      %141 = vector.extract_strided_slice %128 {offsets = [0, 256], sizes = [8, 128], strides = [1, 1]} : vector<8x512xf32> to vector<8x128xf32>
      %142 = math.tanh %141 : vector<8x128xf32>
      %143 = vector.extract_strided_slice %128 {offsets = [0, 384], sizes = [8, 128], strides = [1, 1]} : vector<8x512xf32> to vector<8x128xf32>
      %144 = arith.negf %143 : vector<8x128xf32>
      %145 = math.exp %144 : vector<8x128xf32>
      %cst_93 = arith.constant 1.000000e+00 : f32
      %146 = vector.broadcast %cst_93 : f32 to vector<8x128xf32>
      %147 = arith.addf %146, %145 : vector<8x128xf32>
      %148 = arith.divf %146, %147 : vector<8x128xf32>
      %149 = arith.mulf %140, %arg28 : vector<8x128xf32>
      %150 = arith.mulf %134, %142 : vector<8x128xf32>
      %151 = arith.addf %149, %150 : vector<8x128xf32>
      %152 = math.tanh %151 : vector<8x128xf32>
      %153 = arith.mulf %148, %152 : vector<8x128xf32>
      %154 = arith.index_cast %122 : i32 to index
      %c0_94 = arith.constant 0 : index
      %155 = vector.load %arg25[%154, %c0_94] : memref<144x128xf32, #tpu.memory_space<vmem>>, vector<8x128xf32>
      tpu.vector_store %arg25[%154, %c0_94], %153 {strides = array<i32>} : memref<144x128xf32, #tpu.memory_space<vmem>>, vector<8x128xf32>,
      scf.yield %153, %151 : vector<8x128xf32>, vector<8x128xf32>
    }
    %c18_i32_53 = arith.constant 18 : i32
    %c0_54 = arith.constant 0 : index
    %c0_55 = arith.constant 0 : index
    %87 = vector.load %arg25[%c0_54, %c0_55] : memref<144x128xf32, #tpu.memory_space<vmem>>, vector<144x128xf32>
    %88 = arith.truncf %87 : vector<144x128xf32> to vector<144x128xbf16>
    %c0_56 = arith.constant 0 : index
    %c0_57 = arith.constant 0 : index
    %89 = vector.load %arg13[%c0_56, %c0_57] : memref<128x512xbf16, #tpu.memory_space<vmem>>, vector<128x512xbf16>
    %cst_58 = arith.constant dense<0.000000e+00> : vector<144x512xf32>
    %90 = tpu.matmul %88, %89, %cst_58 {dimension_numbers = #tpu.dot_dimension_numbers<[1], [0], [0], [1], [0, 0, 1, 1], [], []>} : vector<144x128xbf16>, vector<128x512xbf16>, vector<144x512xf32> -> vector<144x512xf32>
    %c0_59 = arith.constant 0 : index
    %c0_60 = arith.constant 0 : index
    %91 = vector.load %arg15[%c0_59, %c0_60] : memref<1x512xf32, #tpu.memory_space<vmem>>, vector<1x512xf32>
    %92 = vector.broadcast %91 : vector<1x512xf32> to vector<144x512xf32>
    %93 = arith.addf %90, %92 : vector<144x512xf32>
    %c0_61 = arith.constant 0 : index
    %c0_62 = arith.constant 0 : index
    %94 = vector.load %arg24[%c0_61, %c0_62] : memref<144x512xf32, #tpu.memory_space<vmem>>, vector<144x512xf32>
    tpu.vector_store %arg24[%c0_61, %c0_62], %93 {strides = array<i32>} : memref<144x512xf32, #tpu.memory_space<vmem>>, vector<144x512xf32>,
    %cst_63 = arith.constant 0.000000e+00 : f32
    %95 = vector.broadcast %cst_63 : f32 to vector<8x128xf32>
    %c0_i32_64 = arith.constant 0 : i32
    %c18_i32_65 = arith.constant 18 : i32
    %96 = arith.addi %c0_i32_64, %c18_i32_65 : i32
    %c1_i32_66 = arith.constant 1 : i32
    %97:2 = scf.for %arg26 = %c0_i32_64 to %96 step %c1_i32_66 iter_args(%arg27 = %95, %arg28 = %95) -> (vector<8x128xf32>, vector<8x128xf32>)  : i32 {
      %c8_i32 = arith.constant 8 : i32
      %121 = arith.muli %arg26, %c8_i32 : i32
      %122 = tpu.assume_multiple %121, 8 : i32
      %123 = arith.index_cast %122 : i32 to index
      %c0_87 = arith.constant 0 : index
      %124 = vector.load %arg24[%123, %c0_87] : memref<144x512xf32, #tpu.memory_space<vmem>>, vector<8x512xf32>
      %125 = arith.truncf %arg27 : vector<8x128xf32> to vector<8x128xbf16>
      %c0_88 = arith.constant 0 : index
      %c0_89 = arith.constant 0 : index
      %126 = vector.load %arg14[%c0_88, %c0_89] : memref<128x512xbf16, #tpu.memory_space<vmem>>, vector<128x512xbf16>
      %cst_90 = arith.constant dense<0.000000e+00> : vector<8x512xf32>
      %127 = tpu.matmul %125, %126, %cst_90 {dimension_numbers = #tpu.dot_dimension_numbers<[1], [0], [0], [1], [0, 0, 1, 1], [], []>} : vector<8x128xbf16>, vector<128x512xbf16>, vector<8x512xf32> -> vector<8x512xf32>
      %128 = arith.addf %124, %127 : vector<8x512xf32>
      %129 = vector.extract_strided_slice %128 {offsets = [0, 0], sizes = [8, 128], strides = [1, 1]} : vector<8x512xf32> to vector<8x128xf32>
      %130 = arith.negf %129 : vector<8x128xf32>
      %131 = math.exp %130 : vector<8x128xf32>
      %cst_91 = arith.constant 1.000000e+00 : f32
      %132 = vector.broadcast %cst_91 : f32 to vector<8x128xf32>
      %133 = arith.addf %132, %131 : vector<8x128xf32>
      %134 = arith.divf %132, %133 : vector<8x128xf32>
      %135 = vector.extract_strided_slice %128 {offsets = [0, 128], sizes = [8, 128], strides = [1, 1]} : vector<8x512xf32> to vector<8x128xf32>
      %136 = arith.negf %135 : vector<8x128xf32>
      %137 = math.exp %136 : vector<8x128xf32>
      %cst_92 = arith.constant 1.000000e+00 : f32
      %138 = vector.broadcast %cst_92 : f32 to vector<8x128xf32>
      %139 = arith.addf %138, %137 : vector<8x128xf32>
      %140 = arith.divf %138, %139 : vector<8x128xf32>
      %141 = vector.extract_strided_slice %128 {offsets = [0, 256], sizes = [8, 128], strides = [1, 1]} : vector<8x512xf32> to vector<8x128xf32>
      %142 = math.tanh %141 : vector<8x128xf32>
      %143 = vector.extract_strided_slice %128 {offsets = [0, 384], sizes = [8, 128], strides = [1, 1]} : vector<8x512xf32> to vector<8x128xf32>
      %144 = arith.negf %143 : vector<8x128xf32>
      %145 = math.exp %144 : vector<8x128xf32>
      %cst_93 = arith.constant 1.000000e+00 : f32
      %146 = vector.broadcast %cst_93 : f32 to vector<8x128xf32>
      %147 = arith.addf %146, %145 : vector<8x128xf32>
      %148 = arith.divf %146, %147 : vector<8x128xf32>
      %149 = arith.mulf %140, %arg28 : vector<8x128xf32>
      %150 = arith.mulf %134, %142 : vector<8x128xf32>
      %151 = arith.addf %149, %150 : vector<8x128xf32>
      %152 = math.tanh %151 : vector<8x128xf32>
      %153 = arith.mulf %148, %152 : vector<8x128xf32>
      scf.yield %153, %151 : vector<8x128xf32>, vector<8x128xf32>
    }
    %c18_i32_67 = arith.constant 18 : i32
    %98 = arith.truncf %97#0 : vector<8x128xf32> to vector<8x128xbf16>
    %c0_68 = arith.constant 0 : index
    %c0_69 = arith.constant 0 : index
    %99 = vector.load %arg16[%c0_68, %c0_69] : memref<128x1024xbf16, #tpu.memory_space<vmem>>, vector<128x1024xbf16>
    %cst_70 = arith.constant dense<0.000000e+00> : vector<8x1024xf32>
    %100 = tpu.matmul %98, %99, %cst_70 {dimension_numbers = #tpu.dot_dimension_numbers<[1], [0], [0], [1], [0, 0, 1, 1], [], []>} : vector<8x128xbf16>, vector<128x1024xbf16>, vector<8x1024xf32> -> vector<8x1024xf32>
    %c0_71 = arith.constant 0 : index
    %c0_72 = arith.constant 0 : index
    %101 = vector.load %arg17[%c0_71, %c0_72] : memref<1x1024xf32, #tpu.memory_space<vmem>>, vector<1x1024xf32>
    %102 = vector.broadcast %101 : vector<1x1024xf32> to vector<8x1024xf32>
    %103 = arith.addf %100, %102 : vector<8x1024xf32>
    %cst_73 = arith.constant 0.000000e+00 : f32
    %104 = vector.broadcast %cst_73 : f32 to vector<8x1024xf32>
    %105 = arith.maximumf %103, %104 : vector<8x1024xf32>
    %106 = arith.truncf %105 : vector<8x1024xf32> to vector<8x1024xbf16>
    %c0_74 = arith.constant 0 : index
    %c0_75 = arith.constant 0 : index
    %107 = vector.load %arg18[%c0_74, %c0_75] : memref<1024x512xbf16, #tpu.memory_space<vmem>>, vector<1024x512xbf16>
    %cst_76 = arith.constant dense<0.000000e+00> : vector<8x512xf32>
    %108 = tpu.matmul %106, %107, %cst_76 {dimension_numbers = #tpu.dot_dimension_numbers<[1], [0], [0], [1], [0, 0, 1, 1], [], []>} : vector<8x1024xbf16>, vector<1024x512xbf16>, vector<8x512xf32> -> vector<8x512xf32>
    %c0_77 = arith.constant 0 : index
    %c0_78 = arith.constant 0 : index
    %109 = vector.load %arg19[%c0_77, %c0_78] : memref<1x512xf32, #tpu.memory_space<vmem>>, vector<1x512xf32>
    %110 = vector.broadcast %109 : vector<1x512xf32> to vector<8x512xf32>
    %111 = arith.addf %108, %110 : vector<8x512xf32>
    %cst_79 = arith.constant 0.000000e+00 : f32
    %112 = vector.broadcast %cst_79 : f32 to vector<8x512xf32>
    %113 = arith.maximumf %111, %112 : vector<8x512xf32>
    %114 = arith.truncf %113 : vector<8x512xf32> to vector<8x512xbf16>
    %c0_80 = arith.constant 0 : index
    %c0_81 = arith.constant 0 : index
    %115 = vector.load %arg20[%c0_80, %c0_81] : memref<512x128xbf16, #tpu.memory_space<vmem>>, vector<512x128xbf16>
    %cst_82 = arith.constant dense<0.000000e+00> : vector<8x128xf32>
    %116 = tpu.matmul %114, %115, %cst_82 {dimension_numbers = #tpu.dot_dimension_numbers<[1], [0], [0], [1], [0, 0, 1, 1], [], []>} : vector<8x512xbf16>, vector<512x128xbf16>, vector<8x128xf32> -> vector<8x128xf32>
    %c0_83 = arith.constant 0 : index
    %c0_84 = arith.constant 0 : index
    %117 = vector.load %arg21[%c0_83, %c0_84] : memref<1x128xf32, #tpu.memory_space<vmem>>, vector<1x128xf32>
    %118 = vector.broadcast %117 : vector<1x128xf32> to vector<8x128xf32>
    %119 = arith.addf %116, %118 : vector<8x128xf32>
    %c0_85 = arith.constant 0 : index
    %c0_86 = arith.constant 0 : index
    %120 = vector.load %arg22[%c0_85, %c0_86] : memref<8x128xf32, #tpu.memory_space<vmem>>, vector<8x128xf32>
    tpu.vector_store %arg22[%c0_85, %c0_86], %119 {strides = array<i32>} : memref<8x128xf32, #tpu.memory_space<vmem>>, vector<8x128xf32>,
    return
  }
  func.func @transform_0(%arg0: i32) -> (i32, i32, i32) {
    %c0_i32 = arith.constant 0 : i32
    %c0_i32_0 = arith.constant 0 : i32
    %c0_i32_1 = arith.constant 0 : i32
    return %arg0, %c0_i32, %c0_i32_0 : i32, i32, i32
  }
  func.func @transform_1(%arg0: i32) -> (i32, i32, i32) {
    %c0_i32 = arith.constant 0 : i32
    %c0_i32_0 = arith.constant 0 : i32
    %c0_i32_1 = arith.constant 0 : i32
    %c0_i32_2 = arith.constant 0 : i32
    return %c0_i32, %c0_i32_0, %c0_i32_1 : i32, i32, i32
  }
  func.func @transform_2(%arg0: i32) -> (i32, i32) {
    %c0_i32 = arith.constant 0 : i32
    %c0_i32_0 = arith.constant 0 : i32
    %c0_i32_1 = arith.constant 0 : i32
    return %c0_i32, %c0_i32_0 : i32, i32
  }
  func.func @transform_3(%arg0: i32) -> (i32, i32, i32) {
    %c0_i32 = arith.constant 0 : i32
    %c0_i32_0 = arith.constant 0 : i32
    %c0_i32_1 = arith.constant 0 : i32
    %c0_i32_2 = arith.constant 0 : i32
    return %c0_i32, %c0_i32_0, %c0_i32_1 : i32, i32, i32
  }
  func.func @transform_4(%arg0: i32) -> (i32, i32) {
    %c0_i32 = arith.constant 0 : i32
    %c0_i32_0 = arith.constant 0 : i32
    %c0_i32_1 = arith.constant 0 : i32
    return %c0_i32, %c0_i32_0 : i32, i32
  }
  func.func @transform_5(%arg0: i32) -> (i32, i32, i32) {
    %c0_i32 = arith.constant 0 : i32
    %c0_i32_0 = arith.constant 0 : i32
    %c0_i32_1 = arith.constant 0 : i32
    %c0_i32_2 = arith.constant 0 : i32
    return %c0_i32, %c0_i32_0, %c0_i32_1 : i32, i32, i32
  }
  func.func @transform_6(%arg0: i32) -> (i32, i32) {
    %c0_i32 = arith.constant 0 : i32
    %c0_i32_0 = arith.constant 0 : i32
    %c0_i32_1 = arith.constant 0 : i32
    return %c0_i32, %c0_i32_0 : i32, i32
  }
  func.func @transform_7(%arg0: i32) -> (i32, i32, i32) {
    %c0_i32 = arith.constant 0 : i32
    %c0_i32_0 = arith.constant 0 : i32
    %c0_i32_1 = arith.constant 0 : i32
    %c0_i32_2 = arith.constant 0 : i32
    return %c0_i32, %c0_i32_0, %c0_i32_1 : i32, i32, i32
  }
  func.func @transform_8(%arg0: i32) -> (i32, i32) {
    %c0_i32 = arith.constant 0 : i32
    %c0_i32_0 = arith.constant 0 : i32
    %c0_i32_1 = arith.constant 0 : i32
    return %c0_i32, %c0_i32_0 : i32, i32
  }
  func.func @transform_9(%arg0: i32) -> (i32, i32) {
    %c0_i32 = arith.constant 0 : i32
    %c0_i32_0 = arith.constant 0 : i32
    %c0_i32_1 = arith.constant 0 : i32
    return %c0_i32, %c0_i32_0 : i32, i32
  }
  func.func @transform_10(%arg0: i32) -> (i32, i32) {
    %c0_i32 = arith.constant 0 : i32
    %c0_i32_0 = arith.constant 0 : i32
    %c0_i32_1 = arith.constant 0 : i32
    return %c0_i32, %c0_i32_0 : i32, i32
  }
  func.func @transform_11(%arg0: i32) -> (i32, i32) {
    %c0_i32 = arith.constant 0 : i32
    %c0_i32_0 = arith.constant 0 : i32
    %c0_i32_1 = arith.constant 0 : i32
    return %c0_i32, %c0_i32_0 : i32, i32
  }
  func.func @transform_12(%arg0: i32) -> (i32, i32) {
    %c0_i32 = arith.constant 0 : i32
    %c0_i32_0 = arith.constant 0 : i32
    %c0_i32_1 = arith.constant 0 : i32
    return %c0_i32, %c0_i32_0 : i32, i32
  }
  func.func @transform_13(%arg0: i32) -> (i32, i32) {
    %c0_i32 = arith.constant 0 : i32
    %c0_i32_0 = arith.constant 0 : i32
    %c0_i32_1 = arith.constant 0 : i32
    return %c0_i32, %c0_i32_0 : i32, i32
  }
  func.func @transform_14(%arg0: i32) -> (i32, i32) {
    %c0_i32 = arith.constant 0 : i32
    %c0_i32_0 = arith.constant 0 : i32
    %c0_i32_1 = arith.constant 0 : i32
    return %c0_i32, %c0_i32_0 : i32, i32
  }
  func.func @transform_15(%arg0: i32) -> (i32, i32) {
    %c0_i32 = arith.constant 0 : i32
    %c0_i32_0 = arith.constant 0 : i32
    %c0_i32_1 = arith.constant 0 : i32
    return %c0_i32, %c0_i32_0 : i32, i32
  }
  func.func @transform_16(%arg0: i32) -> (i32, i32) {
    %c0_i32 = arith.constant 0 : i32
    %c0_i32_0 = arith.constant 0 : i32
    %c0_i32_1 = arith.constant 0 : i32
    return %c0_i32, %c0_i32_0 : i32, i32
  }
  func.func @transform_17(%arg0: i32) -> (i32, i32) {
    %c0_i32 = arith.constant 0 : i32
    %c0_i32_0 = arith.constant 0 : i32
    %c0_i32_1 = arith.constant 0 : i32
    return %c0_i32, %c0_i32_0 : i32, i32
  }
  func.func @transform_18(%arg0: i32) -> (i32, i32) {
    %c0_i32 = arith.constant 0 : i32
    %c0_i32_0 = arith.constant 0 : i32
    %c0_i32_1 = arith.constant 0 : i32
    return %c0_i32, %c0_i32_0 : i32, i32
  }
  func.func @transform_19(%arg0: i32) -> (i32, i32) {
    %c0_i32 = arith.constant 0 : i32
    %c0_i32_0 = arith.constant 0 : i32
    %c0_i32_1 = arith.constant 0 : i32
    return %c0_i32, %c0_i32_0 : i32, i32
  }
  func.func @transform_20(%arg0: i32) -> (i32, i32) {
    %c0_i32 = arith.constant 0 : i32
    %c0_i32_0 = arith.constant 0 : i32
    %c0_i32_1 = arith.constant 0 : i32
    return %c0_i32, %c0_i32_0 : i32, i32
  }
  func.func @transform_21(%arg0: i32) -> (i32, i32) {
    %c0_i32 = arith.constant 0 : i32
    %c0_i32_0 = arith.constant 0 : i32
    return %arg0, %c0_i32 : i32, i32
  }
}

</mosaic_0001>

<bundles_post_ra>
// kernel: _lambda_.1
= control target key start
LH: loop header
LB: loop body
LE: loop exit
PB: predicated region body
PF: predicated region fallthrough
CT: control target
= control target key end

     0   :  { %s11656_s0 = inlined_call_operand.vmem [shape: f32[2,144,1], index: 0, kind: input, shape index: {}]   ;;  %s11657_s1 = inlined_call_operand.vmem [shape: f32[2,1,64], index: 1, kind: input, shape index: {}]   ;;  %s11658_s2 = inlined_call_operand.vmem [shape: f32[1,64], index: 2, kind: input, shape index: {}]   ;;  %s11659_s3 = inlined_call_operand.vmem [shape: bf16[2,64,128], index: 3, kind: input, shape index: {}]   ;;  %s11660_s4 = inlined_call_operand.vmem [shape: f32[1,128], index: 4, kind: input, shape index: {}]   ;;  %s11661_s5 = inlined_call_operand.vmem [shape: bf16[2,128,128], index: 5, kind: input, shape index: {}]   ;;  %s11662_s6 = inlined_call_operand.vmem [shape: f32[1,128], index: 6, kind: input, shape index: {}]   ;;  %s11663_s7 = inlined_call_operand.vmem [shape: bf16[2,128,256], index: 7, kind: input, shape index: {}]   ;;  %s11664_s8 = inlined_call_operand.vmem [shape: f32[1,256], index: 8, kind: input, shape index: {}]   ;;  %s11665_s9 = inlined_call_operand.vmem [shape: bf16[256,512], index: 9, kind: input, shape index: {}]   ;;  %s11666_s10 = inlined_call_operand.vmem [shape: bf16[128,512], index: 10, kind: input, shape index: {}]   ;;  %s11667_s11 = inlined_call_operand.vmem [shape: f32[1,512], index: 11, kind: input, shape index: {}]   ;;  %s11668_s12 = inlined_call_operand.vmem [shape: bf16[128,512], index: 12, kind: input, shape index: {}]   ;;  %s11669_s13 = inlined_call_operand.vmem [shape: bf16[128,512], index: 13, kind: input, shape index: {}]   ;;  %s11670_s14 = inlined_call_operand.vmem [shape: f32[1,512], index: 14, kind: input, shape index: {}]   ;;  %s11671_s15 = inlined_call_operand.vmem [shape: bf16[128,1024], index: 15, kind: input, shape index: {}]   ;;  %s11672_s16 = inlined_call_operand.vmem [shape: f32[1,1024], index: 16, kind: input, shape index: {}]   ;;  %s11673_s17 = inlined_call_operand.vmem [shape: bf16[1024,512], index: 17, kind: input, shape index: {}]   ;;  %s11674_s18 = inlined_call_operand.vmem [shape: f32[1,512], index: 18, kind: input, shape index: {}]   ;;  %s11675_s19 = inlined_call_operand.vmem [shape: bf16[512,128], index: 19, kind: input, shape index: {}]   ;;  %s11676_s20 = inlined_call_operand.vmem [shape: f32[1,128], index: 20, kind: input, shape index: {}]   ;;  %s11677_s21 = inlined_call_operand.vmem [shape: f32[16,128], index: 21, kind: output, shape index: {}]  }
   0x1   :  { %11682 = sst [smem:[#allocation5_spill]] %s11656_s0 }
   0x2   :  { %11683 = sst [smem:[#allocation6_spill]] %s11657_s1 }
   0x3   :  { %11684 = sst [smem:[#allocation7_spill]] %s11658_s2  ;;  %s9162_s2 = smov 0  }
   0x4   :  { %11685 = sst [smem:[#allocation8_spill]] %s11659_s3 }
   0x5   :  { %11686 = sst [smem:[#allocation9_spill]] %s11660_s4 }
   0x6   :  { %11687 = sst [smem:[#allocation10_spill]] %s11661_s5 }
   0x7 LB: > { %s7149_s25 = sadd.s32 4294967295, %s9020_s2   ;;  %p7153_p0 = scmp.ge.s32.totalorder %s9020_s2, 1  ;;  %s9020_s2 = sphi %s9162_s2, %s31_s2  }
   0x8   : > { %p587_p1 = scmp.lt.s32.totalorder %s9020_s2, 3 }
   0xa   : > { %p588_p2 = pnand %p7153_p0, %p587_p1 }
   0xb   : > { %p646_p3 = scmp.lt.s32.totalorder (!%p588_p2), %s7149_s25, 1  ;;  %s11688_s3 = sld [smem:[#allocation8_spill]] (!%p588_p2)  ;;  %v9046_v1 = vmov (!%p588_p2), 0   ;;  %v9047_v2 = vmov (!%p588_p2), 0.0   ;;  %vm9048_vm0 = vmmov (!%p588_p2), 0   ;;  %vm930_vm1 = vcmask (!%p588_p2), 523264  }
   0xc   : > { %591 = sbr.rel (%p588_p2) target bundleno = 3039 (0xbdf), region = 104  ;;  %8229 = vset.pattern.permute.xlu1 (!%p588_p2), %v9046_v1  ;;  %8228 = vset.pattern.permute.xlu0 (!%p588_p2), %v9046_v1  ;;  %s11689_s24 = sld [smem:[#allocation5_spill]] (!%p588_p2) }
   0xd   : > { %7909 = vmatprep.subr.bf16.mxu0 (!%p588_p2), %v9047_v2  ;;  %7953 = vmatprep.subr.bf16.mxu1 (!%p588_p2), %v9047_v2  ;;  %s11690_s29 = sld [smem:[#allocation6_spill]] (!%p588_p2)  ;;  %s11691_s5 = sld [smem:[#allocation7_spill]] (!%p588_p2) }
   0xe   : > { %7917 = vmatprep.mubr.msk.bf16.mxu0 (!%p588_p2), %vm9048_vm0, %v9047_v2  ;;  %7961 = vmatprep.mubr.msk.bf16.mxu1 (!%p588_p2), %vm9048_vm0, %v9047_v2  ;;  %s10090_s27 = smov (!%p588_p2), 0  }
  0x11   : > { %v8230_v0 = vld [vmem:[%s11688_s3 + $0x20] sm:$0xff] (!%p588_p2)   ;;  %v8232_v10 = vld [vmem:[%s11688_s3 + $0x28] sm:$0xff] (!%p588_p2)   ;;  %v8234_v12 = vld [vmem:[%s11688_s3 + $0x30] sm:$0xff] (!%p588_p2)  }
  0x12   : > { %v8231_v3 = vld [vmem:[%s11688_s3] sm:$0xff] (!%p588_p2)   ;;  %7910 = vmatpush3.bf16.msra.mxu0 (!%p588_p2), %v8230_v0  ;;  %v8233_v11 = vld [vmem:[%s11688_s3 + $0x8] sm:$0xff] (!%p588_p2)   ;;  %v8235_v13 = vld [vmem:[%s11688_s3 + $0x10] sm:$0xff] (!%p588_p2)  }
  0x13   : > { %s11697_s25 = smov (!%p646_p3, %s7149_s25), 1  ;;  %7954 = vmatpush3.bf16.msra.mxu1 %v8231_v3  ;;  %7911 = vmatprep.subr.bf16.mxu0 %v9047_v2  ;;  %v8236_v16 = vld [vmem:[%s11688_s3 + $0x38] sm:$0xff]   ;;  %v9241_v28 = vld [vmem:[%s11690_s29 + $0x1] ss:$0 sm:$0xff]  ;;  %v9246_v31 = vld [vmem:[%s11690_s29] ss:$0 sm:$0xff] }
  0x14   : > { %s8165_s0 = smul.u32 144, %s11697_s25  ;;  %s7155_s4 = sshll.u32 %s11697_s25, 3  ;;  %7955 = vmatprep.subr.bf16.mxu1 %v9047_v2  ;;  %v8237_v17 = vld [vmem:[%s11688_s3 + $0x18] sm:$0xff]   ;;  %v9257_v40 = vld [vmem:[%s11691_s5] ss:$0 sm:$0xff] }
  0x15   : > { %s9184_s22 = scalar_lea.vmem %s11677_s21, %s7155_s4  ;;  %s11693_s4 = sld [smem:[#allocation9_spill]] }
  0x16   : > { %s9190_s26 = scalar_lea.vmem %s11689_s24, %s8165_s0  ;;  %7912 = vmatpush3.bf16.msra.mxu0 %v8232_v10  ;;  %s11692_s24 = sld [smem:[#allocation10_spill]] }
  0x17   : > { %v658_v4 = vld [vmem:[%s9190_s26 + $0x10] sm:$0xff]  ;;  %v656_v5 = vld [vmem:[%s9190_s26] sm:$0xff]  ;;  %v659_v6 = vld [vmem:[%s9190_s26 + $0x18] sm:$0xff]  ;;  %7956 = vmatpush3.bf16.msra.mxu1 %v8233_v11  ;;  %7913 = vmatprep.subr.bf16.mxu0 %v9047_v2 }
  0x18   : > { %687 = vperm.xlu1 %8229, %v658_v4   ;;  %677 = vperm.xlu0 %8228, %v656_v5   ;;  %v657_v7 = vld [vmem:[%s9190_s26 + $0x8] sm:$0xff]  ;;  %v660_v9 = vld [vmem:[%s9190_s26 + $0x20] sm:$0xff]  ;;  %v663_v14 = vld [vmem:[%s9190_s26 + $0x38] sm:$0xff] }
  0x19   : > { %v661_v8 = vld [vmem:[%s9190_s26 + $0x28] sm:$0xff]  ;;  %v662_v15 = vld [vmem:[%s9190_s26 + $0x30] sm:$0xff]  ;;  %7957 = vmatprep.subr.bf16.mxu1 %v9047_v2  ;;  %v664_v19 = vld [vmem:[%s9190_s26 + $0x40] sm:$0xff] }
  0x1a   : > { %v665_v18 = vld [vmem:[%s9190_s26 + $0x48] sm:$0xff]  ;;  %7914 = vmatpush3.bf16.msra.mxu0 %v8234_v12  ;;  %v667_v20 = vld [vmem:[%s9190_s26 + $0x58] sm:$0xff]  ;;  %v666_v21 = vld [vmem:[%s9190_s26 + $0x50] sm:$0xff] }
  0x1b   : > { %7958 = vmatpush3.bf16.msra.mxu1 %v8235_v13  ;;  %7915 = vmatprep.subr.bf16.mxu0 %v9047_v2  ;;  %v669_v22 = vld [vmem:[%s9190_s26 + $0x68] sm:$0xff]  ;;  %v668_v23 = vld [vmem:[%s9190_s26 + $0x60] sm:$0xff]  ;;  %v671_v24 = vld [vmem:[%s9190_s26 + $0x78] sm:$0xff] }
  0x1c   : > { %692 = vperm.xlu1 %8229, %v659_v6   ;;  %682 = vperm.xlu0 %8228, %v657_v7   ;;  %v670_v25 = vld [vmem:[%s9190_s26 + $0x70] sm:$0xff]  ;;  %v673_v26 = vld [vmem:[%s9190_s26 + $0x88] sm:$0xff]  ;;  %v672_v27 = vld [vmem:[%s9190_s26 + $0x80] sm:$0xff] }
  0x1d   : > { %7959 = vmatprep.subr.bf16.mxu1 %v9047_v2  ;;  %v8238_v62 = vld [vmem:[%s11692_s24 + $0x40] sm:$0xff]   ;;  %v8241_v10 = vld [vmem:[%s11692_s24 + $0x8] sm:$0xff]  }
  0x1e   : > { %7916 = vmatpush3.bf16.msra.mxu0 %v8236_v16  ;;  %v8239_v63 = vld [vmem:[%s11692_s24] sm:$0xff]  }
  0x1f   : > { %7960 = vmatpush3.bf16.msra.mxu1 %v8237_v17  ;;  %7997 = vmatprep.subr.bf16.mxu0 %v9047_v2 }
  0x20   : > { %702 = vperm.xlu1 %8229, %v661_v8   ;;  %697 = vperm.xlu0 %8228, %v660_v9   ;;  %v8240_v9 = vld [vmem:[%s11692_s24 + $0x48] sm:$0xff]  }
  0x21   : > { %8049 = vmatprep.subr.bf16.mxu1 %v9047_v2 }
  0x24   : > { %712 = vperm.xlu1 %8229, %v663_v14   ;;  %707 = vperm.xlu0 %8228, %v662_v15  }
  0x28   : > { %722 = vperm.xlu1 %8229, %v665_v18   ;;  %717 = vperm.xlu0 %8228, %v664_v19  }
  0x2c   : > { %732 = vperm.xlu1 %8229, %v667_v20   ;;  %727 = vperm.xlu0 %8228, %v666_v21  }
  0x30   : > { %742 = vperm.xlu1 %8229, %v669_v22   ;;  %737 = vperm.xlu0 %8228, %v668_v23   ;;  %v8242_v23 = vld [vmem:[%s11692_s24 + $0x50] sm:$0xff]  }
  0x34   : > { %752 = vperm.xlu1 %8229, %v671_v24   ;;  %747 = vperm.xlu0 %8228, %v670_v25   ;;  %v8243_v24 = vld [vmem:[%s11692_s24 + $0x10] sm:$0xff]  }
  0x38   : > { %787 = vperm.xlu1 %8229, %v673_v26   ;;  %757 = vperm.xlu0 %8228, %v672_v27  }
  0x97   : > { %v688_v29 = vpop.permute.xlu1 %687  ;;  %v678_v30 = vpop.permute.xlu0 %677 }
  0x98   : > { %v797_v32 = vmul.f32 %v9241_v28, %v688_v29  ;;  %v768_v33 = vmul.f32 %v9246_v31, %v688_v29  ;;  %v766_v36 = vmul.f32 %v9246_v31, %v678_v30 }
  0x9b   : > { %v693_v34 = vpop.permute.xlu1 %692  ;;  %v683_v35 = vpop.permute.xlu0 %682 }
  0x9c   : > { %v798_v37 = vmul.f32 %v9241_v28, %v693_v34  ;;  %v767_v38 = vmul.f32 %v9246_v31, %v683_v35  ;;  %v796_v39 = vmul.f32 %v9241_v28, %v683_v35  ;;  %v769_v48 = vmul.f32 %v9246_v31, %v693_v34 }
  0x9e   : > { %v813_v41 = vadd.f32 %v796_v39, %v766_v36  ;;  %v814_v42 = vadd.f32 %v797_v32, %v767_v38  ;;  %v815_v45 = vadd.f32 %v798_v37, %v768_v33 }
  0x9f   : > { %v703_v43 = vpop.permute.xlu1 %702  ;;  %v698_v44 = vpop.permute.xlu0 %697 }
  0xa0   : > { %v837_v46 = vadd.f32 %v9257_v40, %v813_v41  ;;  %v838_v47 = vadd.f32 %v9257_v40, %v814_v42  ;;  %v799_v49 = vmul.f32 %v9241_v28, %v698_v44  ;;  %v839_v55 = vadd.f32 %v9257_v40, %v815_v45  ;;  %v8244_v41 = vld [vmem:[%s11692_s24 + $0x58] sm:$0xff]  }
  0xa1   : > { %v800_v56 = vmul.f32 %v9241_v28, %v703_v43  ;;  %v770_v57 = vmul.f32 %v9246_v31, %v698_v44  ;;  %v771_v0 = vmul.f32 %v9246_v31, %v703_v43  ;;  %v8245_v42 = vld [vmem:[%s11692_s24 + $0x18] sm:$0xff]  }
  0xa2   : > { %v854_v50 = vmax.f32 %v837_v46, 0.0  ;;  %v855_v51 = vmax.f32 %v838_v47, 0.0  ;;  %v816_v52 = vadd.f32 %v799_v49, %v769_v48  ;;  %v856_v6 = vmax.f32 %v839_v55, 0.0 }
  0xa3   : > { %v713_v53 = vpop.permute.xlu1 %712  ;;  %v708_v54 = vpop.permute.xlu0 %707  ;;  %v817_v5 = vadd.f32 %v800_v56, %v770_v57 }
  0xa4   : > { %v840_v58 = vadd.f32 %v9257_v40, %v816_v52  ;;  %v801_v59 = vmul.f32 %v9241_v28, %v708_v54  ;;  %v880_v60 = vpack.c.bf16 %v855_v51, %v854_v50  ;;  %v871_v61 = vpack.c.bf16 %v854_v50, %v9047_v2  ;;  %v8246_v52 = vld [vmem:[%s11692_s24 + $0x60] sm:$0xff]  }
  0xa5   : > { %v841_v13 = vadd.f32 %v9257_v40, %v817_v5  ;;  %v802_v14 = vmul.f32 %v9241_v28, %v713_v53  ;;  %v772_v15 = vmul.f32 %v9246_v31, %v708_v54  ;;  %v872_v19 = vpack.c.bf16 %v856_v6, %v855_v51  ;;  %v8247_v54 = vld [vmem:[%s11692_s24 + $0x20] sm:$0xff]  }
  0xa6   : > { %7918 = vmatmul.mubr.msk.bf16.vlgmr.msra.gmra.mrb[0].mxu0 %vm930_vm1, %v880_v60  ;;  %7962 = vmatmul.mubr.msk.bf16.vlgmr.msra.gmra.mrb[0].mxu1 %vm930_vm1, %v871_v61  ;;  %v857_v7 = vmax.f32 %v840_v58, 0.0  ;;  %v818_v8 = vadd.f32 %v801_v59, %v771_v0  ;;  %v773_v20 = vmul.f32 %v9246_v31, %v713_v53  ;;  %v8249_v0 = vld [vmem:[%s11692_s24 + $0x28] sm:$0xff]  }
  0xa7   : > { %v723_v3 = vpop.permute.xlu1 %722  ;;  %v718_v4 = vpop.permute.xlu0 %717  ;;  %7921 = vmatprep.mubr.msk.bf16.mxu0 %vm9048_vm0, %v9047_v2  ;;  %7965 = vmatprep.mubr.msk.bf16.mxu1 %vm9048_vm0, %v9047_v2  ;;  %v819_v25 = vadd.f32 %v802_v14, %v772_v15  ;;  %v858_v26 = vmax.f32 %v841_v13, 0.0 }
  0xa8   : > { %7998 = vmatpush3.bf16.msra.mxu0 %v8238_v62  ;;  %8050 = vmatpush3.bf16.msra.mxu1 %v8239_v63  ;;  %v9298_v16 = vadd.f32 %v9257_v40, %v818_v8  ;;  %v803_v17 = vmul.f32 %v9241_v28, %v718_v4  ;;  %v881_v18 = vpack.c.bf16 %v857_v7, %v856_v6  ;;  %v8248_v63 = vld [vmem:[%s11692_s24 + $0x68] sm:$0xff]  }
  0xa9   : > { %7999 = vmatprep.subr.bf16.mxu0 %v9047_v2  ;;  %8051 = vmatprep.subr.bf16.mxu1 %v9047_v2  ;;  %v843_v33 = vadd.f32 %v9257_v40, %v819_v25  ;;  %v804_v34 = vmul.f32 %v9241_v28, %v723_v3  ;;  %v774_v35 = vmul.f32 %v9246_v31, %v718_v4 }
  0xaa   : > { %v859_v27 = vmax.f32 %v9298_v16, 0.0  ;;  %v820_v29 = vadd.f32 %v803_v17, %v773_v20  ;;  %v873_v39 = vpack.c.bf16 %v858_v26, %v857_v7  ;;  %v775_v43 = vmul.f32 %v9246_v31, %v723_v3 }
  0xab   : > { %v9288_v11 = vpop.permute.xlu1 %732  ;;  %v9290_v12 = vpop.permute.xlu0 %727  ;;  %v821_v46 = vadd.f32 %v804_v34, %v774_v35  ;;  %v860_v49 = vmax.f32 %v843_v33, 0.0 }
  0xac   : > { %8000 = vmatpush3.bf16.msra.mxu0 %v8240_v9  ;;  %8052 = vmatpush3.bf16.msra.mxu1 %v8241_v10  ;;  %v844_v36 = vadd.f32 %v9257_v40, %v820_v29  ;;  %v805_v37 = vmul.f32 %v9241_v28, %v9290_v12  ;;  %v882_v38 = vpack.c.bf16 %v859_v27, %v858_v26 }
  0xad   : > { %8001 = vmatprep.subr.bf16.mxu0 %v9047_v2  ;;  %8053 = vmatprep.subr.bf16.mxu1 %v9047_v2  ;;  %v845_v55 = vadd.f32 %v9257_v40, %v821_v46  ;;  %v806_v56 = vmul.f32 %v9241_v28, %v9288_v11  ;;  %v776_v57 = vmul.f32 %v9246_v31, %v9290_v12  ;;  %v8252_v46 = vld [vmem:[%s11692_s24 + $0x78] sm:$0xff]  }
  0xae   : > { %7922 = vmatmul.mubr.msk.bf16.gmra.mrb[4].mxu0 %vm930_vm1, %v881_v18  ;;  %7966 = vmatmul.mubr.msk.bf16.gmra.mrb[4].mxu1 %vm930_vm1, %v872_v19  ;;  %v861_v50 = vmax.f32 %v844_v36, 0.0  ;;  %v822_v51 = vadd.f32 %v805_v37, %v775_v43  ;;  %v874_v62 = vpack.c.bf16 %v860_v49, %v859_v27  ;;  %v777_v3 = vmul.f32 %v9246_v31, %v9288_v11  ;;  %v8250_v43 = vld [vmem:[%s11692_s24 + $0x70] sm:$0xff]  }
  0xaf   : > { %v9304_v21 = vpop.permute.xlu1 %742  ;;  %v9306_v22 = vpop.permute.xlu0 %737  ;;  %7925 = vmatprep.mubr.msk.bf16.mxu0 %vm9048_vm0, %v9047_v2  ;;  %7969 = vmatprep.mubr.msk.bf16.mxu1 %vm9048_vm0, %v9047_v2  ;;  %v823_v4 = vadd.f32 %v806_v56, %v776_v57  ;;  %v862_v5 = vmax.f32 %v845_v55, 0.0 }
  0xb0   : > { %8002 = vmatpush3.bf16.msra.mxu0 %v8242_v23  ;;  %8054 = vmatpush3.bf16.msra.mxu1 %v8243_v24  ;;  %v846_v59 = vadd.f32 %v9257_v40, %v822_v51  ;;  %v807_v60 = vmul.f32 %v9241_v28, %v9306_v22  ;;  %v883_v61 = vpack.c.bf16 %v861_v50, %v860_v49 }
  0xb1   : > { %8003 = vmatprep.subr.bf16.mxu0 %v9047_v2  ;;  %8055 = vmatprep.subr.bf16.mxu1 %v9047_v2  ;;  %v847_v8 = vadd.f32 %v9257_v40, %v823_v4  ;;  %v808_v9 = vmul.f32 %v9241_v28, %v9304_v21  ;;  %v778_v10 = vmul.f32 %v9246_v31, %v9306_v22 }
  0xb2   : > { %v863_v6 = vmax.f32 %v846_v59, 0.0  ;;  %v824_v7 = vadd.f32 %v807_v60, %v777_v3  ;;  %v875_v14 = vpack.c.bf16 %v862_v5, %v861_v50  ;;  %v779_v15 = vmul.f32 %v9246_v31, %v9304_v21  ;;  %v9462_v50 = vld [vmem:[%s11693_s4] ss:$0 sm:$0xff] }
  0xb3   : > { %v9321_v30 = vpop.permute.xlu1 %752  ;;  %v9323_v32 = vpop.permute.xlu0 %747  ;;  %v825_v16 = vadd.f32 %v808_v9, %v778_v10  ;;  %v864_v17 = vmax.f32 %v847_v8, 0.0 }
  0xb4   : > { %8004 = vmatpush3.bf16.msra.mxu0 %v8244_v41  ;;  %8056 = vmatpush3.bf16.msra.mxu1 %v8245_v42  ;;  %v848_v11 = vadd.f32 %v9257_v40, %v824_v7  ;;  %v809_v12 = vmul.f32 %v9241_v28, %v9323_v32  ;;  %v884_v13 = vpack.c.bf16 %v863_v6, %v862_v5 }
  0xb5   : > { %8005 = vmatprep.subr.bf16.mxu0 %v9047_v2  ;;  %8057 = vmatprep.subr.bf16.mxu1 %v9047_v2  ;;  %v849_v20 = vadd.f32 %v9257_v40, %v825_v16  ;;  %v810_v22 = vmul.f32 %v9241_v28, %v9321_v30  ;;  %v780_v21 = vmul.f32 %v9246_v31, %v9323_v32 }
  0xb6   : > { %7926 = vmatmul.mubr.msk.bf16.gmra.mrb[8].mxu0 %vm930_vm1, %v882_v38  ;;  %7970 = vmatmul.mubr.msk.bf16.gmra.mrb[8].mxu1 %vm930_vm1, %v873_v39  ;;  %v865_v18 = vmax.f32 %v848_v11, 0.0  ;;  %v826_v19 = vadd.f32 %v809_v12, %v779_v15  ;;  %v876_v26 = vpack.c.bf16 %v864_v17, %v863_v6  ;;  %v781_v27 = vmul.f32 %v9246_v31, %v9321_v30 }
  0xb7   : > { %v788_v44 = vpop.permute.xlu1 %787  ;;  %v9342_v45 = vpop.permute.xlu0 %757  ;;  %7929 = vmatprep.mubr.msk.bf16.mxu0 %vm9048_vm0, %v9047_v2  ;;  %7973 = vmatprep.mubr.msk.bf16.mxu1 %vm9048_vm0, %v9047_v2  ;;  %v866_v29 = vmax.f32 %v849_v20, 0.0  ;;  %v827_v32 = vadd.f32 %v810_v22, %v780_v21  ;;  %v8254_v20 = vld [vmem:[%s11663_s7 + $0x80] ss:$8 sps:$4 sm:$0xff]  }
  0xb8   : > { %v812_v47 = vmul.f32 %v9241_v28, %v788_v44  ;;  %v782_v48 = vmul.f32 %v9246_v31, %v9342_v45  ;;  %8006 = vmatpush3.bf16.msra.mxu0 %v8246_v52  ;;  %8058 = vmatpush3.bf16.msra.mxu1 %v8247_v54  ;;  %v850_v23 = vadd.f32 %v9257_v40, %v826_v19  ;;  %v8251_v44 = vld [vmem:[%s11692_s24 + $0x30] sm:$0xff]  }
  0xb9   : > { %8007 = vmatprep.subr.bf16.mxu0 %v9047_v2  ;;  %8059 = vmatprep.subr.bf16.mxu1 %v9047_v2  ;;  %v811_v24 = vmul.f32 %v9241_v28, %v9342_v45  ;;  %v885_v25 = vpack.c.bf16 %v865_v18, %v864_v17  ;;  %v851_v28 = vadd.f32 %v9257_v40, %v827_v32  ;;  %v8253_v45 = vld [vmem:[%s11692_s24 + $0x38] sm:$0xff]  }
  0xba   : > { %v829_v53 = vadd.f32 %v812_v47, %v782_v48  ;;  %v867_v33 = vmax.f32 %v850_v23, 0.0  ;;  %v877_v31 = vpack.c.bf16 %v866_v29, %v865_v18  ;;  %v8256_v47 = vld [vmem:[%s11663_s7 + $0x84] ss:$8 sps:$4 sm:$0xff]  }
  0xbb   : > { %v828_v34 = vadd.f32 %v811_v24, %v781_v27  ;;  %v868_v30 = vmax.f32 %v851_v28, 0.0 }
  0xbc   : > { %v9365_v58 = vadd.f32 %v9257_v40, %v829_v53  ;;  %8008 = vmatpush3.bf16.msra.mxu0 %v8248_v63  ;;  %8060 = vmatpush3.bf16.msra.mxu1 %v8249_v0  ;;  %v886_v36 = vpack.c.bf16 %v867_v33, %v866_v29 }
  0xbd   : > { %8009 = vmatprep.subr.bf16.mxu0 %v9047_v2  ;;  %8061 = vmatprep.subr.bf16.mxu1 %v9047_v2  ;;  %v852_v35 = vadd.f32 %v9257_v40, %v828_v34  ;;  %v878_v39 = vpack.c.bf16 %v868_v30, %v867_v33 }
  0xbe   : > { %7930 = vmatmul.mubr.msk.bf16.gmra.mrb[12].mxu0 %vm930_vm1, %v883_v61  ;;  %7974 = vmatmul.mubr.msk.bf16.gmra.mrb[12].mxu1 %vm930_vm1, %v874_v62  ;;  %v870_v40 = vmax.f32 %v9365_v58, 0.0 }
  0xbf   : > { %7933 = vmatprep.mubr.msk.bf16.mxu0 %vm9048_vm0, %v9047_v2  ;;  %7977 = vmatprep.mubr.msk.bf16.mxu1 %vm9048_vm0, %v9047_v2  ;;  %v869_v37 = vmax.f32 %v852_v35, 0.0 }
  0xc0   : > { %v888_v42 = vpack.c.bf16 %v9047_v2, %v870_v40  ;;  %8010 = vmatpush3.bf16.msra.mxu0 %v8250_v43  ;;  %8062 = vmatpush3.bf16.msra.mxu1 %v8251_v44 }
  0xc1   : > { %v887_v38 = vpack.c.bf16 %v869_v37, %v868_v30  ;;  %v879_v41 = vpack.c.bf16 %v870_v40, %v869_v37  ;;  %8011 = vmatprep.subr.bf16.mxu0 %v9047_v2  ;;  %8063 = vmatprep.subr.bf16.mxu1 %v9047_v2  ;;  %v8262_v37 = vld [vmem:[%s11663_s7 + $0xa4] ss:$8 sps:$4 sm:$0xff]  }
  0xc4   : > { %8064 = vmatpush3.bf16.msra.mxu1 %v8253_v45  ;;  %8012 = vmatpush3.bf16.msra.mxu0 %v8252_v46 }
  0xc5   : > { %1812 = vmatprep.subr.bf16.mxu0 %v8256_v47 }
  0xc6   : > { %7934 = vmatmul.mubr.msk.bf16.gmra.mrb[16].mxu0 %vm930_vm1, %v884_v13  ;;  %7978 = vmatmul.mubr.msk.bf16.gmra.mrb[16].mxu1 %vm930_vm1, %v875_v14 }
  0xc7   : > { %7937 = vmatprep.mubr.msk.bf16.mxu0 %vm9048_vm0, %v9047_v2  ;;  %7981 = vmatprep.mubr.msk.bf16.mxu1 %vm9048_vm0, %v9047_v2 }
  0xce   : > { %7938 = vmatmul.mubr.msk.bf16.gmra.mrb[20].mxu0 %vm930_vm1, %v885_v25  ;;  %7982 = vmatmul.mubr.msk.bf16.gmra.mrb[20].mxu1 %vm930_vm1, %v876_v26  ;;  %v8259_v26 = vld [vmem:[%s11663_s7 + $0x94] ss:$8 sps:$4 sm:$0xff]  }
  0xcf   : > { %7941 = vmatprep.mubr.msk.bf16.mxu0 %vm9048_vm0, %v9047_v2  ;;  %7985 = vmatprep.mubr.msk.bf16.mxu1 %vm9048_vm0, %v9047_v2 }
  0xd6   : > { %7942 = vmatmul.mubr.msk.bf16.gmra.mrb[24].mxu0 %vm930_vm1, %v886_v36  ;;  %7986 = vmatmul.mubr.msk.bf16.gmra.mrb[24].mxu1 %vm930_vm1, %v877_v31  ;;  %v8257_v36 = vld [vmem:[%s11663_s7 + $0x90] ss:$8 sps:$4 sm:$0xff]  }
  0xd7   : > { %7945 = vmatprep.mubr.msk.bf16.mxu0 %vm9048_vm0, %v9047_v2  ;;  %7989 = vmatprep.mubr.msk.bf16.mxu1 %vm9048_vm0, %v9047_v2 }
  0xde   : > { %7946 = vmatmul.mubr.msk.bf16.gmra.mrb[28].mxu0 %vm930_vm1, %v887_v38  ;;  %7990 = vmatmul.mubr.msk.bf16.gmra.mrb[28].mxu1 %vm930_vm1, %v878_v39 }
  0xdf   : > { %7949 = vmatprep.mubr.msk.bf16.mxu0 %vm9048_vm0, %v9047_v2  ;;  %7993 = vmatprep.mubr.msk.bf16.mxu1 %vm9048_vm0, %v9047_v2 }
  0xe6   : > { %7950 = vmatmul.mubr.msk.bf16.gmra.mrb[32].mxu0 %vm930_vm1, %v888_v42  ;;  %7994 = vmatmul.mubr.msk.bf16.gmra.mrb[32].mxu1 %vm930_vm1, %v879_v41  ;;  %v8260_v42 = vld [vmem:[%s11663_s7 + $0xa0] ss:$8 sps:$4 sm:$0xff]  }
  0xe7   : > { %8065 = vmatprep.mubr.msk.bf16.mxu1 %vm9048_vm0, %v9047_v2  ;;  %8013 = vmatprep.mubr.msk.bf16.mxu0 %vm9048_vm0, %v9047_v2 }
 0x179   : > { %v992_v48 = vpop.f32.mrb[0].mxu0  ;;  %v1148_v49 = vpop.f32.mrb[0].mxu1 }
 0x17a   : > { %v1149_v51 = vadd.f32 %v1148_v49, %v992_v48  ;;  %v7919_v52 = vpop.f32.mrb[1].mxu0  ;;  %v7963_v53 = vpop.f32.mrb[1].mxu1  ;;  %v8265_v48 = vld [vmem:[%s11663_s7 + $0xb4] ss:$8 sps:$4 sm:$0xff]  }
 0x17b   : > { %v995_v54 = vpop.f32.mrb[2].mxu0  ;;  %v1151_v55 = vpop.f32.mrb[2].mxu1 }
 0x17c   : > { %v1226_v56 = vadd.f32 %v9462_v50, %v1149_v51  ;;  %v1152_v57 = vadd.f32 %v1151_v55, %v995_v54  ;;  %v7920_v58 = vpop.f32.mrb[3].mxu0  ;;  %v7964_v59 = vpop.f32.mrb[3].mxu1 }
 0x17e   : > { %v1227_v60 = vadd.f32 %v9462_v50, %v1152_v57  ;;  %v1244_v61 = vmax.f32 %v1226_v56, 0.0  ;;  %v8263_v57 = vld [vmem:[%s11663_s7 + $0xb0] ss:$8 sps:$4 sm:$0xff]  }
 0x180   : > { %v1245_v62 = vmax.f32 %v1227_v60, 0.0  ;;  %v8268_v60 = vld [vmem:[%s11663_s7 + $0xc4] ss:$8 sps:$4 sm:$0xff]  }
 0x181   : > { %v1000_v63 = vpop.f32.mrb[4].mxu0  ;;  %v1156_v0 = vpop.f32.mrb[4].mxu1 }
 0x182   : > { %v1262_v3 = vmax.f32 %v1244_v61, %v1245_v62  ;;  %v1157_v4 = vadd.f32 %v1156_v0, %v1000_v63  ;;  %v7923_v5 = vpop.f32.mrb[5].mxu0  ;;  %v7967_v6 = vpop.f32.mrb[5].mxu1 }
 0x183   : > { %v1003_v7 = vpop.f32.mrb[6].mxu0  ;;  %v1159_v8 = vpop.f32.mrb[6].mxu1 }
 0x184   : > { %v1279_v9 = vpack.c.bf16 %v1262_v3, %v9047_v2  ;;  %v1228_v10 = vadd.f32 %v9462_v50, %v1157_v4  ;;  %v1160_v11 = vadd.f32 %v1159_v8, %v1003_v7  ;;  %v7924_v12 = vpop.f32.mrb[7].mxu0  ;;  %v7968_v13 = vpop.f32.mrb[7].mxu1 }
 0x186   : > { %v1246_v14 = vmax.f32 %v1228_v10, 0.0  ;;  %v1229_v15 = vadd.f32 %v9462_v50, %v1160_v11  ;;  %8066 = vmatmul.mubr.bf16.vlgmr.msra.gmra.mrb[36].mxu1 %v1279_v9  ;;  %v8271_v9 = vld [vmem:[%s11663_s7 + $0xd4] ss:$8 sps:$4 sm:$0xff]  }
 0x187   : > { %8069 = vmatprep.mubr.msk.bf16.mxu1 %vm9048_vm0, %v9047_v2 }
 0x188   : > { %v1263_v16 = vmax.f32 %v1245_v62, %v1246_v14  ;;  %v1247_v17 = vmax.f32 %v1229_v15, 0.0 }
 0x189   : > { %v1008_v18 = vpop.f32.mrb[8].mxu0  ;;  %v1164_v19 = vpop.f32.mrb[8].mxu1 }
 0x18a   : > { %v1288_v22 = vpack.c.bf16 %v1263_v16, %v1262_v3  ;;  %v1264_v21 = vmax.f32 %v1246_v14, %v1247_v17  ;;  %v1165_v23 = vadd.f32 %v1164_v19, %v1008_v18  ;;  %v7927_v24 = vpop.f32.mrb[9].mxu0  ;;  %v7971_v25 = vpop.f32.mrb[9].mxu1  ;;  %v8266_v3 = vld [vmem:[%s11663_s7 + $0xc0] ss:$8 sps:$4 sm:$0xff]  }
 0x18b   : > { %v1011_v27 = vpop.f32.mrb[10].mxu0  ;;  %v1167_v29 = vpop.f32.mrb[10].mxu1  ;;  %v8272_v25 = vld [vmem:[%s11663_s7 + $0xe0] ss:$8 sps:$4 sm:$0xff]  }
 0x18c   : > { %v1230_v32 = vadd.f32 %v9462_v50, %v1165_v23  ;;  %v1168_v33 = vadd.f32 %v1167_v29, %v1011_v27  ;;  %v7928_v34 = vpop.f32.mrb[11].mxu0  ;;  %v7972_v28 = vpop.f32.mrb[11].mxu1  ;;  %8014 = vmatmul.mubr.bf16.vlgmr.msra.gmra.mrb[36].mxu0 %v1288_v22  ;;  %v1280_v35 = vpack.c.bf16 %v1264_v21, %v1263_v16 }
 0x18d   : > { %8017 = vmatprep.mubr.msk.bf16.mxu0 %vm9048_vm0, %v9047_v2  ;;  %1813 = vmatpush1.bf16.msra.mxu0 %v8254_v20  ;;  %v8274_v20 = vld [vmem:[%s11663_s7 + $0xe4] ss:$8 sps:$4 sm:$0xff]  }
 0x18e   : > { %v1248_v31 = vmax.f32 %v1230_v32, 0.0  ;;  %v1231_v30 = vadd.f32 %v9462_v50, %v1168_v33  ;;  %8070 = vmatmul.mubr.bf16.gmra.mrb[40].mxu1 %v1280_v35  ;;  %1814 = vmatprep.subr.bf16.mxu0 %v8259_v26 }
 0x18f   : > { %8073 = vmatprep.mubr.msk.bf16.mxu1 %vm9048_vm0, %v9047_v2 }
 0x190   : > { %v1265_v38 = vmax.f32 %v1247_v17, %v1248_v31  ;;  %v1249_v39 = vmax.f32 %v1231_v30, 0.0  ;;  %v8269_v17 = vld [vmem:[%s11663_s7 + $0xd0] ss:$8 sps:$4 sm:$0xff]  }
 0x191   : > { %v1016_v40 = vpop.f32.mrb[12].mxu0  ;;  %v1172_v41 = vpop.f32.mrb[12].mxu1  ;;  %1815 = vmatpush1.bf16.msra.mxu0 %v8257_v36 }
 0x192   : > { %v1266_v43 = vmax.f32 %v1248_v31, %v1249_v39  ;;  %v1173_v44 = vadd.f32 %v1172_v41, %v1016_v40  ;;  %v7931_v45 = vpop.f32.mrb[13].mxu0  ;;  %v7975_v46 = vpop.f32.mrb[13].mxu1  ;;  %v1289_v47 = vpack.c.bf16 %v1265_v38, %v1264_v21  ;;  %1816 = vmatprep.subr.bf16.mxu0 %v8262_v37 }
 0x193   : > { %v1019_v49 = vpop.f32.mrb[14].mxu0  ;;  %v1175_v51 = vpop.f32.mrb[14].mxu1 }
 0x194   : > { %v1232_v52 = vadd.f32 %v9462_v50, %v1173_v44  ;;  %v1176_v53 = vadd.f32 %v1175_v51, %v1019_v49  ;;  %v7932_v54 = vpop.f32.mrb[15].mxu0  ;;  %v7976_v55 = vpop.f32.mrb[15].mxu1  ;;  %8018 = vmatmul.mubr.bf16.gmra.mrb[40].mxu0 %v1289_v47  ;;  %v1281_v56 = vpack.c.bf16 %v1266_v43, %v1265_v38 }
 0x195   : > { %8021 = vmatprep.mubr.msk.bf16.mxu0 %vm9048_vm0, %v9047_v2  ;;  %1817 = vmatpush1.bf16.msra.mxu0 %v8260_v42 }
 0x196   : > { %v1250_v58 = vmax.f32 %v1232_v52, 0.0  ;;  %v1233_v59 = vadd.f32 %v9462_v50, %v1176_v53  ;;  %8074 = vmatmul.mubr.bf16.gmra.mrb[44].mxu1 %v1281_v56  ;;  %1818 = vmatprep.subr.bf16.mxu0 %v8265_v48 }
 0x197   : > { %8077 = vmatprep.mubr.msk.bf16.mxu1 %vm9048_vm0, %v9047_v2 }
 0x198   : > { %v1267_v61 = vmax.f32 %v1249_v39, %v1250_v58  ;;  %v1251_v62 = vmax.f32 %v1233_v59, 0.0 }
 0x199   : > { %v1024_v63 = vpop.f32.mrb[16].mxu0  ;;  %v1180_v0 = vpop.f32.mrb[16].mxu1  ;;  %1819 = vmatpush1.bf16.msra.mxu0 %v8263_v57 }
 0x19a   : > { %v1268_v4 = vmax.f32 %v1250_v58, %v1251_v62  ;;  %v1181_v5 = vadd.f32 %v1180_v0, %v1024_v63  ;;  %v7935_v6 = vpop.f32.mrb[17].mxu0  ;;  %v7979_v7 = vpop.f32.mrb[17].mxu1  ;;  %v1290_v8 = vpack.c.bf16 %v1267_v61, %v1266_v43  ;;  %1820 = vmatprep.subr.bf16.mxu0 %v8268_v60 }
 0x19b   : > { %v1027_v10 = vpop.f32.mrb[18].mxu0  ;;  %v1183_v11 = vpop.f32.mrb[18].mxu1 }
 0x19c   : > { %v1234_v12 = vadd.f32 %v9462_v50, %v1181_v5  ;;  %v1184_v13 = vadd.f32 %v1183_v11, %v1027_v10  ;;  %v7936_v14 = vpop.f32.mrb[19].mxu0  ;;  %v7980_v15 = vpop.f32.mrb[19].mxu1  ;;  %8022 = vmatmul.mubr.bf16.gmra.mrb[44].mxu0 %v1290_v8  ;;  %v1282_v16 = vpack.c.bf16 %v1268_v4, %v1267_v61 }
 0x19d   : > { %8025 = vmatprep.mubr.msk.bf16.mxu0 %vm9048_vm0, %v9047_v2  ;;  %1821 = vmatpush1.bf16.msra.mxu0 %v8266_v3 }
 0x19e   : > { %v1252_v18 = vmax.f32 %v1234_v12, 0.0  ;;  %v1235_v19 = vadd.f32 %v9462_v50, %v1184_v13  ;;  %8078 = vmatmul.mubr.bf16.gmra.mrb[48].mxu1 %v1282_v16  ;;  %1822 = vmatprep.subr.bf16.mxu0 %v8271_v9 }
 0x19f   : > { %8081 = vmatprep.mubr.msk.bf16.mxu1 %vm9048_vm0, %v9047_v2 }
 0x1a0   : > { %v1269_v22 = vmax.f32 %v1251_v62, %v1252_v18  ;;  %v1253_v21 = vmax.f32 %v1235_v19, 0.0 }
 0x1a1   : > { %v1032_v23 = vpop.f32.mrb[20].mxu0  ;;  %v1188_v24 = vpop.f32.mrb[20].mxu1  ;;  %1823 = vmatpush1.bf16.msra.mxu0 %v8269_v17 }
 0x1a2   : > { %v1270_v26 = vmax.f32 %v1252_v18, %v1253_v21  ;;  %v1189_v27 = vadd.f32 %v1188_v24, %v1032_v23  ;;  %v7939_v29 = vpop.f32.mrb[21].mxu0  ;;  %v7983_v32 = vpop.f32.mrb[21].mxu1  ;;  %v1291_v33 = vpack.c.bf16 %v1269_v22, %v1268_v4  ;;  %1824 = vmatprep.subr.bf16.mxu0 %v8274_v20 }
 0x1a3   : > { %v1035_v34 = vpop.f32.mrb[22].mxu0  ;;  %v1191_v28 = vpop.f32.mrb[22].mxu1 }
 0x1a4   : > { %v1236_v35 = vadd.f32 %v9462_v50, %v1189_v27  ;;  %v1192_v36 = vadd.f32 %v1191_v28, %v1035_v34  ;;  %v7940_v31 = vpop.f32.mrb[23].mxu0  ;;  %v7984_v30 = vpop.f32.mrb[23].mxu1  ;;  %8026 = vmatmul.mubr.bf16.gmra.mrb[48].mxu0 %v1291_v33  ;;  %v1283_v37 = vpack.c.bf16 %v1270_v26, %v1269_v22 }
 0x1a5   : > { %8029 = vmatprep.mubr.msk.bf16.mxu0 %vm9048_vm0, %v9047_v2  ;;  %1825 = vmatpush1.bf16.msra.mxu0 %v8272_v25 }
 0x1a6   : > { %v1254_v38 = vmax.f32 %v1236_v35, 0.0  ;;  %v1237_v39 = vadd.f32 %v9462_v50, %v1192_v36  ;;  %8082 = vmatmul.mubr.bf16.gmra.mrb[52].mxu1 %v1283_v37 }
 0x1a7   : > { %8085 = vmatprep.mubr.msk.bf16.mxu1 %vm9048_vm0, %v9047_v2 }
 0x1a8   : > { %v1271_v40 = vmax.f32 %v1253_v21, %v1254_v38  ;;  %v1255_v41 = vmax.f32 %v1237_v39, 0.0  ;;  %v8275_v39 = vld [vmem:[%s11663_s7 + $0xf0] ss:$8 sps:$4 sm:$0xff]  }
 0x1a9   : > { %v1040_v42 = vpop.f32.mrb[24].mxu0  ;;  %v1196_v43 = vpop.f32.mrb[24].mxu1 }
 0x1aa   : > { %v1272_v44 = vmax.f32 %v1254_v38, %v1255_v41  ;;  %v1197_v45 = vadd.f32 %v1196_v43, %v1040_v42  ;;  %v7943_v46 = vpop.f32.mrb[25].mxu0  ;;  %v7987_v47 = vpop.f32.mrb[25].mxu1  ;;  %v1292_v48 = vpack.c.bf16 %v1271_v40, %v1270_v26 }
 0x1ab   : > { %v1043_v49 = vpop.f32.mrb[26].mxu0  ;;  %v1199_v51 = vpop.f32.mrb[26].mxu1  ;;  %v9568_v46 = vld [vmem:[%s11662_s6] ss:$0 sm:$0xff] }
 0x1ac   : > { %v1238_v52 = vadd.f32 %v9462_v50, %v1197_v45  ;;  %v1200_v53 = vadd.f32 %v1199_v51, %v1043_v49  ;;  %v7944_v54 = vpop.f32.mrb[27].mxu0  ;;  %v7988_v55 = vpop.f32.mrb[27].mxu1  ;;  %8030 = vmatmul.mubr.bf16.gmra.mrb[52].mxu0 %v1292_v48  ;;  %v1284_v56 = vpack.c.bf16 %v1272_v44, %v1271_v40  ;;  %v8280_v40 = vld [vmem:[%s11663_s7 + $0x4] ss:$8 sps:$4 sm:$0xff]  }
 0x1ad   : > { %8033 = vmatprep.mubr.msk.bf16.mxu0 %vm9048_vm0, %v9047_v2 }
 0x1ae   : > { %v1256_v57 = vmax.f32 %v1238_v52, 0.0  ;;  %v1239_v58 = vadd.f32 %v9462_v50, %v1200_v53  ;;  %8086 = vmatmul.mubr.bf16.gmra.mrb[56].mxu1 %v1284_v56 }
 0x1af   : > { %8089 = vmatprep.mubr.msk.bf16.mxu1 %vm9048_vm0, %v9047_v2 }
 0x1b0   : > { %v1273_v59 = vmax.f32 %v1255_v41, %v1256_v57  ;;  %v1257_v60 = vmax.f32 %v1239_v58, 0.0 }
 0x1b1   : > { %v1048_v61 = vpop.f32.mrb[28].mxu0  ;;  %v1204_v62 = vpop.f32.mrb[28].mxu1 }
 0x1b2   : > { %v1274_v63 = vmax.f32 %v1256_v57, %v1257_v60  ;;  %v1205_v0 = vadd.f32 %v1204_v62, %v1048_v61  ;;  %v7947_v3 = vpop.f32.mrb[29].mxu0  ;;  %v7991_v4 = vpop.f32.mrb[29].mxu1  ;;  %v1293_v5 = vpack.c.bf16 %v1273_v59, %v1272_v44  ;;  %v8278_v62 = vld [vmem:[%s11663_s7] ss:$8 sps:$4 sm:$0xff]  }
 0x1b3   : > { %v1051_v6 = vpop.f32.mrb[30].mxu0  ;;  %v1207_v7 = vpop.f32.mrb[30].mxu1  ;;  %v8283_v4 = vld [vmem:[%s11663_s7 + $0x14] ss:$8 sps:$4 sm:$0xff]  }
 0x1b4   : > { %v1240_v8 = vadd.f32 %v9462_v50, %v1205_v0  ;;  %v1208_v9 = vadd.f32 %v1207_v7, %v1051_v6  ;;  %v7948_v10 = vpop.f32.mrb[31].mxu0  ;;  %v7992_v11 = vpop.f32.mrb[31].mxu1  ;;  %8034 = vmatmul.mubr.bf16.gmra.mrb[56].mxu0 %v1293_v5  ;;  %v1285_v12 = vpack.c.bf16 %v1274_v63, %v1273_v59 }
 0x1b5   : > { %8037 = vmatprep.mubr.msk.bf16.mxu0 %vm9048_vm0, %v9047_v2 }
 0x1b6   : > { %v1258_v13 = vmax.f32 %v1240_v8, 0.0  ;;  %v1241_v14 = vadd.f32 %v9462_v50, %v1208_v9  ;;  %8090 = vmatmul.mubr.bf16.gmra.mrb[60].mxu1 %v1285_v12  ;;  %v8281_v12 = vld [vmem:[%s11663_s7 + $0x10] ss:$8 sps:$4 sm:$0xff]  }
 0x1b7   : > { %8093 = vmatprep.mubr.msk.bf16.mxu1 %vm9048_vm0, %v9047_v2 }
 0x1b8   : > { %v1275_v15 = vmax.f32 %v1257_v60, %v1258_v13  ;;  %v1259_v16 = vmax.f32 %v1241_v14, 0.0 }
 0x1b9   : > { %v1056_v17 = vpop.f32.mrb[32].mxu0  ;;  %v1212_v18 = vpop.f32.mrb[32].mxu1 }
 0x1ba   : > { %v1276_v19 = vmax.f32 %v1258_v13, %v1259_v16  ;;  %v1213_v20 = vadd.f32 %v1212_v18, %v1056_v17  ;;  %v7951_v22 = vpop.f32.mrb[33].mxu0  ;;  %v7995_v21 = vpop.f32.mrb[33].mxu1  ;;  %v1294_v23 = vpack.c.bf16 %v1275_v15, %v1274_v63 }
 0x1bb   : > { %v1059_v24 = vpop.f32.mrb[34].mxu0  ;;  %v1215_v25 = vpop.f32.mrb[34].mxu1 }
 0x1bc   : > { %v1242_v26 = vadd.f32 %v9462_v50, %v1213_v20  ;;  %v1216_v27 = vadd.f32 %v1215_v25, %v1059_v24  ;;  %v7952_v29 = vpop.f32.mrb[35].mxu0  ;;  %v7996_v32 = vpop.f32.mrb[35].mxu1  ;;  %8038 = vmatmul.mubr.bf16.gmra.mrb[60].mxu0 %v1294_v23  ;;  %v1286_v33 = vpack.c.bf16 %v1276_v19, %v1275_v15  ;;  %v8284_v20 = vld [vmem:[%s11663_s7 + $0x20] ss:$8 sps:$4 sm:$0xff]   ;;  %v8289_v24 = vld [vmem:[%s11663_s7 + $0x34] ss:$8 sps:$4 sm:$0xff]  }
 0x1bd   : > { %8041 = vmatprep.mubr.msk.bf16.mxu0 %vm9048_vm0, %v9047_v2 }
 0x1be   : > { %v1260_v34 = vmax.f32 %v1242_v26, 0.0  ;;  %v1243_v28 = vadd.f32 %v9462_v50, %v1216_v27  ;;  %8094 = vmatmul.mubr.bf16.gmra.mrb[64].mxu1 %v1286_v33  ;;  %v8277_v50 = vld [vmem:[%s11663_s7 + $0xf4] ss:$8 sps:$4 sm:$0xff]  }
 0x1bf   : > { %8097 = vmatprep.mubr.msk.bf16.mxu1 %vm9048_vm0, %v9047_v2  ;;  %1826 = vmatprep.subr.bf16.mxu0 %v8277_v50 }
 0x1c0   : > { %v1277_v35 = vmax.f32 %v1259_v16, %v1260_v34  ;;  %v1261_v36 = vmax.f32 %v1243_v28, 0.0  ;;  %1827 = vmatpush1.bf16.msra.mxu0 %v8275_v39  ;;  %v8286_v16 = vld [vmem:[%s11663_s7 + $0x24] ss:$8 sps:$4 sm:$0xff]   ;;  %v8287_v28 = vld [vmem:[%s11663_s7 + $0x30] ss:$8 sps:$4 sm:$0xff]  }
 0x1c1   : > { %2023 = vmatprep.subr.bf16.mxu0 %v8280_v40  ;;  %v8290_v39 = vld [vmem:[%s11663_s7 + $0x40] ss:$8 sps:$4 sm:$0xff]  }
 0x1c2   : > { %v1278_v31 = vmax.f32 %v1260_v34, %v1261_v36  ;;  %v1295_v30 = vpack.c.bf16 %v1277_v35, %v1276_v19 }
 0x1c4   : > { %8042 = vmatmul.mubr.bf16.gmra.mrb[64].mxu0 %v1295_v30  ;;  %v1287_v37 = vpack.c.bf16 %v1278_v31, %v1277_v35  ;;  %v1296_v38 = vpack.c.bf16 %v9047_v2, %v1278_v31  ;;  %v8292_v30 = vld [vmem:[%s11663_s7 + $0x44] ss:$8 sps:$4 sm:$0xff]  }
 0x1c5   : > { %8045 = vmatprep.mubr.msk.bf16.mxu0 %vm9048_vm0, %v9047_v2 }
 0x1c6   : > { %8098 = vmatmul.mubr.bf16.gmra.mrb[68].mxu1 %v1287_v37 }
 0x1cc   : > { %8046 = vmatmul.mubr.bf16.gmra.mrb[68].mxu0 %v1296_v38 }
 0x1cd   : > { %1844 = vmatprep.mubr.bf16.mxu0 %v9046_v1 }
 0x259   : > { %v1565_v41 = vpop.f32.mrb[36].mxu1 }
 0x25a   : > { %v8067_v42 = vpop.f32.mrb[37].mxu1 }
 0x25b   : > { %v1568_v43 = vpop.f32.mrb[38].mxu1 }
 0x25c   : > { %v8068_v44 = vpop.f32.mrb[39].mxu1 }
 0x25f   : > { %v1412_v45 = vpop.f32.mrb[36].mxu0 }
 0x260   : > { %v1566_v47 = vadd.f32 %v1565_v41, %v1412_v45  ;;  %v8015_v48 = vpop.f32.mrb[37].mxu0 }
 0x261   : > { %v1415_v49 = vpop.f32.mrb[38].mxu0  ;;  %v1573_v51 = vpop.f32.mrb[40].mxu1 }
 0x262   : > { %v9571_v52 = vadd.f32 %v9568_v46, %v1566_v47  ;;  %v1569_v53 = vadd.f32 %v1568_v43, %v1415_v49  ;;  %v8016_v54 = vpop.f32.mrb[39].mxu0  ;;  %v8071_v55 = vpop.f32.mrb[41].mxu1  ;;  %v8295_v43 = vld [vmem:[%s11663_s7 + $0x54] ss:$8 sps:$4 sm:$0xff]  }
 0x263   : > { %v1576_v56 = vpop.f32.mrb[42].mxu1  ;;  %v8293_v54 = vld [vmem:[%s11663_s7 + $0x50] ss:$8 sps:$4 sm:$0xff]  }
 0x264   : > { %v1644_v57 = vadd.f32 %v9568_v46, %v1569_v53  ;;  %v8072_v58 = vpop.f32.mrb[43].mxu1  ;;  %v1661_v59 = vmax.f32 %v9571_v52, 0.0  ;;  %v8332_v52 = vld [vmem:[%s11665_s9 + $0x140] ss:$16 sps:$4 sm:$0xff]  }
 0x265   : > { %v8298_v58 = vld [vmem:[%s11663_s7 + $0x64] ss:$8 sps:$4 sm:$0xff]  }
 0x266   : > { %v1662_v60 = vmax.f32 %v1644_v57, 0.0 }
 0x267   : > { %v1420_v61 = vpop.f32.mrb[40].mxu0 }
 0x268   : > { %v1689_v63 = vpack.c.bf16 %v1662_v60, %v1661_v59  ;;  %v1574_v0 = vadd.f32 %v1573_v51, %v1420_v61  ;;  %v8019_v3 = vpop.f32.mrb[41].mxu0 }
 0x269   : > { %v1423_v5 = vpop.f32.mrb[42].mxu0  ;;  %v1581_v6 = vpop.f32.mrb[44].mxu1 }
 0x26a   : > { %v1645_v7 = vadd.f32 %v9568_v46, %v1574_v0  ;;  %v1577_v8 = vadd.f32 %v1576_v56, %v1423_v5  ;;  %v8020_v9 = vpop.f32.mrb[43].mxu0  ;;  %v8075_v10 = vpop.f32.mrb[45].mxu1  ;;  %1845 = vmatmul.mubr.bf16.vlgmr.msra.gmra.mrb[72].mxu0 %v1689_v63  ;;  %v8296_v63 = vld [vmem:[%s11663_s7 + $0x60] ss:$8 sps:$4 sm:$0xff]   ;;  %v8301_v5 = vld [vmem:[%s11663_s7 + $0x74] ss:$8 sps:$4 sm:$0xff]  }
 0x26b   : > { %2024 = vmatpush1.bf16.msra.mxu0 %v8278_v62  ;;  %v1584_v11 = vpop.f32.mrb[46].mxu1  ;;  %1854 = vmatprep.mubr.bf16.mxu0 %v9046_v1 }
 0x26c   : > { %v1663_v13 = vmax.f32 %v1645_v7, 0.0  ;;  %v1646_v14 = vadd.f32 %v9568_v46, %v1577_v8  ;;  %v8076_v15 = vpop.f32.mrb[47].mxu1  ;;  %2025 = vmatprep.subr.bf16.mxu0 %v8283_v4 }
 0x26d   : > { %v8299_v15 = vld [vmem:[%s11663_s7 + $0x70] ss:$8 sps:$4 sm:$0xff]  }
 0x26e   : > { %v1664_v17 = vmax.f32 %v1646_v14, 0.0  ;;  %v9592_v18 = vpack.c.bf16 %v1663_v13, %v1662_v60 }
 0x26f   : > { %v1428_v19 = vpop.f32.mrb[44].mxu0  ;;  %2026 = vmatpush1.bf16.msra.mxu0 %v8281_v12  ;;  %v8302_v12 = vld [vmem:[%s11665_s9] ss:$16 sps:$4 sm:$0xff]  }
 0x270   : > { %v1582_v22 = vadd.f32 %v1581_v6, %v1428_v19  ;;  %v8023_v21 = vpop.f32.mrb[45].mxu0  ;;  %v1690_v23 = vpack.c.bf16 %v1664_v17, %v1663_v13  ;;  %2027 = vmatprep.subr.bf16.mxu0 %v8286_v16  ;;  %v8304_v13 = vld [vmem:[%s11665_s9 + $0x4] ss:$16 sps:$4 sm:$0xff]  }
 0x271   : > { %v1431_v25 = vpop.f32.mrb[46].mxu0  ;;  %v1589_v26 = vpop.f32.mrb[48].mxu1  ;;  %v8307_v16 = vld [vmem:[%s11665_s9 + $0x24] ss:$16 sps:$4 sm:$0xff]   ;;  %2702 = vmatprep.subr.bf16.mxu1 %v8304_v13 }
 0x272   : > { %v1647_v27 = vadd.f32 %v9568_v46, %v1582_v22  ;;  %v1585_v29 = vadd.f32 %v1584_v11, %v1431_v25  ;;  %v8024_v32 = vpop.f32.mrb[47].mxu0  ;;  %v8079_v33 = vpop.f32.mrb[49].mxu1  ;;  %1855 = vmatmul.mubr.bf16.gmra.mrb[76].mxu0 %v1690_v23  ;;  %2703 = vmatpush1.bf16.msra.mxu1 %v8302_v12  ;;  %v8305_v22 = vld [vmem:[%s11665_s9 + $0x20] ss:$16 sps:$4 sm:$0xff]  }
 0x273   : > { %v1592_v34 = vpop.f32.mrb[50].mxu1  ;;  %1864 = vmatprep.mubr.bf16.mxu0 %v9046_v1  ;;  %2028 = vmatpush1.bf16.msra.mxu0 %v8284_v20 }
 0x274   : > { %v1665_v35 = vmax.f32 %v1647_v27, 0.0  ;;  %v1648_v36 = vadd.f32 %v9568_v46, %v1585_v29  ;;  %v8080_v31 = vpop.f32.mrb[51].mxu1  ;;  %2029 = vmatprep.subr.bf16.mxu0 %v8289_v24  ;;  %2704 = vmatprep.subr.bf16.mxu1 %v8307_v16  ;;  %v8310_v24 = vld [vmem:[%s11665_s9 + $0x44] ss:$16 sps:$4 sm:$0xff]  }
 0x276   : > { %v1666_v37 = vmax.f32 %v1648_v36, 0.0  ;;  %v9609_v38 = vpack.c.bf16 %v1665_v35, %v1664_v17  ;;  %2705 = vmatpush1.bf16.msra.mxu1 %v8305_v22 }
 0x277   : > { %v1436_v50 = vpop.f32.mrb[48].mxu0  ;;  %2030 = vmatpush1.bf16.msra.mxu0 %v8287_v28  ;;  %2706 = vmatprep.subr.bf16.mxu1 %v8310_v24 }
 0x278   : > { %v1590_v40 = vadd.f32 %v1589_v26, %v1436_v50  ;;  %v8027_v41 = vpop.f32.mrb[49].mxu0  ;;  %v1691_v42 = vpack.c.bf16 %v1666_v37, %v1665_v35  ;;  %2031 = vmatprep.subr.bf16.mxu0 %v8292_v30  ;;  %v8313_v30 = vld [vmem:[%s11665_s9 + $0x64] ss:$16 sps:$4 sm:$0xff]  }
 0x279   : > { %v1439_v44 = vpop.f32.mrb[50].mxu0  ;;  %v1597_v45 = vpop.f32.mrb[52].mxu1  ;;  %v8311_v41 = vld [vmem:[%s11665_s9 + $0x60] ss:$16 sps:$4 sm:$0xff]  }
 0x27a   : > { %v1649_v47 = vadd.f32 %v9568_v46, %v1590_v40  ;;  %v1593_v48 = vadd.f32 %v1592_v34, %v1439_v44  ;;  %v8028_v49 = vpop.f32.mrb[51].mxu0  ;;  %v8083_v51 = vpop.f32.mrb[53].mxu1  ;;  %1865 = vmatmul.mubr.bf16.gmra.mrb[80].mxu0 %v1691_v42  ;;  %v8308_v34 = vld [vmem:[%s11665_s9 + $0x40] ss:$16 sps:$4 sm:$0xff]   ;;  %v8316_v44 = vld [vmem:[%s11665_s9 + $0x84] ss:$16 sps:$4 sm:$0xff]  }
 0x27b   : > { %v1600_v53 = vpop.f32.mrb[54].mxu1  ;;  %1874 = vmatprep.mubr.bf16.mxu0 %v9046_v1  ;;  %2032 = vmatpush1.bf16.msra.mxu0 %v8290_v39 }
 0x27c   : > { %v1667_v55 = vmax.f32 %v1649_v47, 0.0  ;;  %v1650_v56 = vadd.f32 %v9568_v46, %v1593_v48  ;;  %v8084_v57 = vpop.f32.mrb[55].mxu1  ;;  %2033 = vmatprep.subr.bf16.mxu0 %v8295_v43  ;;  %2707 = vmatpush1.bf16.msra.mxu1 %v8308_v34 }
 0x27d   : > { %2708 = vmatprep.subr.bf16.mxu1 %v8313_v30 }
 0x27e   : > { %v1668_v60 = vmax.f32 %v1650_v56, 0.0  ;;  %v9626_v61 = vpack.c.bf16 %v1667_v55, %v1666_v37 }
 0x27f   : > { %v1444_v62 = vpop.f32.mrb[52].mxu0  ;;  %2034 = vmatpush1.bf16.msra.mxu0 %v8293_v54  ;;  %v8314_v54 = vld [vmem:[%s11665_s9 + $0x80] ss:$16 sps:$4 sm:$0xff]  }
 0x280   : > { %v1598_v0 = vadd.f32 %v1597_v45, %v1444_v62  ;;  %v8031_v3 = vpop.f32.mrb[53].mxu0  ;;  %v1692_v4 = vpack.c.bf16 %v1668_v60, %v1667_v55  ;;  %2035 = vmatprep.subr.bf16.mxu0 %v8298_v58  ;;  %2709 = vmatpush1.bf16.msra.mxu1 %v8311_v41 }
 0x281   : > { %v1447_v6 = vpop.f32.mrb[54].mxu0  ;;  %v1605_v7 = vpop.f32.mrb[56].mxu1  ;;  %2710 = vmatprep.subr.bf16.mxu1 %v8316_v44 }
 0x282   : > { %v1651_v8 = vadd.f32 %v9568_v46, %v1598_v0  ;;  %v1601_v9 = vadd.f32 %v1600_v53, %v1447_v6  ;;  %v8032_v10 = vpop.f32.mrb[55].mxu0  ;;  %v8087_v11 = vpop.f32.mrb[57].mxu1  ;;  %1875 = vmatmul.mubr.bf16.gmra.mrb[84].mxu0 %v1692_v4  ;;  %v8317_v4 = vld [vmem:[%s11665_s9 + $0xa0] ss:$16 sps:$4 sm:$0xff]  }
 0x283   : > { %v1608_v14 = vpop.f32.mrb[58].mxu1  ;;  %1884 = vmatprep.mubr.bf16.mxu0 %v9046_v1  ;;  %2036 = vmatpush1.bf16.msra.mxu0 %v8296_v63 }
 0x284   : > { %v1669_v17 = vmax.f32 %v1651_v8, 0.0  ;;  %v1652_v19 = vadd.f32 %v9568_v46, %v1601_v9  ;;  %v8088_v20 = vpop.f32.mrb[59].mxu1  ;;  %2037 = vmatprep.subr.bf16.mxu0 %v8301_v5  ;;  %2711 = vmatpush1.bf16.msra.mxu1 %v8314_v54  ;;  %v8349_v54 = vld [vmem:[%s11665_s9 + $0x1e4] ss:$16 sps:$4 sm:$0xff]  }
 0x285   : > { %v8325_v20 = vld [vmem:[%s11665_s9 + $0xe4] ss:$16 sps:$4 sm:$0xff]  }
 0x286   : > { %v1670_v21 = vmax.f32 %v1652_v19, 0.0  ;;  %v9652_v23 = vpack.c.bf16 %v1669_v17, %v1668_v60  ;;  %v8319_v60 = vld [vmem:[%s11665_s9 + $0xa4] ss:$16 sps:$4 sm:$0xff]  }
 0x287   : > { %v1452_v25 = vpop.f32.mrb[56].mxu0  ;;  %2038 = vmatpush1.bf16.msra.mxu0 %v8299_v15  ;;  %2712 = vmatprep.subr.bf16.mxu1 %v8319_v60 }
 0x288   : > { %v1606_v26 = vadd.f32 %v1605_v7, %v1452_v25  ;;  %v8035_v27 = vpop.f32.mrb[57].mxu0  ;;  %v1693_v29 = vpack.c.bf16 %v1670_v21, %v1669_v17  ;;  %v8322_v7 = vld [vmem:[%s11665_s9 + $0xc4] ss:$16 sps:$4 sm:$0xff]   ;;  %2713 = vmatpush1.bf16.msra.mxu1 %v8317_v4 }
 0x289   : > { %v1455_v32 = vpop.f32.mrb[58].mxu0  ;;  %v1613_v33 = vpop.f32.mrb[60].mxu1  ;;  %2714 = vmatprep.subr.bf16.mxu1 %v8322_v7 }
 0x28a   : > { %v1653_v28 = vadd.f32 %v9568_v46, %v1606_v26  ;;  %v1609_v35 = vadd.f32 %v1608_v14, %v1455_v32  ;;  %v8036_v36 = vpop.f32.mrb[59].mxu0  ;;  %v8091_v31 = vpop.f32.mrb[61].mxu1  ;;  %1885 = vmatmul.mubr.bf16.gmra.mrb[88].mxu0 %v1693_v29  ;;  %v8320_v14 = vld [vmem:[%s11665_s9 + $0xc0] ss:$16 sps:$4 sm:$0xff]   ;;  %v8328_v32 = vld [vmem:[%s11665_s9 + $0x104] ss:$16 sps:$4 sm:$0xff]  }
 0x28b   : > { %v1616_v37 = vpop.f32.mrb[62].mxu1  ;;  %1894 = vmatprep.mubr.bf16.mxu0 %v9046_v1  ;;  %v8323_v26 = vld [vmem:[%s11665_s9 + $0xe0] ss:$16 sps:$4 sm:$0xff]  }
 0x28c   : > { %v1671_v50 = vmax.f32 %v1653_v28, 0.0  ;;  %v1654_v39 = vadd.f32 %v9568_v46, %v1609_v35  ;;  %v8092_v40 = vpop.f32.mrb[63].mxu1  ;;  %2715 = vmatpush1.bf16.msra.mxu1 %v8320_v14  ;;  %v8326_v31 = vld [vmem:[%s11665_s9 + $0x100] ss:$16 sps:$4 sm:$0xff]  }
 0x28d   : > { %2716 = vmatprep.subr.bf16.mxu1 %v8325_v20 }
 0x28e   : > { %v1672_v42 = vmax.f32 %v1654_v39, 0.0  ;;  %v9669_v43 = vpack.c.bf16 %v1671_v50, %v1670_v21  ;;  %v8331_v39 = vld [vmem:[%s11665_s9 + $0x124] ss:$16 sps:$4 sm:$0xff]  }
 0x28f   : > { %v1460_v45 = vpop.f32.mrb[60].mxu0 }
 0x290   : > { %v1614_v47 = vadd.f32 %v1613_v33, %v1460_v45  ;;  %v8039_v48 = vpop.f32.mrb[61].mxu0  ;;  %v1694_v49 = vpack.c.bf16 %v1672_v42, %v1671_v50  ;;  %2717 = vmatpush1.bf16.msra.mxu1 %v8323_v26 }
 0x291   : > { %v1463_v51 = vpop.f32.mrb[62].mxu0  ;;  %v1621_v53 = vpop.f32.mrb[64].mxu1  ;;  %2718 = vmatprep.subr.bf16.mxu1 %v8328_v32  ;;  %v9049_v48 = vmov 0.0|0.0  }
 0x292   : > { %v1655_v55 = vadd.f32 %v9568_v46, %v1614_v47  ;;  %v1617_v56 = vadd.f32 %v1616_v37, %v1463_v51  ;;  %v8040_v57 = vpop.f32.mrb[63].mxu0  ;;  %v8095_v58 = vpop.f32.mrb[65].mxu1  ;;  %1895 = vmatmul.mubr.bf16.gmra.mrb[92].mxu0 %v1694_v49  ;;  %v8341_v49 = vld [vmem:[%s11665_s9 + $0x1a0] ss:$16 sps:$4 sm:$0xff]   ;;  %v8346_v51 = vld [vmem:[%s11665_s9 + $0x1c4] ss:$16 sps:$4 sm:$0xff]  }
 0x293   : > { %v1624_v62 = vpop.f32.mrb[66].mxu1  ;;  %1904 = vmatprep.mubr.bf16.mxu0 %v9046_v1  ;;  %v2156_v57 = vlaneseq }
 0x294   : > { %v1673_v63 = vmax.f32 %v1655_v55, 0.0  ;;  %v1656_v0 = vadd.f32 %v9568_v46, %v1617_v56  ;;  %v8096_v3 = vpop.f32.mrb[67].mxu1  ;;  %2719 = vmatpush1.bf16.msra.mxu1 %v8326_v31  ;;  %v8347_v55 = vld [vmem:[%s11665_s9 + $0x1e0] ss:$16 sps:$4 sm:$0xff]   ;;  %v8352_v56 = vld [vmem:[%s11665_s9 + $0xc] ss:$16 sps:$4 sm:$0xff]  }
 0x295   : > { %2720 = vmatprep.subr.bf16.mxu1 %v8331_v39  ;;  %v9777_v58 = vshrl.u32 %v2156_v57, 7  ;;  %v2154_v3 = vld [vmem:[%s11664_s8] sm:$0x3] }
 0x296   : > { %v1674_v5 = vmax.f32 %v1656_v0, 0.0  ;;  %v9686_v6 = vpack.c.bf16 %v1673_v63, %v1672_v42  ;;  %v8329_v42 = vld [vmem:[%s11665_s9 + $0x120] ss:$16 sps:$4 sm:$0xff]  }
 0x297   : > { %v1468_v8 = vpop.f32.mrb[64].mxu0  ;;  %v9790_v4 = vsub.s32 1, %v9777_v58 }
 0x298   : > { %v1622_v9 = vadd.f32 %v1621_v53, %v1468_v8  ;;  %v8043_v10 = vpop.f32.mrb[65].mxu0  ;;  %v1695_v11 = vpack.c.bf16 %v1674_v5, %v1673_v63  ;;  %2721 = vmatpush1.bf16.msra.mxu1 %v8329_v42  ;;  %v8344_v53 = vld [vmem:[%s11665_s9 + $0x1c0] ss:$16 sps:$4 sm:$0xff]   ;;  %v9784_v63 = vsub.s32 0, %v9777_v58 }
 0x299   : > { %v1471_v12 = vpop.f32.mrb[66].mxu0  ;;  %v1629_v13 = vpop.f32.mrb[68].mxu1  ;;  %v9796_v7 = vrot.slane %v2154_v3, %v9790_v4 }
 0x29a   : > { %v1657_v15 = vadd.f32 %v9568_v46, %v1622_v9  ;;  %v1625_v16 = vadd.f32 %v1624_v62, %v1471_v12  ;;  %v8044_v17 = vpop.f32.mrb[67].mxu0  ;;  %v8099_v19 = vpop.f32.mrb[69].mxu1  ;;  %1905 = vmatmul.mubr.bf16.gmra.mrb[96].mxu0 %v1695_v11 }
 0x29b   : > { %v1632_v22 = vpop.f32.mrb[70].mxu1  ;;  %1914 = vmatprep.mubr.bf16.mxu0 %v9046_v1 }
 0x29c   : > { %v1675_v21 = vmax.f32 %v1657_v15, 0.0  ;;  %v1658_v24 = vadd.f32 %v9568_v46, %v1625_v16  ;;  %v8100_v25 = vpop.f32.mrb[71].mxu1 }
 0x29e   : > { %v1676_v27 = vmax.f32 %v1658_v24, 0.0  ;;  %v1686_v29 = vpack.c.bf16 %v1675_v21, %v1674_v5 }
 0x29f   : > { %v1476_v33 = vpop.f32.mrb[68].mxu0 }
 0x2a0   : > { %v1630_v34 = vadd.f32 %v1629_v13, %v1476_v33  ;;  %v8047_v28 = vpop.f32.mrb[69].mxu0  ;;  %v1696_v35 = vpack.c.bf16 %v1676_v27, %v1675_v21 }
 0x2a1   : > { %v1479_v36 = vpop.f32.mrb[70].mxu0 }
 0x2a2   : > { %v1659_v30 = vadd.f32 %v9568_v46, %v1630_v34  ;;  %v1633_v37 = vadd.f32 %v1632_v22, %v1479_v36  ;;  %v8048_v50 = vpop.f32.mrb[71].mxu0  ;;  %1915 = vmatmul.mubr.bf16.gmra.mrb[100].mxu0 %v1696_v35 }
 0x2a3   : > { %1924 = vmatprep.mubr.bf16.mxu0 %v9046_v1 }
 0x2a4   : > { %v1677_v40 = vmax.f32 %v1659_v30, 0.0  ;;  %v1660_v41 = vadd.f32 %v9568_v46, %v1633_v37  ;;  %v1679_v46 = vpack.c.bf16 %v1661_v59, %v9047_v2  ;;  %v8334_v59 = vld [vmem:[%s11665_s9 + $0x144] ss:$16 sps:$4 sm:$0xff]  }
 0x2a5   : > { %2722 = vmatprep.subr.bf16.mxu1 %v8334_v59 }
 0x2a6   : > { %v1678_v44 = vmax.f32 %v1660_v41, 0.0  ;;  %v1687_v45 = vpack.c.bf16 %v1677_v40, %v1676_v27  ;;  %2723 = vmatpush1.bf16.msra.mxu1 %v8332_v52 }
 0x2a8   : > { %v1697_v47 = vpack.c.bf16 %v1678_v44, %v1677_v40  ;;  %v1688_v2 = vpack.c.bf16 %v1678_v44, %v1678_v44  ;;  %v8350_v44 = vld [vmem:[%s11665_s9 + $0x8] ss:$16 sps:$4 sm:$0xff]  }
 0x2aa   : > { %1925 = vmatmul.mubr.bf16.gmra.mrb[104].mxu0 %v1697_v47 }
 0x2ab   : > { %1934 = vmatprep.mubr.bf16.mxu0 %v9046_v1 }
 0x2b2   : > { %1935 = vmatmul.mubr.bf16.gmra.mrb[108].mxu0 %v9049_v48  ;;  %v8355_v48 = vld [vmem:[%s11665_s9 + $0x2c] ss:$16 sps:$4 sm:$0xff]  }
 0x2b3   : > { %2055 = vmatprep.mubr.bf16.mxu0 %v9046_v1 }
 0x2ba   : > { %2056 = vmatmul.mubr.bf16.vlgmr.msra.gmra.mrb[72].mxu0 %v1679_v46 }
 0x2bb   : > { %2065 = vmatprep.mubr.bf16.mxu0 %v9046_v1 }
 0x2c2   : > { %2066 = vmatmul.mubr.bf16.gmra.mrb[76].mxu0 %v9592_v18  ;;  %v8337_v18 = vld [vmem:[%s11665_s9 + $0x164] ss:$16 sps:$4 sm:$0xff]  }
 0x2c3   : > { %2075 = vmatprep.mubr.bf16.mxu0 %v9046_v1  ;;  %2724 = vmatprep.subr.bf16.mxu1 %v8337_v18 }
 0x2ca   : > { %2076 = vmatmul.mubr.bf16.gmra.mrb[80].mxu0 %v9609_v38  ;;  %v8335_v38 = vld [vmem:[%s11665_s9 + $0x160] ss:$16 sps:$4 sm:$0xff]  }
 0x2cb   : > { %2085 = vmatprep.mubr.bf16.mxu0 %v9046_v1  ;;  %2725 = vmatpush1.bf16.msra.mxu1 %v8335_v38 }
 0x2d2   : > { %2086 = vmatmul.mubr.bf16.gmra.mrb[84].mxu0 %v9626_v61  ;;  %v8340_v61 = vld [vmem:[%s11665_s9 + $0x184] ss:$16 sps:$4 sm:$0xff]  }
 0x2d3   : > { %2095 = vmatprep.mubr.bf16.mxu0 %v9046_v1  ;;  %2726 = vmatprep.subr.bf16.mxu1 %v8340_v61 }
 0x2da   : > { %2096 = vmatmul.mubr.bf16.gmra.mrb[88].mxu0 %v9652_v23  ;;  %v8338_v23 = vld [vmem:[%s11665_s9 + $0x180] ss:$16 sps:$4 sm:$0xff]  }
 0x2db   : > { %2105 = vmatprep.mubr.bf16.mxu0 %v9046_v1  ;;  %2727 = vmatpush1.bf16.msra.mxu1 %v8338_v23  ;;  %v8353_v23 = vld [vmem:[%s11665_s9 + $0x28] ss:$16 sps:$4 sm:$0xff]  }
 0x2e2   : > { %2106 = vmatmul.mubr.bf16.gmra.mrb[92].mxu0 %v9669_v43  ;;  %v8343_v43 = vld [vmem:[%s11665_s9 + $0x1a4] ss:$16 sps:$4 sm:$0xff]  }
 0x2e3   : > { %2115 = vmatprep.mubr.bf16.mxu0 %v9046_v1  ;;  %2728 = vmatprep.subr.bf16.mxu1 %v8343_v43 }
 0x2e4   : > { %2729 = vmatpush1.bf16.msra.mxu1 %v8341_v49 }
 0x2e5   : > { %2730 = vmatprep.subr.bf16.mxu1 %v8346_v51  ;;  %v8358_v51 = vld [vmem:[%s11665_s9 + $0x4c] ss:$16 sps:$4 sm:$0xff]  }
 0x2e8   : > { %2731 = vmatpush1.bf16.msra.mxu1 %v8344_v53 }
 0x2e9   : > { %2732 = vmatprep.subr.bf16.mxu1 %v8349_v54 }
 0x2ea   : > { %2116 = vmatmul.mubr.bf16.gmra.mrb[96].mxu0 %v9686_v6  ;;  %v9793_v6 = vrot.slane %v2154_v3, %v9784_v63 }
 0x2eb   : > { %2125 = vmatprep.mubr.bf16.mxu0 %v9046_v1 }
 0x2ec   : > { %2733 = vmatpush1.bf16.msra.mxu1 %v8347_v55 }
 0x2ed   : > { %2825 = vmatprep.subr.bf16.mxu1 %v8352_v56 }
 0x2f2   : > { %2126 = vmatmul.mubr.bf16.gmra.mrb[100].mxu0 %v1686_v29 }
 0x2f3   : > { %2135 = vmatprep.mubr.bf16.mxu0 %v9046_v1 }
 0x2fa   : > { %2136 = vmatmul.mubr.bf16.gmra.mrb[104].mxu0 %v1687_v45 }
 0x2fb   : > { %2145 = vmatprep.mubr.bf16.mxu0 %v9046_v1 }
 0x302   : > { %2146 = vmatmul.mubr.bf16.gmra.mrb[112].mxu0 %v1688_v2 }
 0x385   : > { %v9779_v60 = vpop.f32.mrb[108].mxu0 }
 0x386   : > { %v9781_v62 = vpop.f32.mrb[109].mxu0 }
 0x387   : > { %v1940_v0 = vpop.f32.mrb[110].mxu0 }
 0x388   : > { %v1941_v5 = vpop.f32.mrb[111].mxu0 }
 0x389   : > { %v8356_v5 = vld [vmem:[%s11665_s9 + $0x48] ss:$16 sps:$4 sm:$0xff]  }
 0x38d   : > { %v2057_v8 = vpop.f32.mrb[72].mxu0 }
 0x38e   : > { %v2166_v9 = vadd.f32 %v9793_v6, %v2057_v8  ;;  %v2059_v10 = vpop.f32.mrb[73].mxu0 }
 0x38f   : > { %v2167_v11 = vadd.f32 %v9796_v7, %v2059_v10  ;;  %v2061_v12 = vpop.f32.mrb[74].mxu0  ;;  %v8361_v10 = vld [vmem:[%s11665_s9 + $0x6c] ss:$16 sps:$4 sm:$0xff]  }
 0x390   : > { %v2168_v13 = vadd.f32 %v9793_v6, %v2061_v12  ;;  %v2063_v14 = vpop.f32.mrb[75].mxu0  ;;  %v2204_v16 = vmax.f32 %v2166_v9, 0.0 }
 0x391   : > { %v2169_v15 = vadd.f32 %v9796_v7, %v2063_v14  ;;  %v2205_v19 = vmax.f32 %v2167_v11, 0.0 }
 0x392   : > { %v2206_v17 = vmax.f32 %v2168_v13, 0.0 }
 0x393   : > { %v2207_v20 = vmax.f32 %v2169_v15, 0.0 }
 0x394   : > { %v2242_v22 = vmax.f32 %v2204_v16, %v2206_v17 }
 0x395   : > { %v2243_v21 = vmax.f32 %v2205_v19, %v2207_v20  ;;  %v2067_v24 = vpop.f32.mrb[76].mxu0  ;;  %v8359_v19 = vld [vmem:[%s11665_s9 + $0x68] ss:$16 sps:$4 sm:$0xff]  }
 0x396   : > { %v2170_v25 = vadd.f32 %v9793_v6, %v2067_v24  ;;  %v2069_v26 = vpop.f32.mrb[77].mxu0 }
 0x397   : > { %v2171_v27 = vadd.f32 %v9796_v7, %v2069_v26  ;;  %v2071_v29 = vpop.f32.mrb[78].mxu0 }
 0x398   : > { %v2208_v32 = vmax.f32 %v2170_v25, 0.0  ;;  %v2172_v33 = vadd.f32 %v9793_v6, %v2071_v29  ;;  %v2073_v34 = vpop.f32.mrb[79].mxu0 }
 0x399   : > { %v2209_v28 = vmax.f32 %v2171_v27, 0.0  ;;  %v2173_v35 = vadd.f32 %v9796_v7, %v2073_v34  ;;  %v8362_v34 = vld [vmem:[%s11665_s9 + $0x88] ss:$16 sps:$4 sm:$0xff]  }
 0x39a   : > { %v2244_v36 = vmax.f32 %v2206_v17, %v2208_v32  ;;  %v2210_v31 = vmax.f32 %v2172_v33, 0.0 }
 0x39b   : > { %v2245_v30 = vmax.f32 %v2207_v20, %v2209_v28  ;;  %v2211_v37 = vmax.f32 %v2173_v35, 0.0 }
 0x39c   : > { %v9806_v50 = vpack.c.bf16 %v2244_v36, %v2242_v22  ;;  %v2246_v39 = vmax.f32 %v2208_v32, %v2210_v31  ;;  %v8367_v36 = vld [vmem:[%s11665_s9 + $0xac] ss:$16 sps:$4 sm:$0xff]  }
 0x39d   : > { %v2247_v40 = vmax.f32 %v2209_v28, %v2211_v37  ;;  %v2077_v41 = vpop.f32.mrb[80].mxu0  ;;  %v9808_v42 = vpack.c.bf16 %v2245_v30, %v2243_v21  ;;  %v8364_v21 = vld [vmem:[%s11665_s9 + $0x8c] ss:$16 sps:$4 sm:$0xff]  }
 0x39e   : > { %v2174_v45 = vadd.f32 %v9793_v6, %v2077_v41  ;;  %v2079_v47 = vpop.f32.mrb[81].mxu0 }
 0x39f   : > { %v2175_v46 = vadd.f32 %v9796_v7, %v2079_v47  ;;  %v2081_v2 = vpop.f32.mrb[82].mxu0  ;;  %2734 = vmatprep.mubr.bf16.mxu1 %v9808_v42 }
 0x3a0   : > { %v2212_v52 = vmax.f32 %v2174_v45, 0.0  ;;  %v2176_v59 = vadd.f32 %v9793_v6, %v2081_v2  ;;  %v2083_v18 = vpop.f32.mrb[83].mxu0  ;;  %2735 = vmatmul.mubr.bf16.vlgmr.msra.gmra.mrb[72].mxu1 %v9806_v50  ;;  %v8365_v45 = vld [vmem:[%s11665_s9 + $0xa8] ss:$16 sps:$4 sm:$0xff]  }
 0x3a1   : > { %v2213_v38 = vmax.f32 %v2175_v46, 0.0  ;;  %v2177_v61 = vadd.f32 %v9796_v7, %v2083_v18  ;;  %2826 = vmatpush1.bf16.msra.mxu1 %v8350_v44  ;;  %v8370_v46 = vld [vmem:[%s11665_s9 + $0xcc] ss:$16 sps:$4 sm:$0xff]  }
 0x3a2   : > { %v2248_v43 = vmax.f32 %v2210_v31, %v2212_v52  ;;  %v2214_v49 = vmax.f32 %v2176_v59, 0.0  ;;  %2827 = vmatprep.subr.bf16.mxu1 %v8355_v48 }
 0x3a3   : > { %v2249_v53 = vmax.f32 %v2211_v37, %v2213_v38  ;;  %v2215_v54 = vmax.f32 %v2177_v61, 0.0 }
 0x3a4   : > { %v2250_v55 = vmax.f32 %v2212_v52, %v2214_v49  ;;  %v9828_v56 = vpack.c.bf16 %v2248_v43, %v2246_v39  ;;  %v8368_v43 = vld [vmem:[%s11665_s9 + $0xc8] ss:$16 sps:$4 sm:$0xff]  }
 0x3a5   : > { %v2251_v57 = vmax.f32 %v2213_v38, %v2215_v54  ;;  %v2087_v0 = vpop.f32.mrb[84].mxu0  ;;  %v9830_v3 = vpack.c.bf16 %v2249_v53, %v2247_v40  ;;  %2828 = vmatpush1.bf16.msra.mxu1 %v8353_v23  ;;  %v8373_v53 = vld [vmem:[%s11665_s9 + $0xec] ss:$16 sps:$4 sm:$0xff]  }
 0x3a6   : > { %v2178_v8 = vadd.f32 %v9793_v6, %v2087_v0  ;;  %v2089_v9 = vpop.f32.mrb[85].mxu0  ;;  %2829 = vmatprep.subr.bf16.mxu1 %v8358_v51 }
 0x3a7   : > { %v2179_v11 = vadd.f32 %v9796_v7, %v2089_v9  ;;  %v2091_v12 = vpop.f32.mrb[86].mxu0  ;;  %2744 = vmatprep.mubr.bf16.mxu1 %v9830_v3 }
 0x3a8   : > { %v2216_v13 = vmax.f32 %v2178_v8, 0.0  ;;  %v2180_v14 = vadd.f32 %v9793_v6, %v2091_v12  ;;  %v2093_v15 = vpop.f32.mrb[87].mxu0  ;;  %2745 = vmatmul.mubr.bf16.gmra.mrb[76].mxu1 %v9828_v56 }
 0x3a9   : > { %v2217_v16 = vmax.f32 %v2179_v11, 0.0  ;;  %v2181_v17 = vadd.f32 %v9796_v7, %v2093_v15  ;;  %2830 = vmatpush1.bf16.msra.mxu1 %v8356_v5 }
 0x3aa   : > { %v2252_v20 = vmax.f32 %v2214_v49, %v2216_v13  ;;  %v2218_v22 = vmax.f32 %v2180_v14, 0.0  ;;  %2831 = vmatprep.subr.bf16.mxu1 %v8361_v10  ;;  %v8371_v10 = vld [vmem:[%s11665_s9 + $0xe8] ss:$16 sps:$4 sm:$0xff]  }
 0x3ab   : > { %v2253_v24 = vmax.f32 %v2215_v54, %v2217_v16  ;;  %v2219_v25 = vmax.f32 %v2181_v17, 0.0 }
 0x3ac   : > { %v2254_v26 = vmax.f32 %v2216_v13, %v2218_v22  ;;  %v9850_v27 = vpack.c.bf16 %v2252_v20, %v2250_v55  ;;  %v8376_v13 = vld [vmem:[%s11665_s9 + $0x10c] ss:$16 sps:$4 sm:$0xff]  }
 0x3ad   : > { %v2255_v29 = vmax.f32 %v2217_v16, %v2219_v25  ;;  %v2097_v32 = vpop.f32.mrb[88].mxu0  ;;  %v9852_v33 = vpack.c.bf16 %v2253_v24, %v2251_v57  ;;  %2832 = vmatpush1.bf16.msra.mxu1 %v8359_v19 }
 0x3ae   : > { %v2182_v28 = vadd.f32 %v9793_v6, %v2097_v32  ;;  %v2099_v35 = vpop.f32.mrb[89].mxu0  ;;  %2833 = vmatprep.subr.bf16.mxu1 %v8364_v21  ;;  %v8374_v21 = vld [vmem:[%s11665_s9 + $0x108] ss:$16 sps:$4 sm:$0xff]  }
 0x3af   : > { %v2183_v31 = vadd.f32 %v9796_v7, %v2099_v35  ;;  %v2101_v30 = vpop.f32.mrb[90].mxu0  ;;  %2754 = vmatprep.mubr.bf16.mxu1 %v9852_v33 }
 0x3b0   : > { %v2220_v37 = vmax.f32 %v2182_v28, 0.0  ;;  %v2184_v39 = vadd.f32 %v9793_v6, %v2101_v30  ;;  %v2103_v40 = vpop.f32.mrb[91].mxu0  ;;  %2755 = vmatmul.mubr.bf16.gmra.mrb[80].mxu1 %v9850_v27  ;;  %v8377_v30 = vld [vmem:[%s11665_s9 + $0x128] ss:$16 sps:$4 sm:$0xff]  }
 0x3b1   : > { %v2221_v41 = vmax.f32 %v2183_v31, 0.0  ;;  %v2185_v44 = vadd.f32 %v9796_v7, %v2103_v40  ;;  %2834 = vmatpush1.bf16.msra.mxu1 %v8362_v34  ;;  %v8382_v40 = vld [vmem:[%s11665_s9 + $0x14c] ss:$16 sps:$4 sm:$0xff]  }
 0x3b2   : > { %v2256_v47 = vmax.f32 %v2218_v22, %v2220_v37  ;;  %v2222_v48 = vmax.f32 %v2184_v39, 0.0  ;;  %2835 = vmatprep.subr.bf16.mxu1 %v8367_v36 }
 0x3b3   : > { %v2257_v2 = vmax.f32 %v2219_v25, %v2221_v41  ;;  %v2223_v52 = vmax.f32 %v2185_v44, 0.0 }
 0x3b4   : > { %v2258_v59 = vmax.f32 %v2220_v37, %v2222_v48  ;;  %v9872_v18 = vpack.c.bf16 %v2256_v47, %v2254_v26  ;;  %v8379_v26 = vld [vmem:[%s11665_s9 + $0x12c] ss:$16 sps:$4 sm:$0xff]  }
 0x3b5   : > { %v2259_v38 = vmax.f32 %v2221_v41, %v2223_v52  ;;  %v2107_v61 = vpop.f32.mrb[92].mxu0  ;;  %v9874_v23 = vpack.c.bf16 %v2257_v2, %v2255_v29  ;;  %2836 = vmatpush1.bf16.msra.mxu1 %v8365_v45 }
 0x3b6   : > { %v2186_v49 = vadd.f32 %v9793_v6, %v2107_v61  ;;  %v2109_v51 = vpop.f32.mrb[93].mxu0  ;;  %2837 = vmatprep.subr.bf16.mxu1 %v8370_v46  ;;  %v8385_v61 = vld [vmem:[%s11665_s9 + $0x16c] ss:$16 sps:$4 sm:$0xff]  }
 0x3b7   : > { %v2187_v54 = vadd.f32 %v9796_v7, %v2109_v51  ;;  %v2111_v55 = vpop.f32.mrb[94].mxu0  ;;  %2764 = vmatprep.mubr.bf16.mxu1 %v9874_v23 }
 0x3b8   : > { %v2224_v57 = vmax.f32 %v2186_v49, 0.0  ;;  %v2188_v0 = vadd.f32 %v9793_v6, %v2111_v55  ;;  %v2113_v5 = vpop.f32.mrb[95].mxu0  ;;  %2765 = vmatmul.mubr.bf16.gmra.mrb[84].mxu1 %v9872_v18 }
 0x3b9   : > { %v2225_v8 = vmax.f32 %v2187_v54, 0.0  ;;  %v2189_v9 = vadd.f32 %v9796_v7, %v2113_v5  ;;  %2838 = vmatpush1.bf16.msra.mxu1 %v8368_v43 }
 0x3ba   : > { %v2260_v11 = vmax.f32 %v2222_v48, %v2224_v57  ;;  %v2226_v12 = vmax.f32 %v2188_v0, 0.0  ;;  %2839 = vmatprep.subr.bf16.mxu1 %v8373_v53  ;;  %v8383_v0 = vld [vmem:[%s11665_s9 + $0x168] ss:$16 sps:$4 sm:$0xff]  }
 0x3bb   : > { %v2261_v14 = vmax.f32 %v2223_v52, %v2225_v8  ;;  %v2227_v15 = vmax.f32 %v2189_v9, 0.0  ;;  %v8380_v52 = vld [vmem:[%s11665_s9 + $0x148] ss:$16 sps:$4 sm:$0xff]   ;;  %v8388_v9 = vld [vmem:[%s11665_s9 + $0x18c] ss:$16 sps:$4 sm:$0xff]  }
 0x3bc   : > { %v2262_v16 = vmax.f32 %v2224_v57, %v2226_v12  ;;  %v9894_v17 = vpack.c.bf16 %v2260_v11, %v2258_v59 }
 0x3bd   : > { %v2263_v19 = vmax.f32 %v2225_v8, %v2227_v15  ;;  %v2117_v20 = vpop.f32.mrb[96].mxu0  ;;  %v9896_v22 = vpack.c.bf16 %v2261_v14, %v2259_v38  ;;  %2840 = vmatpush1.bf16.msra.mxu1 %v8371_v10 }
 0x3be   : > { %v2190_v24 = vadd.f32 %v9793_v6, %v2117_v20  ;;  %v2119_v25 = vpop.f32.mrb[97].mxu0  ;;  %2841 = vmatprep.subr.bf16.mxu1 %v8376_v13 }
 0x3bf   : > { %v2191_v29 = vadd.f32 %v9796_v7, %v2119_v25  ;;  %v2121_v32 = vpop.f32.mrb[98].mxu0  ;;  %2774 = vmatprep.mubr.bf16.mxu1 %v9896_v22 }
 0x3c0   : > { %v2228_v34 = vmax.f32 %v2190_v24, 0.0  ;;  %v2192_v28 = vadd.f32 %v9793_v6, %v2121_v32  ;;  %v2123_v35 = vpop.f32.mrb[99].mxu0  ;;  %2775 = vmatmul.mubr.bf16.gmra.mrb[88].mxu1 %v9894_v17  ;;  %v8391_v24 = vld [vmem:[%s11665_s9 + $0x1ac] ss:$16 sps:$4 sm:$0xff]  }
 0x3c1   : > { %v2229_v36 = vmax.f32 %v2191_v29, 0.0  ;;  %v2193_v31 = vadd.f32 %v9796_v7, %v2123_v35  ;;  %2842 = vmatpush1.bf16.msra.mxu1 %v8374_v21 }
 0x3c2   : > { %v2264_v37 = vmax.f32 %v2226_v12, %v2228_v34  ;;  %v2230_v39 = vmax.f32 %v2192_v28, 0.0  ;;  %2843 = vmatprep.subr.bf16.mxu1 %v8379_v26 }
 0x3c3   : > { %v2265_v41 = vmax.f32 %v2227_v15, %v2229_v36  ;;  %v2231_v44 = vmax.f32 %v2193_v31, 0.0 }
 0x3c4   : > { %v2266_v45 = vmax.f32 %v2228_v34, %v2230_v39  ;;  %v9916_v47 = vpack.c.bf16 %v2264_v37, %v2262_v16  ;;  %v8394_v37 = vld [vmem:[%s11665_s9 + $0x1cc] ss:$16 sps:$4 sm:$0xff]  }
 0x3c5   : > { %v2267_v48 = vmax.f32 %v2229_v36, %v2231_v44  ;;  %v2127_v46 = vpop.f32.mrb[100].mxu0  ;;  %v9918_v2 = vpack.c.bf16 %v2265_v41, %v2263_v19  ;;  %2844 = vmatpush1.bf16.msra.mxu1 %v8377_v30  ;;  %v8386_v19 = vld [vmem:[%s11665_s9 + $0x188] ss:$16 sps:$4 sm:$0xff]  }
 0x3c6   : > { %v2194_v59 = vadd.f32 %v9793_v6, %v2127_v46  ;;  %v2129_v38 = vpop.f32.mrb[101].mxu0  ;;  %2845 = vmatprep.subr.bf16.mxu1 %v8382_v40  ;;  %v8389_v36 = vld [vmem:[%s11665_s9 + $0x1a8] ss:$16 sps:$4 sm:$0xff]  }
 0x3c7   : > { %v2195_v43 = vadd.f32 %v9796_v7, %v2129_v38  ;;  %v2131_v49 = vpop.f32.mrb[102].mxu0  ;;  %2784 = vmatprep.mubr.bf16.mxu1 %v9918_v2 }
 0x3c8   : > { %v2232_v51 = vmax.f32 %v2194_v59, 0.0  ;;  %v2196_v53 = vadd.f32 %v9793_v6, %v2131_v49  ;;  %v2133_v54 = vpop.f32.mrb[103].mxu0  ;;  %2785 = vmatmul.mubr.bf16.gmra.mrb[92].mxu1 %v9916_v47 }
 0x3c9   : > { %v2233_v55 = vmax.f32 %v2195_v43, 0.0  ;;  %v2197_v57 = vadd.f32 %v9796_v7, %v2133_v54  ;;  %2846 = vmatpush1.bf16.msra.mxu1 %v8380_v52  ;;  %v8392_v52 = vld [vmem:[%s11665_s9 + $0x1c8] ss:$16 sps:$4 sm:$0xff]  }
 0x3ca   : > { %v2268_v5 = vmax.f32 %v2230_v39, %v2232_v51  ;;  %v2234_v8 = vmax.f32 %v2196_v53, 0.0  ;;  %2847 = vmatprep.subr.bf16.mxu1 %v8385_v61  ;;  %v8397_v61 = vld [vmem:[%s11665_s9 + $0x1ec] ss:$16 sps:$4 sm:$0xff]  }
 0x3cb   : > { %v2269_v10 = vmax.f32 %v2231_v44, %v2233_v55  ;;  %v2235_v11 = vmax.f32 %v2197_v57, 0.0 }
 0x3cc   : > { %v2270_v12 = vmax.f32 %v2232_v51, %v2234_v8  ;;  %v9938_v13 = vpack.c.bf16 %v2268_v5, %v2266_v45 }
 0x3cd   : > { %v2271_v14 = vmax.f32 %v2233_v55, %v2235_v11  ;;  %v2137_v15 = vpop.f32.mrb[104].mxu0  ;;  %v9940_v16 = vpack.c.bf16 %v2269_v10, %v2267_v48  ;;  %2848 = vmatpush1.bf16.msra.mxu1 %v8383_v0 }
 0x3ce   : > { %v2198_v20 = vadd.f32 %v9793_v6, %v2137_v15  ;;  %v2139_v21 = vpop.f32.mrb[105].mxu0  ;;  %2849 = vmatprep.subr.bf16.mxu1 %v8388_v9 }
 0x3cf   : > { %v2199_v25 = vadd.f32 %v9796_v7, %v2139_v21  ;;  %v2141_v26 = vpop.f32.mrb[106].mxu0  ;;  %2794 = vmatprep.mubr.bf16.mxu1 %v9940_v16 }
 0x3d0   : > { %v2236_v29 = vmax.f32 %v2198_v20, 0.0  ;;  %v2200_v32 = vadd.f32 %v9793_v6, %v2141_v26  ;;  %v2143_v34 = vpop.f32.mrb[107].mxu0  ;;  %2795 = vmatmul.mubr.bf16.gmra.mrb[96].mxu1 %v9938_v13 }
 0x3d1   : > { %v2237_v28 = vmax.f32 %v2199_v25, 0.0  ;;  %v2201_v35 = vadd.f32 %v9796_v7, %v2143_v34  ;;  %2850 = vmatpush1.bf16.msra.mxu1 %v8386_v19 }
 0x3d2   : > { %v2272_v31 = vmax.f32 %v2234_v8, %v2236_v29  ;;  %v2238_v30 = vmax.f32 %v2200_v32, 0.0  ;;  %2851 = vmatprep.subr.bf16.mxu1 %v8391_v24 }
 0x3d3   : > { %v2273_v39 = vmax.f32 %v2235_v11, %v2237_v28  ;;  %v2239_v40 = vmax.f32 %v2201_v35, 0.0 }
 0x3d4   : > { %v2274_v41 = vmax.f32 %v2236_v29, %v2238_v30  ;;  %v2292_v44 = vpack.c.bf16 %v2272_v31, %v2270_v12 }
 0x3d5   : > { %v2275_v45 = vmax.f32 %v2237_v28, %v2239_v40  ;;  %v2147_v48 = vpop.f32.mrb[112].mxu0  ;;  %v2293_v46 = vpack.c.bf16 %v2273_v39, %v2271_v14  ;;  %2852 = vmatpush1.bf16.msra.mxu1 %v8389_v36 }
 0x3d6   : > { %v2148_v59 = vadd.f32 %v2147_v48, %v9779_v60  ;;  %v2149_v38 = vpop.f32.mrb[113].mxu0  ;;  %2853 = vmatprep.subr.bf16.mxu1 %v8394_v37  ;;  %v8395_v60 = vld [vmem:[%s11665_s9 + $0x1e8] ss:$16 sps:$4 sm:$0xff]  }
 0x3d7   : > { %v2150_v43 = vadd.f32 %v2149_v38, %v9781_v62  ;;  %v2151_v49 = vpop.f32.mrb[114].mxu0  ;;  %2804 = vmatprep.mubr.bf16.mxu1 %v2293_v46 }
 0x3d8   : > { %v2202_v51 = vadd.f32 %v9793_v6, %v2148_v59  ;;  %v2152_v53 = vpop.f32.mrb[115].mxu0  ;;  %2805 = vmatmul.mubr.bf16.gmra.mrb[100].mxu1 %v2292_v44  ;;  %v9990_v6 = vld [vmem:[%s11667_s11] sm:$0xf] }
 0x3d9   : > { %v2203_v54 = vadd.f32 %v9796_v7, %v2150_v43  ;;  %2854 = vmatpush1.bf16.msra.mxu1 %v8392_v52  ;;  %v9994_v7 = vrot.slane %v9990_v6, %v9784_v63 }
 0x3da   : > { %v2240_v55 = vmax.f32 %v2202_v51, 0.0  ;;  %2855 = vmatprep.subr.bf16.mxu1 %v8397_v61 }
 0x3db   : > { %v2241_v57 = vmax.f32 %v2203_v54, 0.0 }
 0x3dc   : > { %v2276_v0 = vmax.f32 %v2238_v30, %v2240_v55 }
 0x3dd   : > { %v2277_v5 = vmax.f32 %v2239_v40, %v2241_v57  ;;  %2856 = vmatpush1.bf16.msra.mxu1 %v8395_v60 }
 0x3de   : > { %v2294_v62 = vpack.c.bf16 %v2276_v0, %v2274_v41 }
 0x3df   : > { %v2295_v8 = vpack.c.bf16 %v2277_v5, %v2275_v45 }
 0x3e1   : > { %2814 = vmatprep.mubr.bf16.mxu1 %v2295_v8 }
 0x3e2   : > { %2815 = vmatmul.mubr.bf16.gmra.mrb[104].mxu1 %v2294_v62 }
 0x3e3   : > { %2857 = vmatprep.mubr.bf16.mxu1 %v9808_v42 }
 0x3ea   : > { %2858 = vmatmul.mubr.bf16.vlgmr.msra.gmra.mrb[108].mxu1 %v9806_v50  ;;  %v9998_v50 = vrot.slane %v9990_v6, %v9790_v4 }
 0x3eb   : > { %2867 = vmatprep.mubr.bf16.mxu1 %v9830_v3 }
 0x3f2   : > { %2868 = vmatmul.mubr.bf16.gmra.mrb[112].mxu1 %v9828_v56 }
 0x3f3   : > { %2877 = vmatprep.mubr.bf16.mxu1 %v9852_v33 }
 0x3fa   : > { %2878 = vmatmul.mubr.bf16.gmra.mrb[116].mxu1 %v9850_v27 }
 0x3fb   : > { %2887 = vmatprep.mubr.bf16.mxu1 %v9874_v23 }
 0x402   : > { %2888 = vmatmul.mubr.bf16.gmra.mrb[120].mxu1 %v9872_v18 }
 0x403   : > { %2897 = vmatprep.mubr.bf16.mxu1 %v9896_v22 }
 0x40a   : > { %2898 = vmatmul.mubr.bf16.gmra.mrb[124].mxu1 %v9894_v17 }
 0x40b   : > { %2907 = vmatprep.mubr.bf16.mxu1 %v9918_v2 }
 0x412   : > { %2908 = vmatmul.mubr.bf16.gmra.mrb[128].mxu1 %v9916_v47 }
 0x413   : > { %2917 = vmatprep.mubr.bf16.mxu1 %v9940_v16 }
 0x41a   : > { %2918 = vmatmul.mubr.bf16.gmra.mrb[132].mxu1 %v9938_v13 }
 0x41b   : > { %2927 = vmatprep.mubr.bf16.mxu1 %v2293_v46 }
 0x422   : > { %2928 = vmatmul.mubr.bf16.gmra.mrb[136].mxu1 %v2292_v44 }
 0x423   : > { %2937 = vmatprep.mubr.bf16.mxu1 %v2295_v8 }
 0x42a   : > { %2938 = vmatmul.mubr.bf16.gmra.mrb[140].mxu1 %v2294_v62 }
 0x473   : > { %v2736_v42 = vpop.f32.mrb[72].mxu1 }
 0x474   : > { %v2737_v56 = vadd.f32 %v2736_v42, %v9994_v7  ;;  %v2738_v3 = vpop.f32.mrb[73].mxu1 }
 0x475   : > { %v2739_v27 = vadd.f32 %v2738_v3, %v9998_v50  ;;  %v2740_v33 = vpop.f32.mrb[74].mxu1 }
 0x476   : > { %2948 = vst [vmem:[#allocation2] sm:$0xff] %v2737_v56  ;;  %v2741_v18 = vadd.f32 %v2740_v33, %v9994_v7  ;;  %v2742_v23 = vpop.f32.mrb[75].mxu1 }
 0x477   : > { %2949 = vst [vmem:[#allocation2 + $0x8] sm:$0xff] %v2739_v27  ;;  %v2743_v17 = vadd.f32 %v2742_v23, %v9998_v50 }
 0x478   : > { %2952 = vst [vmem:[#allocation2 + $0x20] sm:$0xff] %v2741_v18 }
 0x479   : > { %2953 = vst [vmem:[#allocation2 + $0x28] sm:$0xff] %v2743_v17 }
 0x47b   : > { %v2746_v22 = vpop.f32.mrb[76].mxu1 }
 0x47c   : > { %v2747_v47 = vadd.f32 %v2746_v22, %v9994_v7  ;;  %v2748_v2 = vpop.f32.mrb[77].mxu1 }
 0x47d   : > { %v2749_v9 = vadd.f32 %v2748_v2, %v9998_v50  ;;  %v2750_v10 = vpop.f32.mrb[78].mxu1  ;;  %v10034_v2 = vsub.s32 2, %v9777_v58 }
 0x47e   : > { %2956 = vst [vmem:[#allocation2 + $0x40] sm:$0xff] %v2747_v47  ;;  %v2751_v11 = vadd.f32 %v2750_v10, %v9994_v7  ;;  %v2752_v12 = vpop.f32.mrb[79].mxu1 }
 0x47f   : > { %2957 = vst [vmem:[#allocation2 + $0x48] sm:$0xff] %v2749_v9  ;;  %v2753_v13 = vadd.f32 %v2752_v12, %v9998_v50 }
 0x480   : > { %2960 = vst [vmem:[#allocation2 + $0x60] sm:$0xff] %v2751_v11  ;;  %v10038_v11 = vsub.s32 3, %v9777_v58 }
 0x481   : > { %2961 = vst [vmem:[#allocation2 + $0x68] sm:$0xff] %v2753_v13 }
 0x483   : > { %v2756_v14 = vpop.f32.mrb[80].mxu1 }
 0x484   : > { %v2757_v15 = vadd.f32 %v2756_v14, %v9994_v7  ;;  %v2758_v16 = vpop.f32.mrb[81].mxu1 }
 0x485   : > { %v2759_v19 = vadd.f32 %v2758_v16, %v9998_v50  ;;  %v2760_v20 = vpop.f32.mrb[82].mxu1  ;;  %v10048_v16 = vrot.slane %v9990_v6, %v10038_v11 }
 0x486   : > { %2964 = vst [vmem:[#allocation2 + $0x80] sm:$0xff] %v2757_v15  ;;  %v2761_v21 = vadd.f32 %v2760_v20, %v9994_v7  ;;  %v2762_v24 = vpop.f32.mrb[83].mxu1  ;;  %v10044_v15 = vrot.slane %v9990_v6, %v10034_v2 }
 0x487   : > { %2965 = vst [vmem:[#allocation2 + $0x88] sm:$0xff] %v2759_v19  ;;  %v2763_v25 = vadd.f32 %v2762_v24, %v9998_v50 }
 0x488   : > { %2968 = vst [vmem:[#allocation2 + $0xa0] sm:$0xff] %v2761_v21 }
 0x489   : > { %2969 = vst [vmem:[#allocation2 + $0xa8] sm:$0xff] %v2763_v25 }
 0x48b   : > { %v2766_v26 = vpop.f32.mrb[84].mxu1 }
 0x48c   : > { %v2767_v29 = vadd.f32 %v2766_v26, %v9994_v7  ;;  %v2768_v32 = vpop.f32.mrb[85].mxu1 }
 0x48d   : > { %v2769_v34 = vadd.f32 %v2768_v32, %v9998_v50  ;;  %v2770_v28 = vpop.f32.mrb[86].mxu1 }
 0x48e   : > { %2972 = vst [vmem:[#allocation2 + $0xc0] sm:$0xff] %v2767_v29  ;;  %v2771_v35 = vadd.f32 %v2770_v28, %v9994_v7  ;;  %v2772_v36 = vpop.f32.mrb[87].mxu1 }
 0x48f   : > { %2973 = vst [vmem:[#allocation2 + $0xc8] sm:$0xff] %v2769_v34  ;;  %v2773_v31 = vadd.f32 %v2772_v36, %v9998_v50 }
 0x490   : > { %2976 = vst [vmem:[#allocation2 + $0xe0] sm:$0xff] %v2771_v35 }
 0x491   : > { %2977 = vst [vmem:[#allocation2 + $0xe8] sm:$0xff] %v2773_v31 }
 0x493   : > { %v2776_v30 = vpop.f32.mrb[88].mxu1 }
 0x494   : > { %v2777_v37 = vadd.f32 %v2776_v30, %v9994_v7  ;;  %v2778_v39 = vpop.f32.mrb[89].mxu1 }
 0x495   : > { %v2779_v40 = vadd.f32 %v2778_v39, %v9998_v50  ;;  %v2780_v41 = vpop.f32.mrb[90].mxu1 }
 0x496   : > { %2980 = vst [vmem:[#allocation2 + $0x100] sm:$0xff] %v2777_v37  ;;  %v2781_v44 = vadd.f32 %v2780_v41, %v9994_v7  ;;  %v2782_v45 = vpop.f32.mrb[91].mxu1 }
 0x497   : > { %2981 = vst [vmem:[#allocation2 + $0x108] sm:$0xff] %v2779_v40  ;;  %v2783_v48 = vadd.f32 %v2782_v45, %v9998_v50 }
 0x498   : > { %2984 = vst [vmem:[#allocation2 + $0x120] sm:$0xff] %v2781_v44 }
 0x499   : > { %2985 = vst [vmem:[#allocation2 + $0x128] sm:$0xff] %v2783_v48 }
 0x49b   : > { %v2786_v46 = vpop.f32.mrb[92].mxu1 }
 0x49c   : > { %v2787_v52 = vadd.f32 %v2786_v46, %v9994_v7  ;;  %v2788_v59 = vpop.f32.mrb[93].mxu1 }
 0x49d   : > { %v2789_v38 = vadd.f32 %v2788_v59, %v9998_v50  ;;  %v2790_v61 = vpop.f32.mrb[94].mxu1 }
 0x49e   : > { %2988 = vst [vmem:[#allocation2 + $0x140] sm:$0xff] %v2787_v52  ;;  %v2791_v43 = vadd.f32 %v2790_v61, %v9994_v7  ;;  %v2792_v49 = vpop.f32.mrb[95].mxu1 }
 0x49f   : > { %2989 = vst [vmem:[#allocation2 + $0x148] sm:$0xff] %v2789_v38  ;;  %v2793_v51 = vadd.f32 %v2792_v49, %v9998_v50 }
 0x4a0   : > { %2992 = vst [vmem:[#allocation2 + $0x160] sm:$0xff] %v2791_v43 }
 0x4a1   : > { %2993 = vst [vmem:[#allocation2 + $0x168] sm:$0xff] %v2793_v51 }
 0x4a3   : > { %v2796_v53 = vpop.f32.mrb[96].mxu1 }
 0x4a4   : > { %v2797_v54 = vadd.f32 %v2796_v53, %v9994_v7  ;;  %v2798_v60 = vpop.f32.mrb[97].mxu1 }
 0x4a5   : > { %v2799_v55 = vadd.f32 %v2798_v60, %v9998_v50  ;;  %v2800_v57 = vpop.f32.mrb[98].mxu1 }
 0x4a6   : > { %2996 = vst [vmem:[#allocation2 + $0x180] sm:$0xff] %v2797_v54  ;;  %v2801_v0 = vadd.f32 %v2800_v57, %v9994_v7  ;;  %v2802_v5 = vpop.f32.mrb[99].mxu1 }
 0x4a7   : > { %2997 = vst [vmem:[#allocation2 + $0x188] sm:$0xff] %v2799_v55  ;;  %v2803_v62 = vadd.f32 %v2802_v5, %v9998_v50 }
 0x4a8   : > { %3000 = vst [vmem:[#allocation2 + $0x1a0] sm:$0xff] %v2801_v0 }
 0x4a9   : > { %3001 = vst [vmem:[#allocation2 + $0x1a8] sm:$0xff] %v2803_v62 }
 0x4ab   : > { %v2806_v8 = vpop.f32.mrb[100].mxu1 }
 0x4ac   : > { %v2807_v42 = vadd.f32 %v2806_v8, %v9994_v7  ;;  %v2808_v56 = vpop.f32.mrb[101].mxu1 }
 0x4ad   : > { %v2809_v3 = vadd.f32 %v2808_v56, %v9998_v50  ;;  %v2810_v27 = vpop.f32.mrb[102].mxu1 }
 0x4ae   : > { %3004 = vst [vmem:[#allocation2 + $0x1c0] sm:$0xff] %v2807_v42  ;;  %v2811_v33 = vadd.f32 %v2810_v27, %v9994_v7  ;;  %v2812_v18 = vpop.f32.mrb[103].mxu1 }
 0x4af   : > { %3005 = vst [vmem:[#allocation2 + $0x1c8] sm:$0xff] %v2809_v3  ;;  %v2813_v23 = vadd.f32 %v2812_v18, %v9998_v50 }
 0x4b0   : > { %3008 = vst [vmem:[#allocation2 + $0x1e0] sm:$0xff] %v2811_v33 }
 0x4b1   : > { %3009 = vst [vmem:[#allocation2 + $0x1e8] sm:$0xff] %v2813_v23 }
 0x4b5   : > { %v2816_v17 = vpop.f32.mrb[104].mxu1 }
 0x4b6   : > { %v2817_v22 = vadd.f32 %v2816_v17, %v9994_v7  ;;  %v2818_v47 = vpop.f32.mrb[105].mxu1 }
 0x4b7   : > { %v2819_v9 = vadd.f32 %v2818_v47, %v9998_v50  ;;  %v2820_v10 = vpop.f32.mrb[106].mxu1 }
 0x4b8   : > { %3012 = vst [vmem:[#allocation2 + $0x200] sm:$0xff] %v2817_v22  ;;  %v2821_v12 = vadd.f32 %v2820_v10, %v9994_v7  ;;  %v2822_v13 = vpop.f32.mrb[107].mxu1 }
 0x4b9   : > { %3013 = vst [vmem:[#allocation2 + $0x208] sm:$0xff] %v2819_v9  ;;  %v2823_v14 = vadd.f32 %v2822_v13, %v9998_v50 }
 0x4ba   : > { %3016 = vst [vmem:[#allocation2 + $0x220] sm:$0xff] %v2821_v12 }
 0x4bb   : > { %3017 = vst [vmem:[#allocation2 + $0x228] sm:$0xff] %v2823_v14 }
 0x4bd   : > { %v2859_v19 = vpop.f32.mrb[108].mxu1 }
 0x4be   : > { %v2860_v20 = vadd.f32 %v2859_v19, %v10044_v15  ;;  %v2861_v21 = vpop.f32.mrb[109].mxu1 }
 0x4bf   : > { %v2862_v7 = vadd.f32 %v2861_v21, %v10048_v16  ;;  %v2863_v24 = vpop.f32.mrb[110].mxu1 }
 0x4c0   : > { %2950 = vst [vmem:[#allocation2 + $0x10] sm:$0xff] %v2860_v20  ;;  %v2864_v50 = vadd.f32 %v2863_v24, %v10044_v15  ;;  %v2865_v25 = vpop.f32.mrb[111].mxu1 }
 0x4c1   : > { %2951 = vst [vmem:[#allocation2 + $0x18] sm:$0xff] %v2862_v7  ;;  %v2866_v26 = vadd.f32 %v2865_v25, %v10048_v16 }
 0x4c2   : > { %2954 = vst [vmem:[#allocation2 + $0x30] sm:$0xff] %v2864_v50 }
 0x4c3   : > { %2955 = vst [vmem:[#allocation2 + $0x38] sm:$0xff] %v2866_v26 }
 0x4c5   : > { %v2869_v29 = vpop.f32.mrb[112].mxu1 }
 0x4c6   : > { %v2870_v6 = vadd.f32 %v2869_v29, %v10044_v15  ;;  %v2871_v32 = vpop.f32.mrb[113].mxu1 }
 0x4c7   : > { %v2872_v34 = vadd.f32 %v2871_v32, %v10048_v16  ;;  %v2873_v28 = vpop.f32.mrb[114].mxu1 }
 0x4c8   : > { %2958 = vst [vmem:[#allocation2 + $0x50] sm:$0xff] %v2870_v6  ;;  %v2874_v35 = vadd.f32 %v2873_v28, %v10044_v15  ;;  %v2875_v36 = vpop.f32.mrb[115].mxu1 }
 0x4c9   : > { %2959 = vst [vmem:[#allocation2 + $0x58] sm:$0xff] %v2872_v34  ;;  %v2876_v31 = vadd.f32 %v2875_v36, %v10048_v16 }
 0x4ca   : > { %2962 = vst [vmem:[#allocation2 + $0x70] sm:$0xff] %v2874_v35 }
 0x4cb   : > { %2963 = vst [vmem:[#allocation2 + $0x78] sm:$0xff] %v2876_v31 }
 0x4cd   : > { %v2879_v30 = vpop.f32.mrb[116].mxu1 }
 0x4ce   : > { %v2880_v37 = vadd.f32 %v2879_v30, %v10044_v15  ;;  %v2881_v39 = vpop.f32.mrb[117].mxu1  ;;  %v10086_v30 = vmov 0.0  }
 0x4cf   : > { %v2882_v40 = vadd.f32 %v2881_v39, %v10048_v16  ;;  %v2883_v41 = vpop.f32.mrb[118].mxu1 }
 0x4d0   : > { %2966 = vst [vmem:[#allocation2 + $0x90] sm:$0xff] %v2880_v37  ;;  %v2884_v44 = vadd.f32 %v2883_v41, %v10044_v15  ;;  %v2885_v45 = vpop.f32.mrb[119].mxu1  ;;  %v10088_v37 = vmov 0.0  }
 0x4d1   : > { %2967 = vst [vmem:[#allocation2 + $0x98] sm:$0xff] %v2882_v40  ;;  %v2886_v48 = vadd.f32 %v2885_v45, %v10048_v16 }
 0x4d2   : > { %2970 = vst [vmem:[#allocation2 + $0xb0] sm:$0xff] %v2884_v44 }
 0x4d3   : > { %2971 = vst [vmem:[#allocation2 + $0xb8] sm:$0xff] %v2886_v48 }
 0x4d5   : > { %v2889_v46 = vpop.f32.mrb[120].mxu1 }
 0x4d6   : > { %v2890_v52 = vadd.f32 %v2889_v46, %v10044_v15  ;;  %v2891_v59 = vpop.f32.mrb[121].mxu1 }
 0x4d7   : > { %v2892_v38 = vadd.f32 %v2891_v59, %v10048_v16  ;;  %v2893_v61 = vpop.f32.mrb[122].mxu1 }
 0x4d8   : > { %2974 = vst [vmem:[#allocation2 + $0xd0] sm:$0xff] %v2890_v52  ;;  %v2894_v43 = vadd.f32 %v2893_v61, %v10044_v15  ;;  %v2895_v49 = vpop.f32.mrb[123].mxu1 }
 0x4d9   : > { %2975 = vst [vmem:[#allocation2 + $0xd8] sm:$0xff] %v2892_v38  ;;  %v2896_v51 = vadd.f32 %v2895_v49, %v10048_v16 }
 0x4da   : > { %2978 = vst [vmem:[#allocation2 + $0xf0] sm:$0xff] %v2894_v43 }
 0x4db   : > { %2979 = vst [vmem:[#allocation2 + $0xf8] sm:$0xff] %v2896_v51 }
 0x4dd   : > { %v2899_v53 = vpop.f32.mrb[124].mxu1 }
 0x4de   : > { %v2900_v54 = vadd.f32 %v2899_v53, %v10044_v15  ;;  %v2901_v60 = vpop.f32.mrb[125].mxu1 }
 0x4df   : > { %v2902_v55 = vadd.f32 %v2901_v60, %v10048_v16  ;;  %v2903_v57 = vpop.f32.mrb[126].mxu1 }
 0x4e0   : > { %2982 = vst [vmem:[#allocation2 + $0x110] sm:$0xff] %v2900_v54  ;;  %v2904_v0 = vadd.f32 %v2903_v57, %v10044_v15  ;;  %v2905_v5 = vpop.f32.mrb[127].mxu1 }
 0x4e1   : > { %2983 = vst [vmem:[#allocation2 + $0x118] sm:$0xff] %v2902_v55  ;;  %v2906_v62 = vadd.f32 %v2905_v5, %v10048_v16 }
 0x4e2   : > { %2986 = vst [vmem:[#allocation2 + $0x130] sm:$0xff] %v2904_v0 }
 0x4e3   : > { %2987 = vst [vmem:[#allocation2 + $0x138] sm:$0xff] %v2906_v62 }
 0x4e5   : > { %v2909_v8 = vpop.f32.mrb[128].mxu1 }
 0x4e6   : > { %v2910_v42 = vadd.f32 %v2909_v8, %v10044_v15  ;;  %v2911_v56 = vpop.f32.mrb[129].mxu1 }
 0x4e7   : > { %v2912_v3 = vadd.f32 %v2911_v56, %v10048_v16  ;;  %v2913_v27 = vpop.f32.mrb[130].mxu1 }
 0x4e8   : > { %2990 = vst [vmem:[#allocation2 + $0x150] sm:$0xff] %v2910_v42  ;;  %v2914_v33 = vadd.f32 %v2913_v27, %v10044_v15  ;;  %v2915_v18 = vpop.f32.mrb[131].mxu1 }
 0x4e9   : > { %2991 = vst [vmem:[#allocation2 + $0x158] sm:$0xff] %v2912_v3  ;;  %v2916_v23 = vadd.f32 %v2915_v18, %v10048_v16 }
 0x4ea   : > { %2994 = vst [vmem:[#allocation2 + $0x170] sm:$0xff] %v2914_v33 }
 0x4eb   : > { %2995 = vst [vmem:[#allocation2 + $0x178] sm:$0xff] %v2916_v23 }
 0x4ed   : > { %v2919_v17 = vpop.f32.mrb[132].mxu1 }
 0x4ee   : > { %v2920_v22 = vadd.f32 %v2919_v17, %v10044_v15  ;;  %v2921_v47 = vpop.f32.mrb[133].mxu1 }
 0x4ef   : > { %v2922_v9 = vadd.f32 %v2921_v47, %v10048_v16  ;;  %v2923_v10 = vpop.f32.mrb[134].mxu1 }
 0x4f0   : > { %2998 = vst [vmem:[#allocation2 + $0x190] sm:$0xff] %v2920_v22  ;;  %v2924_v12 = vadd.f32 %v2923_v10, %v10044_v15  ;;  %v2925_v13 = vpop.f32.mrb[135].mxu1 }
 0x4f1   : > { %2999 = vst [vmem:[#allocation2 + $0x198] sm:$0xff] %v2922_v9  ;;  %v2926_v14 = vadd.f32 %v2925_v13, %v10048_v16 }
 0x4f2   : > { %3002 = vst [vmem:[#allocation2 + $0x1b0] sm:$0xff] %v2924_v12 }
 0x4f3   : > { %3003 = vst [vmem:[#allocation2 + $0x1b8] sm:$0xff] %v2926_v14 }
 0x4f5   : > { %v2929_v19 = vpop.f32.mrb[136].mxu1 }
 0x4f6   : > { %v2930_v20 = vadd.f32 %v2929_v19, %v10044_v15  ;;  %v2931_v21 = vpop.f32.mrb[137].mxu1 }
 0x4f7   : > { %v2932_v7 = vadd.f32 %v2931_v21, %v10048_v16  ;;  %v2933_v24 = vpop.f32.mrb[138].mxu1 }
 0x4f8   : > { %3006 = vst [vmem:[#allocation2 + $0x1d0] sm:$0xff] %v2930_v20  ;;  %v2934_v50 = vadd.f32 %v2933_v24, %v10044_v15  ;;  %v2935_v25 = vpop.f32.mrb[139].mxu1 }
 0x4f9   : > { %3007 = vst [vmem:[#allocation2 + $0x1d8] sm:$0xff] %v2932_v7  ;;  %v2936_v26 = vadd.f32 %v2935_v25, %v10048_v16 }
 0x4fa   : > { %3010 = vst [vmem:[#allocation2 + $0x1f0] sm:$0xff] %v2934_v50 }
 0x4fb   : > { %3011 = vst [vmem:[#allocation2 + $0x1f8] sm:$0xff] %v2936_v26 }
 0x4fd   : > { %v2939_v29 = vpop.f32.mrb[140].mxu1 }
 0x4fe   : > { %v2940_v6 = vadd.f32 %v2939_v29, %v10044_v15  ;;  %v2941_v32 = vpop.f32.mrb[141].mxu1 }
 0x4ff   : > { %v2942_v34 = vadd.f32 %v2941_v32, %v10048_v16  ;;  %v2943_v28 = vpop.f32.mrb[142].mxu1 }
 0x500   : > { %3014 = vst [vmem:[#allocation2 + $0x210] sm:$0xff] %v2940_v6  ;;  %v2944_v35 = vadd.f32 %v2943_v28, %v10044_v15  ;;  %v2945_v36 = vpop.f32.mrb[143].mxu1 }
 0x501   : > { %3015 = vst [vmem:[#allocation2 + $0x218] sm:$0xff] %v2942_v34  ;;  %v2946_v31 = vadd.f32 %v2945_v36, %v10048_v16 }
 0x502   : > { %3018 = vst [vmem:[#allocation2 + $0x230] sm:$0xff] %v2944_v35 }
 0x503   : > { %3019 = vst [vmem:[#allocation2 + $0x238] sm:$0xff] %v2946_v31 }
 0x504 LB: >> { %v8398_v15 = vld [vmem:[%s11666_s10 + $0x4] ss:$16 sps:$4 sm:$0xff]   ;;  %v8400_v16 = vld [vmem:[%s11666_s10] ss:$16 sps:$4 sm:$0xff]   ;;  %v9050_v39 = vmov 0   ;;  %v3038_v17 = vpack.c.bf16 %v9028_v37, %v9028_v37  ;;  %s7340_s30 = sshll.u32 %s9032_s27, 3  ;;  %s9032_s27 = sphi %s10090_s27, %s3025_s27   ;;  %v9028_v37 = vphi %v10088_v37, %v3340_v37   ;;  %v9024_v30 = vphi %v10086_v30, %v3338_v30  }
 0x505   : >> { %3263 = vmatprep.mubr.bf16.mxu0 %v9050_v39  ;;  %3304 = vmatprep.mubr.bf16.mxu1 %v9050_v39  ;;  %v8401_v40 = vld [vmem:[%s11666_s10 + $0x24] ss:$16 sps:$4 sm:$0xff]   ;;  %v8403_v41 = vld [vmem:[%s11666_s10 + $0x20] ss:$16 sps:$4 sm:$0xff]   ;;  %v8409_v45 = vld [vmem:[%s11666_s10 + $0xc] ss:$16 sps:$4 sm:$0xff]  }
 0x506   : >> { %3231 = vmatprep.subr.bf16.mxu0 %v8398_v15  ;;  %v8404_v44 = vld [vmem:[%s11666_s10 + $0x44] ss:$16 sps:$4 sm:$0xff]   ;;  %v8412_v48 = vld [vmem:[%s11666_s10 + $0x8] ss:$16 sps:$4 sm:$0xff]   ;;  %v8406_v46 = vld [vmem:[%s11666_s10 + $0x40] ss:$16 sps:$4 sm:$0xff]   ;;  %3272 = vmatprep.subr.bf16.mxu1 %v8409_v45 }
 0x507   : >> { %3232 = vmatpush1.bf16.msra.mxu0 %v8400_v16  ;;  %v8407_v52 = vld [vmem:[%s11666_s10 + $0x64] ss:$16 sps:$4 sm:$0xff]   ;;  %3273 = vmatpush1.bf16.msra.mxu1 %v8412_v48  ;;  %v8415_v59 = vld [vmem:[%s11666_s10 + $0x2c] ss:$16 sps:$4 sm:$0xff]   ;;  %v8418_v38 = vld [vmem:[%s11666_s10 + $0x28] ss:$16 sps:$4 sm:$0xff]  }
 0x508   : >> { %3233 = vmatprep.subr.bf16.mxu0 %v8401_v40  ;;  %3274 = vmatprep.subr.bf16.mxu1 %v8415_v59  ;;  %v8411_v61 = vld [vmem:[%s11666_s10 + $0x60] ss:$16 sps:$4 sm:$0xff]   ;;  %v8413_v43 = vld [vmem:[%s11666_s10 + $0x84] ss:$16 sps:$4 sm:$0xff]   ;;  %v8421_v49 = vld [vmem:[%s11666_s10 + $0x4c] ss:$16 sps:$4 sm:$0xff]  }
 0x509   : >> { %v8424_v51 = vld [vmem:[%s11666_s10 + $0x48] ss:$16 sps:$4 sm:$0xff]   ;;  %v8427_v53 = vld [vmem:[%s11666_s10 + $0x6c] ss:$16 sps:$4 sm:$0xff]   ;;  %v8417_v54 = vld [vmem:[%s11666_s10 + $0x80] ss:$16 sps:$4 sm:$0xff]  }
 0x50a   : >> { %v8419_v60 = vld [vmem:[%s11666_s10 + $0xa4] ss:$16 sps:$4 sm:$0xff]   ;;  %v8430_v55 = vld [vmem:[%s11666_s10 + $0x68] ss:$16 sps:$4 sm:$0xff]   ;;  %v8433_v57 = vld [vmem:[%s11666_s10 + $0x8c] ss:$16 sps:$4 sm:$0xff]  }
 0x50b   : >> { %3234 = vmatpush1.bf16.msra.mxu0 %v8403_v41  ;;  %3275 = vmatpush1.bf16.msra.mxu1 %v8418_v38  ;;  %v8423_v0 = vld [vmem:[%s11666_s10 + $0xa0] ss:$16 sps:$4 sm:$0xff]   ;;  %v8425_v5 = vld [vmem:[%s11666_s10 + $0xc4] ss:$16 sps:$4 sm:$0xff]   ;;  %v8436_v62 = vld [vmem:[%s11666_s10 + $0x88] ss:$16 sps:$4 sm:$0xff]  }
 0x50c   : >> { %3235 = vmatprep.subr.bf16.mxu0 %v8404_v44  ;;  %3276 = vmatprep.subr.bf16.mxu1 %v8421_v49  ;;  %v8437_v8 = vld [vmem:[%s11666_s10 + $0xac] ss:$16 sps:$4 sm:$0xff]   ;;  %v8429_v42 = vld [vmem:[%s11666_s10 + $0xc0] ss:$16 sps:$4 sm:$0xff]   ;;  %v8431_v56 = vld [vmem:[%s11666_s10 + $0xe4] ss:$16 sps:$4 sm:$0xff]  }
 0x50d   : >> { %v8439_v3 = vld [vmem:[%s11666_s10 + $0xa8] ss:$16 sps:$4 sm:$0xff]   ;;  %v8440_v27 = vld [vmem:[%s11666_s10 + $0xcc] ss:$16 sps:$4 sm:$0xff]   ;;  %v8435_v33 = vld [vmem:[%s11666_s10 + $0xe0] ss:$16 sps:$4 sm:$0xff]  }
 0x50e   : >> { %v8442_v18 = vld [vmem:[%s11666_s10 + $0xc8] ss:$16 sps:$4 sm:$0xff]   ;;  %v8443_v23 = vld [vmem:[%s11666_s10 + $0xec] ss:$16 sps:$4 sm:$0xff]   ;;  %s3029_s5 = sshra.s32 %s7340_s30, 3  ;;  %s3341_s25 = scalar_lea.vmem [#allocation4], %s7340_s30 }
 0x50f   : >> { %3236 = vmatpush1.bf16.msra.mxu0 %v8406_v46  ;;  %3277 = vmatpush1.bf16.msra.mxu1 %v8424_v51  ;;  %v8445_v22 = vld [vmem:[%s11666_s10 + $0xe8] ss:$16 sps:$4 sm:$0xff]   ;;  %s7803_s23 = sshll.u32 %s3029_s5, 5  ;;  %s3025_s27 = sadd.s32 1, %s9032_s27  }
 0x510   : >> { %3237 = vmatprep.subr.bf16.mxu0 %v8407_v52  ;;  %3278 = vmatprep.subr.bf16.mxu1 %v8427_v53  ;;  %s3033_s1 = scalar_lea.vmem [#allocation2], %s7803_s23  ;;  %p3022_p4 = scmp.ge.s32.totalorder %s3025_s27, 18  }
 0x511   : >> { %v3034_v47 = vld [vmem:[%s3033_s1] sm:$0xff]  ;;  %v3035_v9 = vld [vmem:[%s3033_s1 + $0x8] sm:$0xff]  ;;  %v3037_v24 = vld [vmem:[%s3033_s1 + $0x18] sm:$0xff]  ;;  %s10417_s28 = smov (%p3022_p4), 0  }
 0x512   : >> { %v3036_v32 = vld [vmem:[%s3033_s1 + $0x10] sm:$0xff]  ;;  %v8464_v59 = vld [vmem:[%s11668_s12 + $0xc] ss:$16 sps:$4 sm:$0xff] (%p3022_p4)   ;;  %v8473_v51 = vld [vmem:[%s11668_s12 + $0x28] ss:$16 sps:$4 sm:$0xff] (%p3022_p4)  }
 0x513   : >> { %3238 = vmatpush1.bf16.msra.mxu0 %v8411_v61  ;;  %3279 = vmatpush1.bf16.msra.mxu1 %v8430_v55  ;;  %v8462_v52 = vld [vmem:[%s11668_s12 + $0x4] ss:$16 sps:$4 sm:$0xff] (%p3022_p4)   ;;  %v8466_v38 = vld [vmem:[%s11668_s12] ss:$16 sps:$4 sm:$0xff] (%p3022_p4)   ;;  %v8479_v55 = vld [vmem:[%s11668_s12 + $0x48] ss:$16 sps:$4 sm:$0xff] (%p3022_p4)  }
 0x514   : >> { %3239 = vmatprep.subr.bf16.mxu0 %v8413_v43  ;;  %3280 = vmatprep.subr.bf16.mxu1 %v8433_v57  ;;  %v8468_v61 = vld [vmem:[%s11668_s12 + $0x24] ss:$16 sps:$4 sm:$0xff] (%p3022_p4)   ;;  %v8470_v43 = vld [vmem:[%s11668_s12 + $0x2c] ss:$16 sps:$4 sm:$0xff] (%p3022_p4)   ;;  %v8472_v49 = vld [vmem:[%s11668_s12 + $0x20] ss:$16 sps:$4 sm:$0xff] (%p3022_p4)  }
 0x515   : > { %v8474_v53 = vld [vmem:[%s11668_s12 + $0x44] ss:$16 sps:$4 sm:$0xff] (%p3022_p4)  }
 0x516   : > { %v8480_v57 = vld [vmem:[%s11668_s12 + $0x64] ss:$16 sps:$4 sm:$0xff] (%p3022_p4)  }
 0x517   : >> { %3240 = vmatpush1.bf16.msra.mxu0 %v8417_v54  ;;  %3281 = vmatpush1.bf16.msra.mxu1 %v8436_v62  ;;  %v8476_v54 = vld [vmem:[%s11668_s12 + $0x4c] ss:$16 sps:$4 sm:$0xff] (%p3022_p4)   ;;  %v8485_v62 = vld [vmem:[%s11668_s12 + $0x68] ss:$16 sps:$4 sm:$0xff] (%p3022_p4)  }
 0x518   : >> { %3241 = vmatprep.subr.bf16.mxu0 %v8419_v60  ;;  %3282 = vmatprep.subr.bf16.mxu1 %v8437_v8  ;;  %v8478_v60 = vld [vmem:[%s11668_s12 + $0x40] ss:$16 sps:$4 sm:$0xff] (%p3022_p4)   ;;  %v8486_v8 = vld [vmem:[%s11668_s12 + $0x84] ss:$16 sps:$4 sm:$0xff] (%p3022_p4)  }
 0x51b   : >> { %3242 = vmatpush1.bf16.msra.mxu0 %v8423_v0  ;;  %3283 = vmatpush1.bf16.msra.mxu1 %v8439_v3  ;;  %v8482_v0 = vld [vmem:[%s11668_s12 + $0x6c] ss:$16 sps:$4 sm:$0xff] (%p3022_p4)   ;;  %v8491_v3 = vld [vmem:[%s11668_s12 + $0x88] ss:$16 sps:$4 sm:$0xff] (%p3022_p4)  }
 0x51c   : >> { %3243 = vmatprep.subr.bf16.mxu0 %v8425_v5  ;;  %3284 = vmatprep.subr.bf16.mxu1 %v8440_v27  ;;  %v8484_v5 = vld [vmem:[%s11668_s12 + $0x60] ss:$16 sps:$4 sm:$0xff] (%p3022_p4)   ;;  %v8492_v27 = vld [vmem:[%s11668_s12 + $0xa4] ss:$16 sps:$4 sm:$0xff] (%p3022_p4)  }
 0x51f   : >> { %3244 = vmatpush1.bf16.msra.mxu0 %v8429_v42  ;;  %3285 = vmatpush1.bf16.msra.mxu1 %v8442_v18  ;;  %v8488_v42 = vld [vmem:[%s11668_s12 + $0x8c] ss:$16 sps:$4 sm:$0xff] (%p3022_p4)   ;;  %v8496_v18 = vld [vmem:[%s11668_s12 + $0xa0] ss:$16 sps:$4 sm:$0xff] (%p3022_p4)  }
 0x520   : >> { %3245 = vmatprep.subr.bf16.mxu0 %v8431_v56  ;;  %3286 = vmatprep.subr.bf16.mxu1 %v8443_v23  ;;  %v8490_v56 = vld [vmem:[%s11668_s12 + $0x80] ss:$16 sps:$4 sm:$0xff] (%p3022_p4)   ;;  %v8497_v23 = vld [vmem:[%s11668_s12 + $0xa8] ss:$16 sps:$4 sm:$0xff] (%p3022_p4)  }
 0x523   : >> { %3246 = vmatpush1.bf16.msra.mxu0 %v8435_v33  ;;  %3287 = vmatpush1.bf16.msra.mxu1 %v8445_v22  ;;  %v8494_v33 = vld [vmem:[%s11668_s12 + $0xac] ss:$16 sps:$4 sm:$0xff] (%p3022_p4)  }
 0x524   : > { %3584 = vmatprep.subr.bf16.mxu0 (%p3022_p4), %v8462_v52  ;;  %3707 = vmatprep.subr.bf16.mxu1 (%p3022_p4), %v8464_v59  ;;  %v8500_v22 = vld [vmem:[%s11668_s12 + $0xcc] ss:$16 sps:$4 sm:$0xff] (%p3022_p4)   ;;  %v3402_v59 = vld [vmem:[%s11670_s14] sm:$0xf] (%p3022_p4) }
 0x526   : >> { %3264 = vmatmul.mubr.bf16.vlgmr.msra.gmra.mrb[0].mxu0 %v3038_v17  ;;  %3305 = vmatmul.mubr.bf16.vlgmr.msra.gmra.mrb[0].mxu1 %v3038_v17  ;;  %v8498_v17 = vld [vmem:[%s11668_s12 + $0xc4] ss:$16 sps:$4 sm:$0xff] (%p3022_p4)  }
 0x527   : > { %3616 = vmatprep.mubr.bf16.mxu0 (%p3022_p4), %v9046_v1  ;;  %3739 = vmatprep.mubr.bf16.mxu1 (%p3022_p4), %v9046_v1 }
 0x528   : > { %3585 = vmatpush1.bf16.msra.mxu0 (%p3022_p4), %v8466_v38  ;;  %v10330_v38 = vrot.slane (%p3022_p4), %v3402_v59, %v9784_v63 }
 0x529   : > { %3586 = vmatprep.subr.bf16.mxu0 (%p3022_p4), %v8468_v61  ;;  %v10336_v61 = vrot.slane (%p3022_p4), %v3402_v59, %v9790_v4 }
 0x52c   : > { %3587 = vmatpush1.bf16.msra.mxu0 (%p3022_p4), %v8472_v49 }
 0x52d   : > { %3588 = vmatprep.subr.bf16.mxu0 (%p3022_p4), %v8474_v53 }
 0x530   : > { %3589 = vmatpush1.bf16.msra.mxu0 (%p3022_p4), %v8478_v60 }
 0x531   : > { %3590 = vmatprep.subr.bf16.mxu0 (%p3022_p4), %v8480_v57 }
 0x534   : > { %3591 = vmatpush1.bf16.msra.mxu0 (%p3022_p4), %v8484_v5 }
 0x535   : > { %3592 = vmatprep.subr.bf16.mxu0 (%p3022_p4), %v8486_v8 }
 0x538   : > { %3593 = vmatpush1.bf16.msra.mxu0 (%p3022_p4), %v8490_v56 }
 0x539   : > { %3594 = vmatprep.subr.bf16.mxu0 (%p3022_p4), %v8492_v27 }
 0x53c   : > { %3595 = vmatpush1.bf16.msra.mxu0 (%p3022_p4), %v8496_v18 }
 0x53d   : > { %3596 = vmatprep.subr.bf16.mxu0 (%p3022_p4), %v8498_v17 }
 0x5f9   : >> { %v3265_v10 = vpop.f32.mrb[0].mxu0  ;;  %v3306_v50 = vpop.f32.mrb[0].mxu1 }
 0x5fa   : >> { %v3313_v12 = vadd.f32 %v3265_v10, %v3034_v47  ;;  %v3267_v13 = vpop.f32.mrb[1].mxu0  ;;  %v3308_v25 = vpop.f32.mrb[1].mxu1  ;;  %v3315_v28 = vadd.f32 %v3306_v50, %v3036_v32  ;;  %v8502_v47 = vld [vmem:[%s11668_s12 + $0xc0] ss:$16 sps:$4 sm:$0xff] (%p3022_p4)   ;;  %v8504_v10 = vld [vmem:[%s11668_s12 + $0xe4] ss:$16 sps:$4 sm:$0xff] (%p3022_p4)  }
 0x5fb   : >> { %v3314_v14 = vadd.f32 %v3267_v13, %v3035_v9  ;;  %v3269_v19 = vpop.f32.mrb[2].mxu0  ;;  %v3316_v26 = vadd.f32 %v3308_v25, %v3037_v24  ;;  %v3310_v29 = vpop.f32.mrb[2].mxu1  ;;  %v8503_v9 = vld [vmem:[%s11668_s12 + $0xc8] ss:$16 sps:$4 sm:$0xff] (%p3022_p4)   ;;  %v8508_v13 = vld [vmem:[%s11668_s12 + $0xe0] ss:$16 sps:$4 sm:$0xff] (%p3022_p4)   ;;  %3597 = vmatpush1.bf16.msra.mxu0 (%p3022_p4), %v8502_v47 }
 0x5fc   : >> { %v7375_v20 = vmul.f32 -1.442695, %v3313_v12  ;;  %v3270_v21 = vpop.f32.mrb[3].mxu0  ;;  %v3311_v6 = vpop.f32.mrb[3].mxu1  ;;  %v8506_v12 = vld [vmem:[%s11668_s12 + $0xec] ss:$16 sps:$4 sm:$0xff] (%p3022_p4)   ;;  %3598 = vmatprep.subr.bf16.mxu0 (%p3022_p4), %v8504_v10 }
 0x5fd   : >> { %v7376_v7 = vmul.f32 -1.442695, %v3314_v14  ;;  %v7377_v34 = vmul.f32 -1.442695, %v3316_v26  ;;  %v8509_v14 = vld [vmem:[%s11668_s12 + $0xe8] ss:$16 sps:$4 sm:$0xff] (%p3022_p4)  }
 0x5fe   : >> { %8446 = vpow2.f32 %v7375_v20 }
 0x5ff   : >> { %8448 = vpow2.f32 %v7376_v7  ;;  %3599 = vmatpush1.bf16.msra.mxu0 (%p3022_p4), %v8508_v13 }
 0x600   : >> { %8450 = vpow2.f32 %v7377_v34 }
 0x601   : >> { %8452 = vtanh.f32 %v3315_v28 }
 0x608   : >> { %v8447_v35 = vpop.eup %8446 }
 0x609   : >> { %v8449_v36 = vpop.eup %8448  ;;  %v3320_v31 = vadd.f32 1.0, %v8447_v35 }
 0x60a   : >> { %v3326_v37 = vadd.f32 1.0, %v8449_v36  ;;  %v8451_v15 = vpop.eup %8450 }
 0x60b   : >> { %8454 = vrcp.f32 %v3320_v31  ;;  %v8453_v16 = vpop.eup %8452  ;;  %v3333_v40 = vadd.f32 1.0, %v8451_v15 }
 0x60c   : >> { %8456 = vrcp.f32 %v3326_v37 }
 0x60d   : >> { %8458 = vrcp.f32 %v3333_v40 }
 0x615   : >> { %v8455_v39 = vpop.eup %8454 }
 0x616   : >> { %v8457_v41 = vpop.eup %8456  ;;  %v3337_v44 = vmul.f32 %v8455_v39, %v8453_v16 }
 0x617   : >> { %v3336_v45 = vmul.f32 %v9024_v30, %v8457_v41  ;;  %v8459_v48 = vpop.eup %8458 }
 0x619   : >> { %v3338_v30 = vadd.f32 %v3337_v44, %v3336_v45  }
 0x61b   : >> { %8460 = vtanh.f32 %v3338_v30  ;;  %v8467_v30 = vld [vmem:[%s11668_s12 + $0x8] ss:$16 sps:$4 sm:$0xff] (%p3022_p4)  }
 0x61c   : > { %3708 = vmatpush1.bf16.msra.mxu1 (%p3022_p4), %v8467_v30  ;;  %v10333_v30 = vrot.slane (%p3022_p4), %v3402_v59, %v10034_v2 }
 0x61d   : > { %3709 = vmatprep.subr.bf16.mxu1 (%p3022_p4), %v8470_v43  ;;  %v10339_v43 = vrot.slane (%p3022_p4), %v3402_v59, %v10038_v11 }
 0x620   : > { %3710 = vmatpush1.bf16.msra.mxu1 (%p3022_p4), %v8473_v51 }
 0x621   : > { %3711 = vmatprep.subr.bf16.mxu1 (%p3022_p4), %v8476_v54 }
 0x622   : > { %3024 = sbr.rel (!%p3022_p4) target bundleno = 1284 (0x504), region = 155 }
 0x624   : > { %3712 = vmatpush1.bf16.msra.mxu1 (%p3022_p4), %v8479_v55 }
 0x625   : >> { %v8461_v46 = vpop.eup %8460  ;;  %3713 = vmatprep.subr.bf16.mxu1 (%p3022_p4), %v8482_v0 }
 0x626   : >> { %v3340_v37 = vmul.f32 %v8461_v46, %v8459_v48  }
 0x628   : >> { %3342 = vst [vmem:[%s3341_s25] sm:$0xff] %v3340_v37  ;;  %3714 = vmatpush1.bf16.msra.mxu1 (%p3022_p4), %v8485_v62 }
 0x629   : > { %3715 = vmatprep.subr.bf16.mxu1 %v8488_v42 }
 0x62c   : > { %3716 = vmatpush1.bf16.msra.mxu1 %v8491_v3 }
 0x62d   : > { %3717 = vmatprep.subr.bf16.mxu1 %v8494_v33 }
 0x62f   : > { %v3343_v19 = vld [vmem:[#allocation4] sm:$0xff]  ;;  %v3344_v20 = vld [vmem:[#allocation4 + $0x8] sm:$0xff]  ;;  %v3345_v7 = vld [vmem:[#allocation4 + $0x10] sm:$0xff] }
 0x630   : > { %3718 = vmatpush1.bf16.msra.mxu1 %v8497_v23  ;;  %v3361_v21 = vpack.c.bf16 %v3344_v20, %v3343_v19  ;;  %v3346_v24 = vld [vmem:[#allocation4 + $0x18] sm:$0xff]  ;;  %v3347_v25 = vld [vmem:[#allocation4 + $0x20] sm:$0xff]  ;;  %v3348_v26 = vld [vmem:[#allocation4 + $0x28] sm:$0xff] }
 0x631   : > { %3719 = vmatprep.subr.bf16.mxu1 %v8500_v22  ;;  %v3362_v50 = vpack.c.bf16 %v3346_v24, %v3345_v7  ;;  %v3363_v29 = vpack.c.bf16 %v3348_v26, %v3347_v25  ;;  %v3349_v6 = vld [vmem:[#allocation4 + $0x30] sm:$0xff]  ;;  %v3350_v32 = vld [vmem:[#allocation4 + $0x38] sm:$0xff]  ;;  %v3351_v28 = vld [vmem:[#allocation4 + $0x40] sm:$0xff] }
 0x632   : > { %3617 = vmatmul.mubr.bf16.vlgmr.msra.gmra.mrb[0].mxu0 %v3361_v21  ;;  %v3364_v34 = vpack.c.bf16 %v3350_v32, %v3349_v6  ;;  %v3352_v35 = vld [vmem:[#allocation4 + $0x48] sm:$0xff]  ;;  %v3353_v31 = vld [vmem:[#allocation4 + $0x50] sm:$0xff]  ;;  %v3354_v37 = vld [vmem:[#allocation4 + $0x58] sm:$0xff] }
 0x633   : > { %3626 = vmatprep.mubr.bf16.mxu0 %v9046_v1  ;;  %v3365_v36 = vpack.c.bf16 %v3352_v35, %v3351_v28  ;;  %v3366_v15 = vpack.c.bf16 %v3354_v37, %v3353_v31  ;;  %v3355_v16 = vld [vmem:[#allocation4 + $0x60] sm:$0xff]  ;;  %v3356_v39 = vld [vmem:[#allocation4 + $0x68] sm:$0xff]  ;;  %v3357_v41 = vld [vmem:[#allocation4 + $0x70] sm:$0xff] }
 0x634   : > { %3720 = vmatpush1.bf16.msra.mxu1 %v8503_v9  ;;  %v3367_v40 = vpack.c.bf16 %v3356_v39, %v3355_v16  ;;  %v3358_v44 = vld [vmem:[#allocation4 + $0x78] sm:$0xff]  ;;  %v3359_v48 = vld [vmem:[#allocation4 + $0x80] sm:$0xff]  ;;  %v3360_v46 = vld [vmem:[#allocation4 + $0x88] sm:$0xff] }
 0x635   : > { %3721 = vmatprep.subr.bf16.mxu1 %v8506_v12  ;;  %v3368_v45 = vpack.c.bf16 %v3358_v44, %v3357_v41  ;;  %v3369_v52 = vpack.c.bf16 %v3360_v46, %v3359_v48 }
 0x638   : > { %3722 = vmatpush1.bf16.msra.mxu1 %v8509_v14 }
 0x63a   : > { %3627 = vmatmul.mubr.bf16.gmra.mrb[4].mxu0 %v3362_v50 }
 0x63b   : > { %3740 = vmatmul.mubr.bf16.vlgmr.msra.gmra.mrb[0].mxu1 %v3361_v21  ;;  %3636 = vmatprep.mubr.bf16.mxu0 %v9046_v1 }
 0x63c   : > { %3749 = vmatprep.mubr.bf16.mxu1 %v9046_v1 }
 0x642   : > { %3637 = vmatmul.mubr.bf16.gmra.mrb[8].mxu0 %v3363_v29 }
 0x643   : > { %3750 = vmatmul.mubr.bf16.gmra.mrb[4].mxu1 %v3362_v50  ;;  %3646 = vmatprep.mubr.bf16.mxu0 %v9046_v1 }
 0x644   : > { %3759 = vmatprep.mubr.bf16.mxu1 %v9046_v1 }
 0x64a   : > { %3647 = vmatmul.mubr.bf16.gmra.mrb[12].mxu0 %v3364_v34 }
 0x64b   : > { %3760 = vmatmul.mubr.bf16.gmra.mrb[8].mxu1 %v3363_v29  ;;  %3656 = vmatprep.mubr.bf16.mxu0 %v9046_v1 }
 0x64c   : > { %3769 = vmatprep.mubr.bf16.mxu1 %v9046_v1 }
 0x652   : > { %3657 = vmatmul.mubr.bf16.gmra.mrb[16].mxu0 %v3365_v36 }
 0x653   : > { %3770 = vmatmul.mubr.bf16.gmra.mrb[12].mxu1 %v3364_v34  ;;  %3666 = vmatprep.mubr.bf16.mxu0 %v9046_v1 }
 0x654   : > { %3779 = vmatprep.mubr.bf16.mxu1 %v9046_v1 }
 0x65a   : > { %3667 = vmatmul.mubr.bf16.gmra.mrb[20].mxu0 %v3366_v15 }
 0x65b   : > { %3780 = vmatmul.mubr.bf16.gmra.mrb[16].mxu1 %v3365_v36  ;;  %3676 = vmatprep.mubr.bf16.mxu0 %v9046_v1 }
 0x65c   : > { %3789 = vmatprep.mubr.bf16.mxu1 %v9046_v1 }
 0x662   : > { %3677 = vmatmul.mubr.bf16.gmra.mrb[24].mxu0 %v3367_v40 }
 0x663   : > { %3790 = vmatmul.mubr.bf16.gmra.mrb[20].mxu1 %v3366_v15  ;;  %3686 = vmatprep.mubr.bf16.mxu0 %v9046_v1 }
 0x664   : > { %3799 = vmatprep.mubr.bf16.mxu1 %v9046_v1 }
 0x66a   : > { %3687 = vmatmul.mubr.bf16.gmra.mrb[28].mxu0 %v3368_v45 }
 0x66b   : > { %3800 = vmatmul.mubr.bf16.gmra.mrb[24].mxu1 %v3367_v40  ;;  %3696 = vmatprep.mubr.bf16.mxu0 %v9046_v1 }
 0x66c   : > { %3809 = vmatprep.mubr.bf16.mxu1 %v9046_v1 }
 0x672   : > { %3697 = vmatmul.mubr.bf16.gmra.mrb[32].mxu0 %v3369_v52 }
 0x673   : > { %3810 = vmatmul.mubr.bf16.gmra.mrb[28].mxu1 %v3368_v45 }
 0x674   : > { %3819 = vmatprep.mubr.bf16.mxu1 %v9046_v1 }
 0x67b   : > { %3820 = vmatmul.mubr.bf16.gmra.mrb[32].mxu1 %v3369_v52 }
 0x705   : > { %v3618_v49 = vpop.f32.mrb[0].mxu0 }
 0x706   : > { %v3619_v53 = vadd.f32 %v3618_v49, %v10330_v38  ;;  %v3620_v60 = vpop.f32.mrb[1].mxu0 }
 0x707   : > { %v3621_v57 = vadd.f32 %v3620_v60, %v10336_v61  ;;  %v3622_v5 = vpop.f32.mrb[2].mxu0 }
 0x708   : > { %3830 = vst [vmem:[#allocation3] sm:$0xff] %v3619_v53  ;;  %v3623_v8 = vadd.f32 %v3622_v5, %v10330_v38  ;;  %v3624_v56 = vpop.f32.mrb[3].mxu0 }
 0x709   : > { %3831 = vst [vmem:[#allocation3 + $0x8] sm:$0xff] %v3621_v57  ;;  %v3625_v27 = vadd.f32 %v3624_v56, %v10336_v61 }
 0x70a   : > { %3834 = vst [vmem:[#allocation3 + $0x20] sm:$0xff] %v3623_v8 }
 0x70b   : > { %3835 = vst [vmem:[#allocation3 + $0x28] sm:$0xff] %v3625_v27 }
 0x70d   : > { %v3628_v18 = vpop.f32.mrb[4].mxu0 }
 0x70e   : > { %v3741_v51 = vpop.f32.mrb[0].mxu1  ;;  %v3629_v17 = vadd.f32 %v3628_v18, %v10330_v38  ;;  %v3630_v47 = vpop.f32.mrb[5].mxu0 }
 0x70f   : > { %v3742_v54 = vadd.f32 %v3741_v51, %v10333_v30  ;;  %v3743_v55 = vpop.f32.mrb[1].mxu1  ;;  %v3631_v10 = vadd.f32 %v3630_v47, %v10336_v61  ;;  %v3632_v13 = vpop.f32.mrb[6].mxu0 }
 0x710   : > { %v3744_v0 = vadd.f32 %v3743_v55, %v10339_v43  ;;  %v3745_v62 = vpop.f32.mrb[2].mxu1  ;;  %3838 = vst [vmem:[#allocation3 + $0x40] sm:$0xff] %v3629_v17  ;;  %v3633_v19 = vadd.f32 %v3632_v13, %v10330_v38  ;;  %v3634_v21 = vpop.f32.mrb[7].mxu0 }
 0x711   : > { %3832 = vst [vmem:[#allocation3 + $0x10] sm:$0xff] %v3742_v54  ;;  %v3746_v42 = vadd.f32 %v3745_v62, %v10333_v30  ;;  %v3747_v3 = vpop.f32.mrb[3].mxu1  ;;  %3839 = vst [vmem:[#allocation3 + $0x48] sm:$0xff] %v3631_v10  ;;  %v3635_v24 = vadd.f32 %v3634_v21, %v10336_v61 }
 0x712   : > { %3833 = vst [vmem:[#allocation3 + $0x18] sm:$0xff] %v3744_v0  ;;  %v3748_v33 = vadd.f32 %v3747_v3, %v10339_v43  ;;  %3842 = vst [vmem:[#allocation3 + $0x60] sm:$0xff] %v3633_v19 }
 0x713   : > { %3836 = vst [vmem:[#allocation3 + $0x30] sm:$0xff] %v3746_v42  ;;  %3843 = vst [vmem:[#allocation3 + $0x68] sm:$0xff] %v3635_v24 }
 0x714   : > { %3837 = vst [vmem:[#allocation3 + $0x38] sm:$0xff] %v3748_v33 }
 0x715   : > { %v3638_v25 = vpop.f32.mrb[8].mxu0 }
 0x716   : > { %v3751_v23 = vpop.f32.mrb[4].mxu1  ;;  %v3639_v29 = vadd.f32 %v3638_v25, %v10330_v38  ;;  %v3640_v32 = vpop.f32.mrb[9].mxu0 }
 0x717   : > { %v3752_v22 = vadd.f32 %v3751_v23, %v10333_v30  ;;  %v3753_v9 = vpop.f32.mrb[5].mxu1  ;;  %v3641_v28 = vadd.f32 %v3640_v32, %v10336_v61  ;;  %v3642_v36 = vpop.f32.mrb[10].mxu0 }
 0x718   : > { %v3754_v12 = vadd.f32 %v3753_v9, %v10339_v43  ;;  %v3755_v14 = vpop.f32.mrb[6].mxu1  ;;  %3846 = vst [vmem:[#allocation3 + $0x80] sm:$0xff] %v3639_v29  ;;  %v3643_v37 = vadd.f32 %v3642_v36, %v10330_v38  ;;  %v3644_v16 = vpop.f32.mrb[11].mxu0 }
 0x719   : > { %3840 = vst [vmem:[#allocation3 + $0x50] sm:$0xff] %v3752_v22  ;;  %v3756_v20 = vadd.f32 %v3755_v14, %v10333_v30  ;;  %v3757_v7 = vpop.f32.mrb[7].mxu1  ;;  %3847 = vst [vmem:[#allocation3 + $0x88] sm:$0xff] %v3641_v28  ;;  %v3645_v40 = vadd.f32 %v3644_v16, %v10336_v61 }
 0x71a   : > { %3841 = vst [vmem:[#allocation3 + $0x58] sm:$0xff] %v3754_v12  ;;  %v3758_v50 = vadd.f32 %v3757_v7, %v10339_v43  ;;  %3850 = vst [vmem:[#allocation3 + $0xa0] sm:$0xff] %v3643_v37 }
 0x71b   : > { %3844 = vst [vmem:[#allocation3 + $0x70] sm:$0xff] %v3756_v20  ;;  %3851 = vst [vmem:[#allocation3 + $0xa8] sm:$0xff] %v3645_v40 }
 0x71c   : > { %3845 = vst [vmem:[#allocation3 + $0x78] sm:$0xff] %v3758_v50 }
 0x71d   : > { %v3648_v44 = vpop.f32.mrb[12].mxu0 }
 0x71e   : > { %v3761_v26 = vpop.f32.mrb[8].mxu1  ;;  %v3649_v48 = vadd.f32 %v3648_v44, %v10330_v38  ;;  %v3650_v52 = vpop.f32.mrb[13].mxu0 }
 0x71f   : > { %v3762_v6 = vadd.f32 %v3761_v26, %v10333_v30  ;;  %v3763_v34 = vpop.f32.mrb[9].mxu1  ;;  %v3651_v49 = vadd.f32 %v3650_v52, %v10336_v61  ;;  %v3652_v53 = vpop.f32.mrb[14].mxu0 }
 0x720   : > { %v3764_v35 = vadd.f32 %v3763_v34, %v10339_v43  ;;  %v3765_v31 = vpop.f32.mrb[10].mxu1  ;;  %3854 = vst [vmem:[#allocation3 + $0xc0] sm:$0xff] %v3649_v48  ;;  %v3653_v60 = vadd.f32 %v3652_v53, %v10330_v38  ;;  %v3654_v57 = vpop.f32.mrb[15].mxu0 }
 0x721   : > { %3848 = vst [vmem:[#allocation3 + $0x90] sm:$0xff] %v3762_v6  ;;  %v3766_v15 = vadd.f32 %v3765_v31, %v10333_v30  ;;  %v3767_v39 = vpop.f32.mrb[11].mxu1  ;;  %3855 = vst [vmem:[#allocation3 + $0xc8] sm:$0xff] %v3651_v49  ;;  %v3655_v5 = vadd.f32 %v3654_v57, %v10336_v61 }
 0x722   : > { %3849 = vst [vmem:[#allocation3 + $0x98] sm:$0xff] %v3764_v35  ;;  %v3768_v41 = vadd.f32 %v3767_v39, %v10339_v43  ;;  %3858 = vst [vmem:[#allocation3 + $0xe0] sm:$0xff] %v3653_v60 }
 0x723   : > { %3852 = vst [vmem:[#allocation3 + $0xb0] sm:$0xff] %v3766_v15  ;;  %3859 = vst [vmem:[#allocation3 + $0xe8] sm:$0xff] %v3655_v5 }
 0x724   : > { %3853 = vst [vmem:[#allocation3 + $0xb8] sm:$0xff] %v3768_v41 }
 0x725   : > { %v3658_v8 = vpop.f32.mrb[16].mxu0 }
 0x726   : > { %v3771_v45 = vpop.f32.mrb[12].mxu1  ;;  %v3659_v56 = vadd.f32 %v3658_v8, %v10330_v38  ;;  %v3660_v27 = vpop.f32.mrb[17].mxu0 }
 0x727   : > { %v3772_v46 = vadd.f32 %v3771_v45, %v10333_v30  ;;  %v3773_v59 = vpop.f32.mrb[13].mxu1  ;;  %v3661_v18 = vadd.f32 %v3660_v27, %v10336_v61  ;;  %v3662_v17 = vpop.f32.mrb[18].mxu0 }
 0x728   : > { %v3774_v51 = vadd.f32 %v3773_v59, %v10339_v43  ;;  %v3775_v54 = vpop.f32.mrb[14].mxu1  ;;  %3862 = vst [vmem:[#allocation3 + $0x100] sm:$0xff] %v3659_v56  ;;  %v3663_v47 = vadd.f32 %v3662_v17, %v10330_v38  ;;  %v3664_v10 = vpop.f32.mrb[19].mxu0 }
 0x729   : > { %3856 = vst [vmem:[#allocation3 + $0xd0] sm:$0xff] %v3772_v46  ;;  %v3776_v55 = vadd.f32 %v3775_v54, %v10333_v30  ;;  %v3777_v0 = vpop.f32.mrb[15].mxu1  ;;  %3863 = vst [vmem:[#allocation3 + $0x108] sm:$0xff] %v3661_v18  ;;  %v3665_v13 = vadd.f32 %v3664_v10, %v10336_v61 }
 0x72a   : > { %3857 = vst [vmem:[#allocation3 + $0xd8] sm:$0xff] %v3774_v51  ;;  %v3778_v62 = vadd.f32 %v3777_v0, %v10339_v43  ;;  %3866 = vst [vmem:[#allocation3 + $0x120] sm:$0xff] %v3663_v47 }
 0x72b   : > { %3860 = vst [vmem:[#allocation3 + $0xf0] sm:$0xff] %v3776_v55  ;;  %3867 = vst [vmem:[#allocation3 + $0x128] sm:$0xff] %v3665_v13 }
 0x72c   : > { %3861 = vst [vmem:[#allocation3 + $0xf8] sm:$0xff] %v3778_v62 }
 0x72d   : > { %v3668_v19 = vpop.f32.mrb[20].mxu0 }
 0x72e   : > { %v3781_v42 = vpop.f32.mrb[16].mxu1  ;;  %v3669_v21 = vadd.f32 %v3668_v19, %v10330_v38  ;;  %v3670_v24 = vpop.f32.mrb[21].mxu0 }
 0x72f   : > { %v3782_v3 = vadd.f32 %v3781_v42, %v10333_v30  ;;  %v3783_v33 = vpop.f32.mrb[17].mxu1  ;;  %v3671_v25 = vadd.f32 %v3670_v24, %v10336_v61  ;;  %v3672_v29 = vpop.f32.mrb[22].mxu0 }
 0x730   : > { %v3784_v23 = vadd.f32 %v3783_v33, %v10339_v43  ;;  %v3785_v22 = vpop.f32.mrb[18].mxu1  ;;  %3870 = vst [vmem:[#allocation3 + $0x140] sm:$0xff] %v3669_v21  ;;  %v3673_v32 = vadd.f32 %v3672_v29, %v10330_v38  ;;  %v3674_v28 = vpop.f32.mrb[23].mxu0 }
 0x731   : > { %3864 = vst [vmem:[#allocation3 + $0x110] sm:$0xff] %v3782_v3  ;;  %v3786_v9 = vadd.f32 %v3785_v22, %v10333_v30  ;;  %v3787_v12 = vpop.f32.mrb[19].mxu1  ;;  %3871 = vst [vmem:[#allocation3 + $0x148] sm:$0xff] %v3671_v25  ;;  %v3675_v36 = vadd.f32 %v3674_v28, %v10336_v61 }
 0x732   : > { %3865 = vst [vmem:[#allocation3 + $0x118] sm:$0xff] %v3784_v23  ;;  %v3788_v14 = vadd.f32 %v3787_v12, %v10339_v43  ;;  %3874 = vst [vmem:[#allocation3 + $0x160] sm:$0xff] %v3673_v32  ;;  %v10413_v32 = vmov 0.0  }
 0x733   : > { %3868 = vst [vmem:[#allocation3 + $0x130] sm:$0xff] %v3786_v9  ;;  %3875 = vst [vmem:[#allocation3 + $0x168] sm:$0xff] %v3675_v36 }
 0x734   : > { %3869 = vst [vmem:[#allocation3 + $0x138] sm:$0xff] %v3788_v14 }
 0x735   : > { %v3678_v37 = vpop.f32.mrb[24].mxu0 }
 0x736   : > { %v3791_v20 = vpop.f32.mrb[20].mxu1  ;;  %v3679_v16 = vadd.f32 %v3678_v37, %v10330_v38  ;;  %v3680_v40 = vpop.f32.mrb[25].mxu0 }
 0x737   : > { %v3792_v7 = vadd.f32 %v3791_v20, %v10333_v30  ;;  %v3793_v50 = vpop.f32.mrb[21].mxu1  ;;  %v3681_v44 = vadd.f32 %v3680_v40, %v10336_v61  ;;  %v3682_v48 = vpop.f32.mrb[26].mxu0 }
 0x738   : > { %v3794_v26 = vadd.f32 %v3793_v50, %v10339_v43  ;;  %v3795_v6 = vpop.f32.mrb[22].mxu1  ;;  %3878 = vst [vmem:[#allocation3 + $0x180] sm:$0xff] %v3679_v16  ;;  %v3683_v52 = vadd.f32 %v3682_v48, %v10330_v38  ;;  %v3684_v49 = vpop.f32.mrb[27].mxu0 }
 0x739   : > { %3872 = vst [vmem:[#allocation3 + $0x150] sm:$0xff] %v3792_v7  ;;  %v3796_v34 = vadd.f32 %v3795_v6, %v10333_v30  ;;  %v3797_v35 = vpop.f32.mrb[23].mxu1  ;;  %3879 = vst [vmem:[#allocation3 + $0x188] sm:$0xff] %v3681_v44  ;;  %v3685_v53 = vadd.f32 %v3684_v49, %v10336_v61 }
 0x73a   : > { %3873 = vst [vmem:[#allocation3 + $0x158] sm:$0xff] %v3794_v26  ;;  %v3798_v31 = vadd.f32 %v3797_v35, %v10339_v43  ;;  %3882 = vst [vmem:[#allocation3 + $0x1a0] sm:$0xff] %v3683_v52 }
 0x73b   : > { %3876 = vst [vmem:[#allocation3 + $0x170] sm:$0xff] %v3796_v34  ;;  %3883 = vst [vmem:[#allocation3 + $0x1a8] sm:$0xff] %v3685_v53  ;;  %v10415_v34 = vmov 0.0  }
 0x73c   : > { %3877 = vst [vmem:[#allocation3 + $0x178] sm:$0xff] %v3798_v31 }
 0x73d   : > { %v3688_v60 = vpop.f32.mrb[28].mxu0 }
 0x73e   : > { %v3801_v15 = vpop.f32.mrb[24].mxu1  ;;  %v3689_v57 = vadd.f32 %v3688_v60, %v10330_v38  ;;  %v3690_v5 = vpop.f32.mrb[29].mxu0 }
 0x73f   : > { %v3802_v39 = vadd.f32 %v3801_v15, %v10333_v30  ;;  %v3803_v41 = vpop.f32.mrb[25].mxu1  ;;  %v3691_v8 = vadd.f32 %v3690_v5, %v10336_v61  ;;  %v3692_v56 = vpop.f32.mrb[30].mxu0 }
 0x740   : > { %v3804_v45 = vadd.f32 %v3803_v41, %v10339_v43  ;;  %v3805_v46 = vpop.f32.mrb[26].mxu1  ;;  %3886 = vst [vmem:[#allocation3 + $0x1c0] sm:$0xff] %v3689_v57  ;;  %v3693_v27 = vadd.f32 %v3692_v56, %v10330_v38  ;;  %v3694_v18 = vpop.f32.mrb[31].mxu0 }
 0x741   : > { %3880 = vst [vmem:[#allocation3 + $0x190] sm:$0xff] %v3802_v39  ;;  %v3806_v59 = vadd.f32 %v3805_v46, %v10333_v30  ;;  %v3807_v51 = vpop.f32.mrb[27].mxu1  ;;  %3887 = vst [vmem:[#allocation3 + $0x1c8] sm:$0xff] %v3691_v8  ;;  %v3695_v17 = vadd.f32 %v3694_v18, %v10336_v61 }
 0x742   : > { %3881 = vst [vmem:[#allocation3 + $0x198] sm:$0xff] %v3804_v45  ;;  %v3808_v54 = vadd.f32 %v3807_v51, %v10339_v43  ;;  %3890 = vst [vmem:[#allocation3 + $0x1e0] sm:$0xff] %v3693_v27 }
 0x743   : > { %3884 = vst [vmem:[#allocation3 + $0x1b0] sm:$0xff] %v3806_v59  ;;  %3891 = vst [vmem:[#allocation3 + $0x1e8] sm:$0xff] %v3695_v17 }
 0x744   : > { %3885 = vst [vmem:[#allocation3 + $0x1b8] sm:$0xff] %v3808_v54 }
 0x745   : > { %v3698_v47 = vpop.f32.mrb[32].mxu0 }
 0x746   : > { %v3811_v55 = vpop.f32.mrb[28].mxu1  ;;  %v3699_v10 = vadd.f32 %v3698_v47, %v10330_v38  ;;  %v3700_v13 = vpop.f32.mrb[33].mxu0 }
 0x747   : > { %v3812_v0 = vadd.f32 %v3811_v55, %v10333_v30  ;;  %v3813_v62 = vpop.f32.mrb[29].mxu1  ;;  %v3701_v19 = vadd.f32 %v3700_v13, %v10336_v61  ;;  %v3702_v21 = vpop.f32.mrb[34].mxu0 }
 0x748   : > { %v3814_v42 = vadd.f32 %v3813_v62, %v10339_v43  ;;  %v3815_v3 = vpop.f32.mrb[30].mxu1  ;;  %3894 = vst [vmem:[#allocation3 + $0x200] sm:$0xff] %v3699_v10  ;;  %v3703_v24 = vadd.f32 %v3702_v21, %v10330_v38  ;;  %v3704_v25 = vpop.f32.mrb[35].mxu0 }
 0x749   : > { %3888 = vst [vmem:[#allocation3 + $0x1d0] sm:$0xff] %v3812_v0  ;;  %v3816_v33 = vadd.f32 %v3815_v3, %v10333_v30  ;;  %v3817_v23 = vpop.f32.mrb[31].mxu1  ;;  %3895 = vst [vmem:[#allocation3 + $0x208] sm:$0xff] %v3701_v19  ;;  %v3705_v29 = vadd.f32 %v3704_v25, %v10336_v61 }
 0x74a   : > { %3889 = vst [vmem:[#allocation3 + $0x1d8] sm:$0xff] %v3814_v42  ;;  %v3818_v22 = vadd.f32 %v3817_v23, %v10339_v43  ;;  %3898 = vst [vmem:[#allocation3 + $0x220] sm:$0xff] %v3703_v24 }
 0x74b   : > { %3892 = vst [vmem:[#allocation3 + $0x1f0] sm:$0xff] %v3816_v33  ;;  %3899 = vst [vmem:[#allocation3 + $0x228] sm:$0xff] %v3705_v29 }
 0x74c   : > { %3893 = vst [vmem:[#allocation3 + $0x1f8] sm:$0xff] %v3818_v22 }
 0x74e   : > { %v3821_v9 = vpop.f32.mrb[32].mxu1 }
 0x74f   : > { %v3822_v12 = vadd.f32 %v3821_v9, %v10333_v30  ;;  %v3823_v14 = vpop.f32.mrb[33].mxu1 }
 0x750   : > { %v3824_v20 = vadd.f32 %v3823_v14, %v10339_v43  ;;  %v3825_v7 = vpop.f32.mrb[34].mxu1 }
 0x751   : > { %3896 = vst [vmem:[#allocation3 + $0x210] sm:$0xff] %v3822_v12  ;;  %v3826_v50 = vadd.f32 %v3825_v7, %v10333_v30  ;;  %v3827_v26 = vpop.f32.mrb[35].mxu1 }
 0x752   : > { %3897 = vst [vmem:[#allocation3 + $0x218] sm:$0xff] %v3824_v20  ;;  %v3828_v6 = vadd.f32 %v3827_v26, %v10339_v43 }
 0x753   : > { %3900 = vst [vmem:[#allocation3 + $0x230] sm:$0xff] %v3826_v50 }
 0x754   : > { %3901 = vst [vmem:[#allocation3 + $0x238] sm:$0xff] %v3828_v6 }
 0x755 LB: >> { %v8510_v38 = vld [vmem:[%s11669_s13 + $0x4] ss:$16 sps:$4 sm:$0xff]   ;;  %v8512_v30 = vld [vmem:[%s11669_s13] ss:$16 sps:$4 sm:$0xff]   ;;  %v9051_v61 = vmov 0   ;;  %v3920_v56 = vpack.c.bf16 %v9040_v34, %v9040_v34  ;;  %s7410_s30 = sshll.u32 %s9044_s28, 3  ;;  %s9044_s28 = sphi %s10417_s28, %s3907_s28   ;;  %v9040_v34 = vphi %v10415_v34, %v11695_v34   ;;  %v9036_v32 = vphi %v10413_v32, %v4220_v32  }
 0x756   : >> { %4145 = vmatprep.mubr.bf16.mxu0 %v9051_v61  ;;  %4186 = vmatprep.mubr.bf16.mxu1 %v9051_v61  ;;  %v8513_v43 = vld [vmem:[%s11669_s13 + $0x24] ss:$16 sps:$4 sm:$0xff]   ;;  %v8515_v28 = vld [vmem:[%s11669_s13 + $0x20] ss:$16 sps:$4 sm:$0xff]   ;;  %v8521_v36 = vld [vmem:[%s11669_s13 + $0xc] ss:$16 sps:$4 sm:$0xff]  }
 0x757   : >> { %4113 = vmatprep.subr.bf16.mxu0 %v8510_v38  ;;  %v8516_v35 = vld [vmem:[%s11669_s13 + $0x44] ss:$16 sps:$4 sm:$0xff]   ;;  %v8524_v31 = vld [vmem:[%s11669_s13 + $0x8] ss:$16 sps:$4 sm:$0xff]   ;;  %v8518_v37 = vld [vmem:[%s11669_s13 + $0x40] ss:$16 sps:$4 sm:$0xff]   ;;  %4154 = vmatprep.subr.bf16.mxu1 %v8521_v36 }
 0x758   : >> { %4114 = vmatpush1.bf16.msra.mxu0 %v8512_v30  ;;  %v8519_v15 = vld [vmem:[%s11669_s13 + $0x64] ss:$16 sps:$4 sm:$0xff]   ;;  %4155 = vmatpush1.bf16.msra.mxu1 %v8524_v31  ;;  %v8527_v16 = vld [vmem:[%s11669_s13 + $0x2c] ss:$16 sps:$4 sm:$0xff]   ;;  %v8530_v39 = vld [vmem:[%s11669_s13 + $0x28] ss:$16 sps:$4 sm:$0xff]  }
 0x759   : >> { %4115 = vmatprep.subr.bf16.mxu0 %v8513_v43  ;;  %4156 = vmatprep.subr.bf16.mxu1 %v8527_v16  ;;  %v8523_v40 = vld [vmem:[%s11669_s13 + $0x60] ss:$16 sps:$4 sm:$0xff]   ;;  %v8525_v41 = vld [vmem:[%s11669_s13 + $0x84] ss:$16 sps:$4 sm:$0xff]   ;;  %v8533_v44 = vld [vmem:[%s11669_s13 + $0x4c] ss:$16 sps:$4 sm:$0xff]  }
 0x75a   : >> { %v8536_v45 = vld [vmem:[%s11669_s13 + $0x48] ss:$16 sps:$4 sm:$0xff]   ;;  %v8539_v48 = vld [vmem:[%s11669_s13 + $0x6c] ss:$16 sps:$4 sm:$0xff]   ;;  %v8529_v46 = vld [vmem:[%s11669_s13 + $0x80] ss:$16 sps:$4 sm:$0xff]  }
 0x75b   : >> { %v8531_v52 = vld [vmem:[%s11669_s13 + $0xa4] ss:$16 sps:$4 sm:$0xff]   ;;  %v8542_v59 = vld [vmem:[%s11669_s13 + $0x68] ss:$16 sps:$4 sm:$0xff]   ;;  %v8545_v49 = vld [vmem:[%s11669_s13 + $0x8c] ss:$16 sps:$4 sm:$0xff]  }
 0x75c   : >> { %4116 = vmatpush1.bf16.msra.mxu0 %v8515_v28  ;;  %4157 = vmatpush1.bf16.msra.mxu1 %v8530_v39  ;;  %v8535_v51 = vld [vmem:[%s11669_s13 + $0xa0] ss:$16 sps:$4 sm:$0xff]   ;;  %v8537_v53 = vld [vmem:[%s11669_s13 + $0xc4] ss:$16 sps:$4 sm:$0xff]   ;;  %v8548_v54 = vld [vmem:[%s11669_s13 + $0x88] ss:$16 sps:$4 sm:$0xff]  }
 0x75d   : >> { %4117 = vmatprep.subr.bf16.mxu0 %v8516_v35  ;;  %4158 = vmatprep.subr.bf16.mxu1 %v8533_v44  ;;  %v8549_v60 = vld [vmem:[%s11669_s13 + $0xac] ss:$16 sps:$4 sm:$0xff]   ;;  %v8541_v55 = vld [vmem:[%s11669_s13 + $0xc0] ss:$16 sps:$4 sm:$0xff]   ;;  %v8543_v57 = vld [vmem:[%s11669_s13 + $0xe4] ss:$16 sps:$4 sm:$0xff]  }
 0x75e   : >> { %v8551_v0 = vld [vmem:[%s11669_s13 + $0xa8] ss:$16 sps:$4 sm:$0xff]   ;;  %v8552_v5 = vld [vmem:[%s11669_s13 + $0xcc] ss:$16 sps:$4 sm:$0xff]   ;;  %v8547_v62 = vld [vmem:[%s11669_s13 + $0xe0] ss:$16 sps:$4 sm:$0xff]  }
 0x75f   : >> { %v8554_v8 = vld [vmem:[%s11669_s13 + $0xc8] ss:$16 sps:$4 sm:$0xff]   ;;  %v8555_v42 = vld [vmem:[%s11669_s13 + $0xec] ss:$16 sps:$4 sm:$0xff]   ;;  %s3911_s5 = sshra.s32 %s7410_s30, 3  ;;  %s3907_s28 = sadd.s32 1, %s9044_s28  }
 0x760   : >> { %4118 = vmatpush1.bf16.msra.mxu0 %v8518_v37  ;;  %4159 = vmatpush1.bf16.msra.mxu1 %v8536_v45  ;;  %v8557_v3 = vld [vmem:[%s11669_s13 + $0xe8] ss:$16 sps:$4 sm:$0xff]   ;;  %s7804_s27 = sshll.u32 %s3911_s5, 5  ;;  %p3904_p5 = scmp.ge.s32.totalorder %s3907_s28, 18  }
 0x761   : >> { %4119 = vmatprep.subr.bf16.mxu0 %v8519_v15  ;;  %4160 = vmatprep.subr.bf16.mxu1 %v8539_v48  ;;  %s3915_s23 = scalar_lea.vmem [#allocation3], %s7804_s27  ;;  %v4224_v16 = vld [vmem:[%s11671_s15] sm:$0xff] (%p3904_p5) }
 0x762   : >> { %v3916_v27 = vld [vmem:[%s3915_s23] sm:$0xff]  ;;  %v3917_v33 = vld [vmem:[%s3915_s23 + $0x8] sm:$0xff]  ;;  %v3919_v13 = vld [vmem:[%s3915_s23 + $0x18] sm:$0xff] }
 0x763   : >> { %v3918_v24 = vld [vmem:[%s3915_s23 + $0x10] sm:$0xff]  ;;  %v4228_v39 = vld [vmem:[%s11671_s15 + $0x20] sm:$0xff] (%p3904_p5) }
 0x764   : >> { %4120 = vmatpush1.bf16.msra.mxu0 %v8523_v40  ;;  %4161 = vmatpush1.bf16.msra.mxu1 %v8542_v59  ;;  %v4232_v40 = vld [vmem:[%s11671_s15 + $0x40] sm:$0xff] (%p3904_p5)  ;;  %v7448_v44 = vcombine.low (%p3904_p5), %v4224_v16, %v4228_v39 }
 0x765   : >> { %4121 = vmatprep.subr.bf16.mxu0 %v8525_v41  ;;  %4162 = vmatprep.subr.bf16.mxu1 %v8545_v49  ;;  %v7449_v41 = vcombine.high (%p3904_p5), %v4224_v16, %v4228_v39  ;;  %v4240_v48 = vld [vmem:[%s11671_s15 + $0x80] sm:$0xff] (%p3904_p5)  ;;  %v4226_v39 = vld [vmem:[%s11671_s15 + $0x10] sm:$0xff] (%p3904_p5) }
 0x766   : > { %v4248_v49 = vld [vmem:[%s11671_s15 + $0xc0] sm:$0xff] (%p3904_p5) }
 0x768   : >> { %4122 = vmatpush1.bf16.msra.mxu0 %v8529_v46  ;;  %4163 = vmatpush1.bf16.msra.mxu1 %v8548_v54  ;;  %v4244_v46 = vld [vmem:[%s11671_s15 + $0xa0] sm:$0xff] (%p3904_p5) }
 0x769   : >> { %4123 = vmatprep.subr.bf16.mxu0 %v8531_v52  ;;  %4164 = vmatprep.subr.bf16.mxu1 %v8549_v60  ;;  %v7465_v59 = vcombine.high (%p3904_p5), %v4240_v48, %v4244_v46  ;;  %v4252_v54 = vld [vmem:[%s11671_s15 + $0xe0] sm:$0xff] (%p3904_p5) }
 0x76c   : >> { %4124 = vmatpush1.bf16.msra.mxu0 %v8535_v51  ;;  %4165 = vmatpush1.bf16.msra.mxu1 %v8551_v0  ;;  %v4225_v51 = vld [vmem:[%s11671_s15 + $0x8] sm:$0xff] (%p3904_p5) }
 0x76d   : >> { %4125 = vmatprep.subr.bf16.mxu0 %v8537_v53  ;;  %4166 = vmatprep.subr.bf16.mxu1 %v8552_v5  ;;  %v4229_v53 = vld [vmem:[%s11671_s15 + $0x28] sm:$0xff] (%p3904_p5) }
 0x76e   : > { %v7451_v60 = vcombine.high (%p3904_p5), %v4225_v51, %v4229_v53  ;;  %v4237_v0 = vld [vmem:[%s11671_s15 + $0x68] sm:$0xff] (%p3904_p5) }
 0x770   : >> { %4126 = vmatpush1.bf16.msra.mxu0 %v8541_v55  ;;  %4167 = vmatpush1.bf16.msra.mxu1 %v8554_v8  ;;  %v7450_v55 = vcombine.low (%p3904_p5), %v4225_v51, %v4229_v53  ;;  %v4245_v8 = vld [vmem:[%s11671_s15 + $0xa8] sm:$0xff] (%p3904_p5)  ;;  %v4227_v51 = vld [vmem:[%s11671_s15 + $0x18] sm:$0xff] (%p3904_p5) }
 0x771   : >> { %4127 = vmatprep.subr.bf16.mxu0 %v8543_v57  ;;  %4168 = vmatprep.subr.bf16.mxu1 %v8555_v42  ;;  %v4233_v57 = vld [vmem:[%s11671_s15 + $0x48] sm:$0xff] (%p3904_p5)  ;;  %v7464_v42 = vcombine.low (%p3904_p5), %v4240_v48, %v4244_v46  ;;  %v4231_v53 = vld [vmem:[%s11671_s15 + $0x38] sm:$0xff] (%p3904_p5) }
 0x772   : > { %v7459_v5 = vcombine.high (%p3904_p5), %v4233_v57, %v4237_v0 }
 0x774   : >> { %4128 = vmatpush1.bf16.msra.mxu0 %v8547_v62  ;;  %4169 = vmatpush1.bf16.msra.mxu1 %v8557_v3  ;;  %v4241_v62 = vld [vmem:[%s11671_s15 + $0x88] sm:$0xff] (%p3904_p5)  ;;  %v7458_v3 = vcombine.low (%p3904_p5), %v4233_v57, %v4237_v0  ;;  %v4246_v57 = vld [vmem:[%s11671_s15 + $0xb0] sm:$0xff] (%p3904_p5)  ;;  %v7455_v0 = vcombine.high (%p3904_p5), %v4227_v51, %v4231_v53 }
 0x775   : > { %4650 = vmatprep.subr.bf16.mxu0 (%p3904_p5), %v7449_v41  ;;  %4691 = vmatprep.subr.bf16.mxu1 (%p3904_p5), %v7451_v60  ;;  %v4281_v41 = vld [vmem:[%s11671_s15 + $0x1c8] sm:$0xff] (%p3904_p5) }
 0x777   : >> { %4146 = vmatmul.mubr.bf16.vlgmr.msra.gmra.mrb[0].mxu0 %v3920_v56  ;;  %4187 = vmatmul.mubr.bf16.vlgmr.msra.gmra.mrb[0].mxu1 %v3920_v56  ;;  %v7473_v56 = vcombine.high (%p3904_p5), %v4248_v49, %v4252_v54 }
 0x778   : > { %4682 = vmatprep.mubr.bf16.mxu0 (%p3904_p5), %v9046_v1  ;;  %4723 = vmatprep.mubr.bf16.mxu1 (%p3904_p5), %v9046_v1 }
 0x779   : > { %4651 = vmatpush1.bf16.msra.mxu0 (%p3904_p5), %v7448_v44  ;;  %4692 = vmatpush1.bf16.msra.mxu1 (%p3904_p5), %v7450_v55  ;;  %v4285_v44 = vld [vmem:[%s11671_s15 + $0x1e8] sm:$0xff] (%p3904_p5) }
 0x77a   : > { %4693 = vmatprep.subr.bf16.mxu1 (%p3904_p5), %v7459_v5  ;;  %v7507_v46 = vcombine.high (%p3904_p5), %v4281_v41, %v4285_v44  ;;  %v7506_v60 = vcombine.low (%p3904_p5), %v4281_v41, %v4285_v44  ;;  %v4235_v5 = vld [vmem:[%s11671_s15 + $0x58] sm:$0xff] (%p3904_p5) }
 0x77d   : > { %4694 = vmatpush1.bf16.msra.mxu1 (%p3904_p5), %v7458_v3  ;;  %v4250_v3 = vld [vmem:[%s11671_s15 + $0xd0] sm:$0xff] (%p3904_p5) }
 0x84a   : >> { %v4147_v18 = vpop.f32.mrb[0].mxu0  ;;  %v4188_v14 = vpop.f32.mrb[0].mxu1 }
 0x84b   : >> { %v4195_v23 = vadd.f32 %v4147_v18, %v3916_v27  ;;  %v4149_v17 = vpop.f32.mrb[1].mxu0  ;;  %v4190_v19 = vpop.f32.mrb[1].mxu1  ;;  %v4197_v25 = vadd.f32 %v4188_v14, %v3918_v24  ;;  %v4256_v27 = vld [vmem:[%s11671_s15 + $0x100] sm:$0xff] (%p3904_p5)  ;;  %v7467_v18 = vcombine.high (%p3904_p5), %v4241_v62, %v4245_v8  ;;  %v4257_v14 = vld [vmem:[%s11671_s15 + $0x108] sm:$0xff] (%p3904_p5) }
 0x84c   : >> { %v4196_v22 = vadd.f32 %v4149_v17, %v3917_v33  ;;  %v4151_v47 = vpop.f32.mrb[2].mxu0  ;;  %v4198_v20 = vadd.f32 %v4190_v19, %v3919_v13  ;;  %v4192_v21 = vpop.f32.mrb[2].mxu1  ;;  %v4260_v33 = vld [vmem:[%s11671_s15 + $0x120] sm:$0xff] (%p3904_p5)  ;;  %v4253_v17 = vld [vmem:[%s11671_s15 + $0xe8] sm:$0xff] (%p3904_p5) }
 0x84d   : >> { %v7445_v9 = vmul.f32 -1.442695, %v4195_v23  ;;  %v4152_v10 = vpop.f32.mrb[3].mxu0  ;;  %v4193_v7 = vpop.f32.mrb[3].mxu1  ;;  %v4249_v23 = vld [vmem:[%s11671_s15 + $0xc8] sm:$0xff] (%p3904_p5)  ;;  %v7481_v47 = vcombine.high (%p3904_p5), %v4256_v27, %v4260_v33  ;;  %4695 = vmatprep.subr.bf16.mxu1 (%p3904_p5), %v7467_v18  ;;  %v4272_v24 = vld [vmem:[%s11671_s15 + $0x180] sm:$0xff] (%p3904_p5) }
 0x84e   : >> { %v7446_v12 = vmul.f32 -1.442695, %v4196_v22  ;;  %v7447_v50 = vmul.f32 -1.442695, %v4198_v20  ;;  %v7472_v22 = vcombine.low (%p3904_p5), %v4248_v49, %v4252_v54  ;;  %v4264_v10 = vld [vmem:[%s11671_s15 + $0x140] sm:$0xff] (%p3904_p5)  ;;  %v7475_v13 = vcombine.high (%p3904_p5), %v4249_v23, %v4253_v17  ;;  %v4261_v19 = vld [vmem:[%s11671_s15 + $0x128] sm:$0xff] (%p3904_p5) }
 0x84f   : >> { %8558 = vpow2.f32 %v7445_v9  ;;  %v7466_v9 = vcombine.low (%p3904_p5), %v4241_v62, %v4245_v8  ;;  %v7480_v20 = vcombine.low (%p3904_p5), %v4256_v27, %v4260_v33  ;;  %v7474_v7 = vcombine.low (%p3904_p5), %v4249_v23, %v4253_v17  ;;  %v4239_v62 = vld [vmem:[%s11671_s15 + $0x78] sm:$0xff] (%p3904_p5)  ;;  %v4254_v27 = vld [vmem:[%s11671_s15 + $0xf0] sm:$0xff] (%p3904_p5) }
 0x850   : >> { %8560 = vpow2.f32 %v7446_v12  ;;  %v4268_v12 = vld [vmem:[%s11671_s15 + $0x160] sm:$0xff] (%p3904_p5)  ;;  %v7463_v33 = vcombine.high (%p3904_p5), %v4235_v5, %v4239_v62  ;;  %v4243_v18 = vld [vmem:[%s11671_s15 + $0x98] sm:$0xff] (%p3904_p5) }
 0x851   : >> { %8562 = vpow2.f32 %v7447_v50  ;;  %v7489_v21 = vcombine.high (%p3904_p5), %v4264_v10, %v4268_v12  ;;  %4696 = vmatpush1.bf16.msra.mxu1 (%p3904_p5), %v7466_v9  ;;  %v4276_v50 = vld [vmem:[%s11671_s15 + $0x1a0] sm:$0xff] (%p3904_p5)  ;;  %v4247_v23 = vld [vmem:[%s11671_s15 + $0xb8] sm:$0xff] (%p3904_p5)  ;;  %v4258_v9 = vld [vmem:[%s11671_s15 + $0x110] sm:$0xff] (%p3904_p5) }
 0x852   : >> { %8564 = vtanh.f32 %v4197_v25  ;;  %4697 = vmatprep.subr.bf16.mxu1 (%p3904_p5), %v7475_v13  ;;  %v7483_v25 = vcombine.high (%p3904_p5), %v4257_v14, %v4261_v19  ;;  %v4251_v13 = vld [vmem:[%s11671_s15 + $0xd8] sm:$0xff] (%p3904_p5) }
 0x855   : > { %4698 = vmatpush1.bf16.msra.mxu1 (%p3904_p5), %v7474_v7  ;;  %v4266_v7 = vld [vmem:[%s11671_s15 + $0x150] sm:$0xff] (%p3904_p5) }
 0x856   : > { %4699 = vmatprep.subr.bf16.mxu1 (%p3904_p5), %v7483_v25  ;;  %v4263_v25 = vld [vmem:[%s11671_s15 + $0x138] sm:$0xff] (%p3904_p5) }
 0x859   : >> { %v8559_v26 = vpop.eup %8558 }
 0x85a   : >> { %v8561_v29 = vpop.eup %8560  ;;  %v4202_v6 = vadd.f32 1.0, %v8559_v26  ;;  %v4265_v26 = vld [vmem:[%s11671_s15 + $0x148] sm:$0xff] (%p3904_p5) }
 0x85b   : >> { %v4208_v34 = vadd.f32 1.0, %v8561_v29  ;;  %v8563_v38 = vpop.eup %8562  ;;  %v4269_v29 = vld [vmem:[%s11671_s15 + $0x168] sm:$0xff] (%p3904_p5) }
 0x85c   : >> { %8566 = vrcp.f32 %v4202_v6  ;;  %v8565_v30 = vpop.eup %8564  ;;  %v4215_v43 = vadd.f32 1.0, %v8563_v38  ;;  %v7488_v6 = vcombine.low (%p3904_p5), %v4264_v10, %v4268_v12  ;;  %v7482_v38 = vcombine.low (%p3904_p5), %v4257_v14, %v4261_v19  ;;  %v4262_v10 = vld [vmem:[%s11671_s15 + $0x130] sm:$0xff] (%p3904_p5)  ;;  %v4255_v14 = vld [vmem:[%s11671_s15 + $0xf8] sm:$0xff] (%p3904_p5) }
 0x85d   : >> { %8568 = vrcp.f32 %v4208_v34  ;;  %v7471_v12 = vcombine.high (%p3904_p5), %v4243_v18, %v4247_v23  ;;  %v7476_v19 = vcombine.low (%p3904_p5), %v4250_v3, %v4254_v27 }
 0x85e   : >> { %8570 = vrcp.f32 %v4215_v43  ;;  %v7491_v43 = vcombine.high (%p3904_p5), %v4265_v26, %v4269_v29  ;;  %4700 = vmatpush1.bf16.msra.mxu1 (%p3904_p5), %v7482_v38  ;;  %v4278_v38 = vld [vmem:[%s11671_s15 + $0x1b0] sm:$0xff] (%p3904_p5) }
 0x860   : > { %4701 = vmatprep.subr.bf16.mxu1 (%p3904_p5), %v7491_v43  ;;  %v4271_v43 = vld [vmem:[%s11671_s15 + $0x178] sm:$0xff] (%p3904_p5) }
 0x866   : >> { %v8567_v61 = vpop.eup %8566 }
 0x867   : >> { %v8569_v28 = vpop.eup %8568  ;;  %v4219_v35 = vmul.f32 %v8567_v61, %v8565_v30  ;;  %v4280_v30 = vld [vmem:[%s11671_s15 + $0x1c0] sm:$0xff] (%p3904_p5) }
 0x868   : >> { %v4218_v36 = vmul.f32 %v9036_v32, %v8569_v28  ;;  %v8571_v31 = vpop.eup %8570  ;;  %v4284_v61 = vld [vmem:[%s11671_s15 + $0x1e0] sm:$0xff] (%p3904_p5)  ;;  %v4273_v28 = vld [vmem:[%s11671_s15 + $0x188] sm:$0xff] (%p3904_p5) }
 0x86a   : >> { %v4220_v32 = vadd.f32 %v4219_v35, %v4218_v36   ;;  %v4277_v35 = vld [vmem:[%s11671_s15 + $0x1a8] sm:$0xff] (%p3904_p5)  ;;  %v7496_v36 = vcombine.low (%p3904_p5), %v4272_v24, %v4276_v50 }
 0x86b   : > { %v7499_v16 = vcombine.high (%p3904_p5), %v4273_v28, %v4277_v35 }
 0x86c   : >> { %8572 = vtanh.f32 %v4220_v32  ;;  %v4236_v32 = vld [vmem:[%s11671_s15 + $0x60] sm:$0xff] (%p3904_p5) }
 0x86d   : > { %v7457_v45 = vcombine.high (%p3904_p5), %v4232_v40, %v4236_v32  ;;  %v7456_v52 = vcombine.low (%p3904_p5), %v4232_v40, %v4236_v32  ;;  %v4230_v40 = vld [vmem:[%s11671_s15 + $0x30] sm:$0xff] (%p3904_p5)  ;;  %v7504_v32 = vcombine.low (%p3904_p5), %v4280_v30, %v4284_v61 }
 0x86e   : > { %v7453_v48 = vcombine.high (%p3904_p5), %v4226_v39, %v4230_v40  ;;  %v7452_v54 = vcombine.low (%p3904_p5), %v4226_v39, %v4230_v40  ;;  %v4275_v39 = vld [vmem:[%s11671_s15 + $0x198] sm:$0xff] (%p3904_p5) }
 0x86f   : > { %4652 = vmatprep.subr.bf16.mxu0 (%p3904_p5), %v7457_v45  ;;  %v7498_v45 = vcombine.low (%p3904_p5), %v4273_v28, %v4277_v35  ;;  %v4279_v40 = vld [vmem:[%s11671_s15 + $0x1b8] sm:$0xff] (%p3904_p5) }
 0x870   : > { %4653 = vmatpush1.bf16.msra.mxu0 (%p3904_p5), %v7456_v52  ;;  %v4234_v52 = vld [vmem:[%s11671_s15 + $0x50] sm:$0xff] (%p3904_p5) }
 0x871   : > { %4654 = vmatprep.subr.bf16.mxu0 (%p3904_p5), %v7465_v59  ;;  %v4238_v59 = vld [vmem:[%s11671_s15 + $0x70] sm:$0xff] (%p3904_p5) }
 0x872   : > { %v7461_v55 = vcombine.high (%p3904_p5), %v4234_v52, %v4238_v59  ;;  %v7460_v8 = vcombine.low (%p3904_p5), %v4234_v52, %v4238_v59  ;;  %v8576_v52 = vld [vmem:[%s11673_s17 + $0x4] ss:$16 sps:$4 sm:$0xff] (%p3904_p5)  }
 0x874   : > { %3906 = sbr.rel (!%p3904_p5) target bundleno = 1877 (0x755), region = 166  ;;  %4655 = vmatpush1.bf16.msra.mxu0 (%p3904_p5), %v7464_v42 }
 0x875   : > { %4656 = vmatprep.subr.bf16.mxu0 (%p3904_p5), %v7473_v56  ;;  %v7454_v56 = vcombine.low (%p3904_p5), %v4227_v51, %v4231_v53  ;;  %v7502_v51 = vcombine.low (%p3904_p5), %v4275_v39, %v4279_v40 }
 0x876   : >> { %v8573_v37 = vpop.eup %8572 }
 0x877   : >> { %v10528_v34 = vmul.f32 %v8573_v37, %v8571_v31   ;;  %v7505_v31 = vcombine.high (%p3904_p5), %v4280_v30, %v4284_v61  ;;  %v7490_v37 = vcombine.low (%p3904_p5), %v4265_v26, %v4269_v29  ;;  %v7484_v26 = vcombine.low (%p3904_p5), %v4258_v9, %v4262_v10  ;;  %v4267_v61 = vld [vmem:[%s11671_s15 + $0x158] sm:$0xff] (%p3904_p5) }
 0x878   : > { %4657 = vmatpush1.bf16.msra.mxu0 (%p3904_p5), %v7472_v22  ;;  %v7477_v22 = vcombine.high (%p3904_p5), %v4250_v3, %v4254_v27  ;;  %v8591_v3 = vld [vmem:[%s11673_s17 + $0x4c] ss:$16 sps:$4 sm:$0xff] (%p3904_p5)   ;;  %v8592_v27 = vld [vmem:[%s11673_s17 + $0x60] ss:$16 sps:$4 sm:$0xff] (%p3904_p5)  }
 0x879   : >> { %v11694_v15 = vmov %v10528_v34  ;;  %4658 = vmatprep.subr.bf16.mxu0 (%p3904_p5), %v7481_v47  ;;  %4702 = vmatpush1.bf16.msra.mxu1 (%p3904_p5), %v7490_v37  ;;  %v7462_v47 = vcombine.low (%p3904_p5), %v4235_v5, %v4239_v62  ;;  %v4286_v37 = vld [vmem:[%s11671_s15 + $0x1f0] sm:$0xff] (%p3904_p5)  ;;  %v8585_v62 = vld [vmem:[%s11673_s17 + $0x2c] ss:$16 sps:$4 sm:$0xff] (%p3904_p5)  }
 0x87a   : >> { %v11695_v34 = vmov %v11694_v15  ;;  %4703 = vmatprep.subr.bf16.mxu1 (%p3904_p5), %v7499_v16  ;;  %v10650_v49 = vpack.c.bf16 (%p3904_p5), %v11694_v15, %v11694_v15  ;;  %v4242_v15 = vld [vmem:[%s11671_s15 + $0x90] sm:$0xff] (%p3904_p5)  ;;  %v7495_v16 = vcombine.high (%p3904_p5), %v4267_v61, %v4271_v43 }
 0x87b   : > { %v7497_v34 = vcombine.high %v4272_v24, %v4276_v50  ;;  %v7469_v42 = vcombine.high %v4242_v15, %v4246_v57  ;;  %v7468_v17 = vcombine.low %v4242_v15, %v4246_v57  ;;  %v7479_v24 = vcombine.high %v4251_v13, %v4255_v14  ;;  %v4259_v50 = vld [vmem:[%s11671_s15 + $0x118] sm:$0xff]  ;;  %v8580_v57 = vld [vmem:[%s11673_s17 + $0x20] ss:$16 sps:$4 sm:$0xff]   ;;  %v8588_v5 = vld [vmem:[%s11673_s17 + $0x44] ss:$16 sps:$4 sm:$0xff]  }
 0x87c   : > { %4659 = vmatpush1.bf16.msra.mxu0 %v7480_v20  ;;  %v7485_v20 = vcombine.high %v4258_v9, %v4262_v10  ;;  %v7487_v30 = vcombine.high %v4259_v50, %v4263_v25  ;;  %v8604_v9 = vld [vmem:[%s11673_s17 + $0xa0] ss:$16 sps:$4 sm:$0xff]   ;;  %v8601_v10 = vld [vmem:[%s11673_s17 + $0x88] ss:$16 sps:$4 sm:$0xff]  }
 0x87d   : > { %4660 = vmatprep.subr.bf16.mxu0 %v7489_v21  ;;  %4704 = vmatpush1.bf16.msra.mxu1 %v7498_v45  ;;  %v7470_v21 = vcombine.low %v4243_v18, %v4247_v23  ;;  %v7503_v45 = vcombine.high %v4275_v39, %v4279_v40  ;;  %v8597_v18 = vld [vmem:[%s11673_s17 + $0x6c] ss:$16 sps:$4 sm:$0xff]   ;;  %v8598_v23 = vld [vmem:[%s11673_s17 + $0x80] ss:$16 sps:$4 sm:$0xff]  }
 0x87e   : > { %4705 = vmatprep.subr.bf16.mxu1 %v7507_v46  ;;  %v4287_v46 = vld [vmem:[%s11671_s15 + $0x1f8] sm:$0xff]  ;;  %v8646_v40 = vld [vmem:[%s11673_s17 + $0x180] ss:$16 sps:$4 sm:$0xff]  }
 0x87f   : > { %v8645_v39 = vld [vmem:[%s11673_s17 + $0x16c] ss:$16 sps:$4 sm:$0xff]  }
 0x880   : > { %4661 = vmatpush1.bf16.msra.mxu0 %v7488_v6  ;;  %v7478_v6 = vcombine.low %v4251_v13, %v4255_v14  ;;  %v8609_v13 = vld [vmem:[%s11673_s17 + $0xac] ss:$16 sps:$4 sm:$0xff]   ;;  %v8610_v14 = vld [vmem:[%s11673_s17 + $0xc0] ss:$16 sps:$4 sm:$0xff]  }
 0x881   : > { %4662 = vmatprep.subr.bf16.mxu0 %v7497_v34  ;;  %4706 = vmatpush1.bf16.msra.mxu1 %v7506_v60  ;;  %v4274_v34 = vld [vmem:[%s11671_s15 + $0x190] sm:$0xff] }
 0x882   : > { %4773 = vmatprep.subr.bf16.mxu1 %v7455_v0  ;;  %v7501_v35 = vcombine.high %v4274_v34, %v4278_v38  ;;  %v7500_v41 = vcombine.low %v4274_v34, %v4278_v38  ;;  %v8582_v60 = vld [vmem:[%s11673_s17 + $0x24] ss:$16 sps:$4 sm:$0xff]   ;;  %v8577_v0 = vld [vmem:[%s11673_s17 + $0x8] ss:$16 sps:$4 sm:$0xff]   ;;  %v8628_v34 = vld [vmem:[%s11673_s17 + $0x120] ss:$16 sps:$4 sm:$0xff]  }
 0x883   : > { %v8625_v38 = vld [vmem:[%s11673_s17 + $0x108] ss:$16 sps:$4 sm:$0xff]  }
 0x884   : > { %4663 = vmatpush1.bf16.msra.mxu0 %v7496_v36  ;;  %4724 = vmatmul.mubr.bf16.vlgmr.msra.gmra.mrb[0].mxu1 %v10650_v49  ;;  %v7486_v36 = vcombine.low %v4259_v50, %v4263_v25  ;;  %v8621_v50 = vld [vmem:[%s11673_s17 + $0xec] ss:$16 sps:$4 sm:$0xff]   ;;  %v8622_v25 = vld [vmem:[%s11673_s17 + $0x100] ss:$16 sps:$4 sm:$0xff]  }
 0x885   : > { %4664 = vmatprep.subr.bf16.mxu0 %v7505_v31  ;;  %4774 = vmatpush1.bf16.msra.mxu1 %v7454_v56  ;;  %v4282_v31 = vld [vmem:[%s11671_s15 + $0x1d0] sm:$0xff] }
 0x886   : > { %4775 = vmatprep.subr.bf16.mxu1 %v7463_v33  ;;  %4805 = vmatprep.mubr.bf16.mxu1 %v9046_v1  ;;  %v7509_v44 = vcombine.high %v4282_v31, %v4286_v37  ;;  %v7508_v59 = vcombine.low %v4282_v31, %v4286_v37  ;;  %v8594_v56 = vld [vmem:[%s11673_s17 + $0x64] ss:$16 sps:$4 sm:$0xff]   ;;  %v8589_v33 = vld [vmem:[%s11673_s17 + $0x48] ss:$16 sps:$4 sm:$0xff]   ;;  %v8640_v31 = vld [vmem:[%s11673_s17 + $0x160] ss:$16 sps:$4 sm:$0xff]  }
 0x887   : > { %v8637_v37 = vld [vmem:[%s11673_s17 + $0x148] ss:$16 sps:$4 sm:$0xff]  }
 0x888   : > { %4665 = vmatpush1.bf16.msra.mxu0 %v7504_v32  ;;  %v7494_v32 = vcombine.low %v4267_v61, %v4271_v43  ;;  %v8633_v61 = vld [vmem:[%s11673_s17 + $0x12c] ss:$16 sps:$4 sm:$0xff]   ;;  %v8634_v43 = vld [vmem:[%s11673_s17 + $0x140] ss:$16 sps:$4 sm:$0xff]  }
 0x889   : > { %4732 = vmatprep.subr.bf16.mxu0 %v7453_v48  ;;  %4776 = vmatpush1.bf16.msra.mxu1 %v7462_v47  ;;  %v4283_v48 = vld [vmem:[%s11671_s15 + $0x1d8] sm:$0xff] }
 0x88a   : > { %4777 = vmatprep.subr.bf16.mxu1 %v7471_v12  ;;  %v7511_v53 = vcombine.high %v4283_v48, %v4287_v46  ;;  %v7510_v15 = vcombine.low %v4283_v48, %v4287_v46  ;;  %v8603_v47 = vld [vmem:[%s11673_s17 + $0x8c] ss:$16 sps:$4 sm:$0xff]   ;;  %v8612_v12 = vld [vmem:[%s11673_s17 + $0xc4] ss:$16 sps:$4 sm:$0xff]   ;;  %v8652_v48 = vld [vmem:[%s11673_s17 + $0x1a0] ss:$16 sps:$4 sm:$0xff]  }
 0x88b   : > { %4683 = vmatmul.mubr.bf16.vlgmr.msra.gmra.mrb[0].mxu0 %v10650_v49  ;;  %v8657_v46 = vld [vmem:[%s11673_s17 + $0x1ac] ss:$16 sps:$4 sm:$0xff]  }
 0x88c   : > { %4733 = vmatpush1.bf16.msra.mxu0 %v7452_v54  ;;  %4764 = vmatprep.mubr.bf16.mxu0 %v9046_v1  ;;  %v4270_v1 = vld [vmem:[%s11671_s15 + $0x170] sm:$0xff] }
 0x88d   : > { %4734 = vmatprep.subr.bf16.mxu0 %v7461_v55  ;;  %v7493_v29 = vcombine.high %v4266_v7, %v4270_v1  ;;  %4778 = vmatpush1.bf16.msra.mxu1 %v7470_v21  ;;  %v7492_v28 = vcombine.low %v4266_v7, %v4270_v1  ;;  %v8574_v54 = vld [vmem:[%s11673_s17] ss:$16 sps:$4 sm:$0xff]   ;;  %v8579_v55 = vld [vmem:[%s11673_s17 + $0xc] ss:$16 sps:$4 sm:$0xff]   ;;  %v8613_v1 = vld [vmem:[%s11673_s17 + $0xc8] ss:$16 sps:$4 sm:$0xff]  }
 0x88e   : > { %4779 = vmatprep.subr.bf16.mxu1 %v7479_v24  ;;  %v8615_v21 = vld [vmem:[%s11673_s17 + $0xcc] ss:$16 sps:$4 sm:$0xff]   ;;  %v8616_v7 = vld [vmem:[%s11673_s17 + $0xe0] ss:$16 sps:$4 sm:$0xff]   ;;  %v8624_v24 = vld [vmem:[%s11673_s17 + $0x104] ss:$16 sps:$4 sm:$0xff]  }
 0x890   : > { %4735 = vmatpush1.bf16.msra.mxu0 %v7460_v8  ;;  %v8586_v8 = vld [vmem:[%s11673_s17 + $0x40] ss:$16 sps:$4 sm:$0xff]  }
 0x891   : > { %4736 = vmatprep.subr.bf16.mxu0 %v7469_v42  ;;  %4780 = vmatpush1.bf16.msra.mxu1 %v7478_v6  ;;  %v8583_v42 = vld [vmem:[%s11673_s17 + $0x28] ss:$16 sps:$4 sm:$0xff]   ;;  %v8627_v6 = vld [vmem:[%s11673_s17 + $0x10c] ss:$16 sps:$4 sm:$0xff]  }
 0x892   : > { %4781 = vmatprep.subr.bf16.mxu1 %v7487_v30  ;;  %v8636_v30 = vld [vmem:[%s11673_s17 + $0x144] ss:$16 sps:$4 sm:$0xff]  }
 0x894   : > { %4737 = vmatpush1.bf16.msra.mxu0 %v7468_v17  ;;  %v8595_v17 = vld [vmem:[%s11673_s17 + $0x68] ss:$16 sps:$4 sm:$0xff]  }
 0x895   : > { %4738 = vmatprep.subr.bf16.mxu0 %v7477_v22  ;;  %4782 = vmatpush1.bf16.msra.mxu1 %v7486_v36  ;;  %v8606_v22 = vld [vmem:[%s11673_s17 + $0xa4] ss:$16 sps:$4 sm:$0xff]   ;;  %v8639_v36 = vld [vmem:[%s11673_s17 + $0x14c] ss:$16 sps:$4 sm:$0xff]  }
 0x896   : > { %4783 = vmatprep.subr.bf16.mxu1 %v7495_v16  ;;  %v8648_v16 = vld [vmem:[%s11673_s17 + $0x184] ss:$16 sps:$4 sm:$0xff]  }
 0x898   : > { %4739 = vmatpush1.bf16.msra.mxu0 %v7476_v19  ;;  %v8607_v19 = vld [vmem:[%s11673_s17 + $0xa8] ss:$16 sps:$4 sm:$0xff]  }
 0x899   : > { %4740 = vmatprep.subr.bf16.mxu0 %v7485_v20  ;;  %4784 = vmatpush1.bf16.msra.mxu1 %v7494_v32  ;;  %v8618_v20 = vld [vmem:[%s11673_s17 + $0xe4] ss:$16 sps:$4 sm:$0xff]   ;;  %v8651_v32 = vld [vmem:[%s11673_s17 + $0x18c] ss:$16 sps:$4 sm:$0xff]  }
 0x89a   : > { %4785 = vmatprep.subr.bf16.mxu1 %v7503_v45  ;;  %v8649_v45 = vld [vmem:[%s11673_s17 + $0x188] ss:$16 sps:$4 sm:$0xff]  }
 0x89c   : > { %4741 = vmatpush1.bf16.msra.mxu0 %v7484_v26  ;;  %v8619_v26 = vld [vmem:[%s11673_s17 + $0xe8] ss:$16 sps:$4 sm:$0xff]  }
 0x89d   : > { %4742 = vmatprep.subr.bf16.mxu0 %v7493_v29  ;;  %4786 = vmatpush1.bf16.msra.mxu1 %v7502_v51  ;;  %v8630_v29 = vld [vmem:[%s11673_s17 + $0x124] ss:$16 sps:$4 sm:$0xff]   ;;  %v8658_v51 = vld [vmem:[%s11673_s17 + $0x1c0] ss:$16 sps:$4 sm:$0xff]  }
 0x89e   : > { %4787 = vmatprep.subr.bf16.mxu1 %v7511_v53  ;;  %v8663_v53 = vld [vmem:[%s11673_s17 + $0x1cc] ss:$16 sps:$4 sm:$0xff]  }
 0x8a0   : > { %4743 = vmatpush1.bf16.msra.mxu0 %v7492_v28  ;;  %v8631_v28 = vld [vmem:[%s11673_s17 + $0x128] ss:$16 sps:$4 sm:$0xff]  }
 0x8a1   : > { %4744 = vmatprep.subr.bf16.mxu0 %v7501_v35  ;;  %4788 = vmatpush1.bf16.msra.mxu1 %v7510_v15  ;;  %v8642_v35 = vld [vmem:[%s11673_s17 + $0x164] ss:$16 sps:$4 sm:$0xff]   ;;  %v8669_v15 = vld [vmem:[%s11673_s17 + $0x1ec] ss:$16 sps:$4 sm:$0xff]  }
 0x8a2   : > { %6552 = vmatprep.subr.bf16.mxu1 %v8579_v55  ;;  %v8664_v55 = vld [vmem:[%s11673_s17 + $0x1e0] ss:$16 sps:$4 sm:$0xff]  }
 0x8a4   : > { %4745 = vmatpush1.bf16.msra.mxu0 %v7500_v41  ;;  %4806 = vmatmul.mubr.bf16.vlgmr.msra.gmra.mrb[4].mxu1 %v10650_v49  ;;  %v8643_v41 = vld [vmem:[%s11673_s17 + $0x168] ss:$16 sps:$4 sm:$0xff]  }
 0x8a5   : > { %4746 = vmatprep.subr.bf16.mxu0 %v7509_v44  ;;  %6553 = vmatpush1.bf16.msra.mxu1 %v8577_v0  ;;  %v8654_v44 = vld [vmem:[%s11673_s17 + $0x1a4] ss:$16 sps:$4 sm:$0xff]   ;;  %v8667_v0 = vld [vmem:[%s11673_s17 + $0x1e8] ss:$16 sps:$4 sm:$0xff]  }
 0x8a6   : > { %6554 = vmatprep.subr.bf16.mxu1 %v8585_v62  ;;  %v10943_v62 = vld [vmem:[%s11672_s16] sm:$0xff] }
 0x8a8   : > { %4747 = vmatpush1.bf16.msra.mxu0 %v7508_v59  ;;  %v8655_v59 = vld [vmem:[%s11673_s17 + $0x1a8] ss:$16 sps:$4 sm:$0xff]  }
 0x8a9   : > { %6388 = vmatprep.subr.bf16.mxu0 %v8576_v52  ;;  %6555 = vmatpush1.bf16.msra.mxu1 %v8583_v42  ;;  %v8660_v52 = vld [vmem:[%s11673_s17 + $0x1c4] ss:$16 sps:$4 sm:$0xff]   ;;  %v4297_v42 = vrot.slane %v10943_v62, %v9790_v4 }
 0x8aa   : > { %6556 = vmatprep.subr.bf16.mxu1 %v8591_v3 }
 0x8ab   : > { %4765 = vmatmul.mubr.bf16.vlgmr.msra.gmra.mrb[4].mxu0 %v10650_v49  ;;  %v8600_v49 = vld [vmem:[%s11673_s17 + $0x84] ss:$16 sps:$4 sm:$0xff]  }
 0x8ac   : > { %6389 = vmatpush1.bf16.msra.mxu0 %v8574_v54  ;;  %v8666_v54 = vld [vmem:[%s11673_s17 + $0x1e4] ss:$16 sps:$4 sm:$0xff]  }
 0x8ad   : > { %6390 = vmatprep.subr.bf16.mxu0 %v8582_v60  ;;  %6557 = vmatpush1.bf16.msra.mxu1 %v8589_v33  ;;  %v8661_v60 = vld [vmem:[%s11673_s17 + $0x1c8] ss:$16 sps:$4 sm:$0xff]  }
 0x8ae   : > { %6558 = vmatprep.subr.bf16.mxu1 %v8597_v18 }
 0x8b0   : > { %6391 = vmatpush1.bf16.msra.mxu0 %v8580_v57  ;;  %v8672_v57 = vld [vmem:[%s11673_s17 + $0x204] ss:$16 sps:$4 sm:$0xff]  }
 0x8b1   : > { %6392 = vmatprep.subr.bf16.mxu0 %v8588_v5  ;;  %6559 = vmatpush1.bf16.msra.mxu1 %v8595_v17  ;;  %v8675_v5 = vld [vmem:[%s11673_s17 + $0x20c] ss:$16 sps:$4 sm:$0xff]   ;;  %v4305_v17 = vrot.slane %v10943_v62, %v10038_v11 }
 0x8b2   : > { %6560 = vmatprep.subr.bf16.mxu1 %v8603_v47 }
 0x8b4   : > { %6393 = vmatpush1.bf16.msra.mxu0 %v8586_v8  ;;  %v4293_v8 = vrot.slane %v10943_v62, %v9784_v63 }
 0x8b5   : > { %6394 = vmatprep.subr.bf16.mxu0 %v8594_v56  ;;  %6561 = vmatpush1.bf16.msra.mxu1 %v8601_v10  ;;  %v8670_v10 = vld [vmem:[%s11673_s17 + $0x200] ss:$16 sps:$4 sm:$0xff]  }
 0x8b6   : > { %6562 = vmatprep.subr.bf16.mxu1 %v8609_v13 }
 0x8b8   : > { %6395 = vmatpush1.bf16.msra.mxu0 %v8592_v27 }
 0x8b9   : > { %6396 = vmatprep.subr.bf16.mxu0 %v8600_v49  ;;  %6563 = vmatpush1.bf16.msra.mxu1 %v8607_v19  ;;  %v8678_v19 = vld [vmem:[%s11673_s17 + $0x224] ss:$16 sps:$4 sm:$0xff]  }
 0x8ba   : > { %6564 = vmatprep.subr.bf16.mxu1 %v8615_v21 }
 0x8bc   : > { %6397 = vmatpush1.bf16.msra.mxu0 %v8598_v23 }
 0x8bd   : > { %6398 = vmatprep.subr.bf16.mxu0 %v8606_v22  ;;  %6565 = vmatpush1.bf16.msra.mxu1 %v8613_v1 }
 0x8be   : > { %6566 = vmatprep.subr.bf16.mxu1 %v8621_v50  ;;  %v8676_v50 = vld [vmem:[%s11673_s17 + $0x220] ss:$16 sps:$4 sm:$0xff]  }
 0x8c0   : > { %6399 = vmatpush1.bf16.msra.mxu0 %v8604_v9 }
 0x8c1   : > { %6400 = vmatprep.subr.bf16.mxu0 %v8612_v12  ;;  %6567 = vmatpush1.bf16.msra.mxu1 %v8619_v26  ;;  %v8673_v12 = vld [vmem:[%s11673_s17 + $0x208] ss:$16 sps:$4 sm:$0xff]   ;;  %v8684_v26 = vld [vmem:[%s11673_s17 + $0x244] ss:$16 sps:$4 sm:$0xff]  }
 0x8c2   : > { %6568 = vmatprep.subr.bf16.mxu1 %v8627_v6 }
 0x8c4   : > { %6401 = vmatpush1.bf16.msra.mxu0 %v8610_v14 }
 0x8c5   : > { %6402 = vmatprep.subr.bf16.mxu0 %v8618_v20  ;;  %6569 = vmatpush1.bf16.msra.mxu1 %v8625_v38  ;;  %v8681_v20 = vld [vmem:[%s11673_s17 + $0x22c] ss:$16 sps:$4 sm:$0xff]   ;;  %v8685_v38 = vld [vmem:[%s11673_s17 + $0x248] ss:$16 sps:$4 sm:$0xff]  }
 0x8c6   : > { %6570 = vmatprep.subr.bf16.mxu1 %v8633_v61  ;;  %v8693_v61 = vld [vmem:[%s11673_s17 + $0x26c] ss:$16 sps:$4 sm:$0xff]  }
 0x8c8   : > { %6403 = vmatpush1.bf16.msra.mxu0 %v8616_v7 }
 0x8c9   : > { %6404 = vmatprep.subr.bf16.mxu0 %v8624_v24  ;;  %6571 = vmatpush1.bf16.msra.mxu1 %v8631_v28  ;;  %v8691_v28 = vld [vmem:[%s11673_s17 + $0x268] ss:$16 sps:$4 sm:$0xff]  }
 0x8ca   : > { %6572 = vmatprep.subr.bf16.mxu1 %v8639_v36  ;;  %v8699_v36 = vld [vmem:[%s11673_s17 + $0x28c] ss:$16 sps:$4 sm:$0xff]  }
 0x8cc   : > { %6405 = vmatpush1.bf16.msra.mxu0 %v8622_v25  ;;  %v8679_v25 = vld [vmem:[%s11673_s17 + $0x228] ss:$16 sps:$4 sm:$0xff]  }
 0x8cd   : > { %6406 = vmatprep.subr.bf16.mxu0 %v8630_v29  ;;  %6573 = vmatpush1.bf16.msra.mxu1 %v8637_v37  ;;  %v8687_v29 = vld [vmem:[%s11673_s17 + $0x24c] ss:$16 sps:$4 sm:$0xff]   ;;  %v8697_v37 = vld [vmem:[%s11673_s17 + $0x288] ss:$16 sps:$4 sm:$0xff]  }
 0x8ce   : > { %6574 = vmatprep.subr.bf16.mxu1 %v8645_v39  ;;  %v8705_v39 = vld [vmem:[%s11673_s17 + $0x2ac] ss:$16 sps:$4 sm:$0xff]  }
 0x8d0   : > { %6407 = vmatpush1.bf16.msra.mxu0 %v8628_v34  ;;  %v8682_v34 = vld [vmem:[%s11673_s17 + $0x240] ss:$16 sps:$4 sm:$0xff]  }
 0x8d1   : > { %6408 = vmatprep.subr.bf16.mxu0 %v8636_v30  ;;  %6575 = vmatpush1.bf16.msra.mxu1 %v8643_v41  ;;  %v8690_v30 = vld [vmem:[%s11673_s17 + $0x264] ss:$16 sps:$4 sm:$0xff]   ;;  %v8703_v41 = vld [vmem:[%s11673_s17 + $0x2a8] ss:$16 sps:$4 sm:$0xff]  }
 0x8d2   : > { %6576 = vmatprep.subr.bf16.mxu1 %v8651_v32  ;;  %v8711_v32 = vld [vmem:[%s11673_s17 + $0x2cc] ss:$16 sps:$4 sm:$0xff]  }
 0x8d4   : > { %6409 = vmatpush1.bf16.msra.mxu0 %v8634_v43  ;;  %v8688_v43 = vld [vmem:[%s11673_s17 + $0x260] ss:$16 sps:$4 sm:$0xff]  }
 0x8d5   : > { %6410 = vmatprep.subr.bf16.mxu0 %v8642_v35  ;;  %6577 = vmatpush1.bf16.msra.mxu1 %v8649_v45  ;;  %v8696_v35 = vld [vmem:[%s11673_s17 + $0x284] ss:$16 sps:$4 sm:$0xff]   ;;  %v8706_v45 = vld [vmem:[%s11673_s17 + $0x2c0] ss:$16 sps:$4 sm:$0xff]  }
 0x8d6   : > { %6578 = vmatprep.subr.bf16.mxu1 %v8657_v46  ;;  %v8714_v46 = vld [vmem:[%s11673_s17 + $0x2e4] ss:$16 sps:$4 sm:$0xff]  }
 0x8d8   : > { %6411 = vmatpush1.bf16.msra.mxu0 %v8640_v31  ;;  %v8694_v31 = vld [vmem:[%s11673_s17 + $0x280] ss:$16 sps:$4 sm:$0xff]  }
 0x8d9   : > { %6412 = vmatprep.subr.bf16.mxu0 %v8648_v16  ;;  %6579 = vmatpush1.bf16.msra.mxu1 %v8655_v59  ;;  %v8702_v16 = vld [vmem:[%s11673_s17 + $0x2a4] ss:$16 sps:$4 sm:$0xff]  }
 0x8da   : > { %6580 = vmatprep.subr.bf16.mxu1 %v8663_v53  ;;  %v8712_v53 = vld [vmem:[%s11673_s17 + $0x2e0] ss:$16 sps:$4 sm:$0xff]  }
 0x8dc   : > { %6413 = vmatpush1.bf16.msra.mxu0 %v8646_v40  ;;  %v8700_v40 = vld [vmem:[%s11673_s17 + $0x2a0] ss:$16 sps:$4 sm:$0xff]  }
 0x8dd   : > { %6414 = vmatprep.subr.bf16.mxu0 %v8654_v44  ;;  %6581 = vmatpush1.bf16.msra.mxu1 %v8661_v60  ;;  %v8708_v44 = vld [vmem:[%s11673_s17 + $0x2c4] ss:$16 sps:$4 sm:$0xff]  }
 0x8de   : > { %6582 = vmatprep.subr.bf16.mxu1 %v8669_v15  ;;  %v8723_v15 = vld [vmem:[%s11673_s17 + $0x30c] ss:$16 sps:$4 sm:$0xff]  }
 0x8e0   : > { %6415 = vmatpush1.bf16.msra.mxu0 %v8652_v48  ;;  %v8709_v48 = vld [vmem:[%s11673_s17 + $0x2c8] ss:$16 sps:$4 sm:$0xff]  }
 0x8e1   : > { %6416 = vmatprep.subr.bf16.mxu0 %v8660_v52  ;;  %6583 = vmatpush1.bf16.msra.mxu1 %v8667_v0  ;;  %v8717_v52 = vld [vmem:[%s11673_s17 + $0x2ec] ss:$16 sps:$4 sm:$0xff]  }
 0x8e2   : > { %6593 = vmatprep.subr.bf16.mxu1 %v8675_v5  ;;  %v8718_v5 = vld [vmem:[%s11673_s17 + $0x300] ss:$16 sps:$4 sm:$0xff]  }
 0x8e4   : > { %6417 = vmatpush1.bf16.msra.mxu0 %v8658_v51 }
 0x8e5   : > { %6418 = vmatprep.subr.bf16.mxu0 %v8666_v54  ;;  %v8715_v54 = vld [vmem:[%s11673_s17 + $0x2e8] ss:$16 sps:$4 sm:$0xff]  }
 0x8e8   : > { %6419 = vmatpush1.bf16.msra.mxu0 %v8664_v55  ;;  %v8720_v55 = vld [vmem:[%s11673_s17 + $0x304] ss:$16 sps:$4 sm:$0xff]  }
 0x8e9   : > { %6429 = vmatprep.subr.bf16.mxu0 %v8672_v57 }
 0x957   : > { %v10951_v47 = vpop.f32.mrb[0].mxu1 }
 0x958   : > { %v4727_v13 = vpop.f32.mrb[1].mxu1 }
 0x959   : > { %v4728_v21 = vadd.f32 %v4727_v13, %v4305_v17  ;;  %v4729_v7 = vpop.f32.mrb[2].mxu1  ;;  %v8735_v17 = vld [vmem:[%s11673_s17 + $0x34c] ss:$16 sps:$4 sm:$0xff]   ;;  %v8736_v13 = vld [vmem:[%s11673_s17 + $0x360] ss:$16 sps:$4 sm:$0xff]  }
 0x95a   : > { %v4730_v1 = vpop.f32.mrb[3].mxu1  ;;  %v8745_v7 = vld [vmem:[%s11673_s17 + $0x388] ss:$16 sps:$4 sm:$0xff]  }
 0x95b   : > { %v4817_v24 = vmax.f32 %v4728_v21, 0.0  ;;  %v8742_v21 = vld [vmem:[%s11673_s17 + $0x380] ss:$16 sps:$4 sm:$0xff]   ;;  %v8750_v1 = vld [vmem:[%s11673_s17 + $0x3a4] ss:$16 sps:$4 sm:$0xff]  }
 0x95d   : > { %v4825_v6 = vpack.c.bf16 %v4817_v24, %v4817_v24  ;;  %v8753_v24 = vld [vmem:[%s11673_s17 + $0x3ac] ss:$16 sps:$4 sm:$0xff]  }
 0x95e   : > { %v4684_v56 = vpop.f32.mrb[0].mxu0 }
 0x95f   : > { %v4685_v3 = vadd.f32 %v4684_v56, %v4293_v8  ;;  %v4686_v27 = vpop.f32.mrb[1].mxu0  ;;  %v8721_v8 = vld [vmem:[%s11673_s17 + $0x308] ss:$16 sps:$4 sm:$0xff]   ;;  %v8726_v56 = vld [vmem:[%s11673_s17 + $0x324] ss:$16 sps:$4 sm:$0xff]  }
 0x960   : > { %v4687_v33 = vadd.f32 %v4686_v27, %v4297_v42  ;;  %v4688_v49 = vpop.f32.mrb[2].mxu0 }
 0x961   : > { %v4814_v18 = vmax.f32 %v4685_v3, 0.0  ;;  %v4689_v23 = vpop.f32.mrb[3].mxu0  ;;  %v8729_v3 = vld [vmem:[%s11673_s17 + $0x32c] ss:$16 sps:$4 sm:$0xff]   ;;  %v8724_v49 = vld [vmem:[%s11673_s17 + $0x320] ss:$16 sps:$4 sm:$0xff]  }
 0x962   : > { %v4815_v22 = vmax.f32 %v4687_v33, 0.0  ;;  %v8732_v23 = vld [vmem:[%s11673_s17 + $0x344] ss:$16 sps:$4 sm:$0xff]  }
 0x963   : > { %v4822_v14 = vpack.c.bf16 %v4814_v18, %v4814_v18  ;;  %v8727_v18 = vld [vmem:[%s11673_s17 + $0x328] ss:$16 sps:$4 sm:$0xff]  }
 0x964   : > { %v4823_v9 = vpack.c.bf16 %v4815_v22, %v4815_v22  ;;  %v8730_v22 = vld [vmem:[%s11673_s17 + $0x340] ss:$16 sps:$4 sm:$0xff]  }
 0x966   : > { %6420 = vmatprep.mubr.bf16.mxu0 %v4823_v9  ;;  %6584 = vmatprep.mubr.bf16.mxu1 %v4823_v9  ;;  %v8733_v9 = vld [vmem:[%s11673_s17 + $0x348] ss:$16 sps:$4 sm:$0xff]  }
 0x967   : > { %6421 = vmatmul.mubr.bf16.vlgmr.msra.gmra.mrb[8].mxu0 %v4822_v14  ;;  %6585 = vmatmul.mubr.bf16.vlgmr.msra.gmra.mrb[8].mxu1 %v4822_v14  ;;  %v8739_v14 = vld [vmem:[%s11673_s17 + $0x368] ss:$16 sps:$4 sm:$0xff]  }
 0x968   : > { %6430 = vmatpush1.bf16.msra.mxu0 %v8670_v10  ;;  %6594 = vmatpush1.bf16.msra.mxu1 %v8673_v12  ;;  %v8738_v10 = vld [vmem:[%s11673_s17 + $0x364] ss:$16 sps:$4 sm:$0xff]   ;;  %v8741_v12 = vld [vmem:[%s11673_s17 + $0x36c] ss:$16 sps:$4 sm:$0xff]  }
 0x969   : > { %6431 = vmatprep.subr.bf16.mxu0 %v8678_v19  ;;  %6595 = vmatprep.subr.bf16.mxu1 %v8681_v20  ;;  %v8744_v19 = vld [vmem:[%s11673_s17 + $0x384] ss:$16 sps:$4 sm:$0xff]   ;;  %v8747_v20 = vld [vmem:[%s11673_s17 + $0x38c] ss:$16 sps:$4 sm:$0xff]  }
 0x96a   : > { %6461 = vmatprep.mubr.bf16.mxu0 %v4825_v6  ;;  %6625 = vmatprep.mubr.bf16.mxu1 %v4825_v6  ;;  %v8756_v6 = vld [vmem:[%s11673_s17 + $0x3c4] ss:$16 sps:$4 sm:$0xff]  }
 0x96c   : > { %6432 = vmatpush1.bf16.msra.mxu0 %v8676_v50  ;;  %6596 = vmatpush1.bf16.msra.mxu1 %v8679_v25  ;;  %v4312_v50 = vsub.s32 5, %v9777_v58  ;;  %v4301_v25 = vrot.slane %v10943_v62, %v10034_v2 }
 0x96d   : > { %6433 = vmatprep.subr.bf16.mxu0 %v8684_v26  ;;  %6597 = vmatprep.subr.bf16.mxu1 %v8687_v29  ;;  %v8748_v26 = vld [vmem:[%s11673_s17 + $0x3a0] ss:$16 sps:$4 sm:$0xff]   ;;  %v8751_v29 = vld [vmem:[%s11673_s17 + $0x3a8] ss:$16 sps:$4 sm:$0xff]  }
 0x970   : > { %6434 = vmatpush1.bf16.msra.mxu0 %v8682_v34  ;;  %6598 = vmatpush1.bf16.msra.mxu1 %v8685_v38  ;;  %v8759_v34 = vld [vmem:[%s11673_s17 + $0x3cc] ss:$16 sps:$4 sm:$0xff]   ;;  %v4313_v38 = vrot.slane %v10943_v62, %v4312_v50  ;;  %v8822_v50 = vld [vmem:[%s11673_s17 + $0x524] ss:$16 sps:$4 sm:$0xff]  }
 0x971   : > { %6435 = vmatprep.subr.bf16.mxu0 %v8690_v30  ;;  %6599 = vmatprep.subr.bf16.mxu1 %v8693_v61  ;;  %v4726_v30 = vadd.f32 %v10951_v47, %v4301_v25  ;;  %v8754_v61 = vld [vmem:[%s11673_s17 + $0x3c0] ss:$16 sps:$4 sm:$0xff]   ;;  %v8765_v47 = vld [vmem:[%s11673_s17 + $0x3ec] ss:$16 sps:$4 sm:$0xff]  }
 0x972   : > { %v8825_v25 = vld [vmem:[%s11673_s17 + $0x52c] ss:$16 sps:$4 sm:$0xff]  }
 0x974   : > { %6436 = vmatpush1.bf16.msra.mxu0 %v8688_v43  ;;  %6600 = vmatpush1.bf16.msra.mxu1 %v8691_v28  ;;  %v8757_v43 = vld [vmem:[%s11673_s17 + $0x3c8] ss:$16 sps:$4 sm:$0xff]   ;;  %v8762_v28 = vld [vmem:[%s11673_s17 + $0x3e4] ss:$16 sps:$4 sm:$0xff]  }
 0x975   : > { %6437 = vmatprep.subr.bf16.mxu0 %v8696_v35  ;;  %6601 = vmatprep.subr.bf16.mxu1 %v8699_v36  ;;  %v4816_v36 = vmax.f32 %v4726_v30, 0.0  ;;  %v8829_v30 = vld [vmem:[%s11673_s17 + $0x548] ss:$16 sps:$4 sm:$0xff]  }
 0x977   : > { %v11053_v0 = vpop.f32.mrb[4].mxu1 }
 0x978   : > { %6438 = vmatpush1.bf16.msra.mxu0 %v8694_v31  ;;  %6602 = vmatpush1.bf16.msra.mxu1 %v8697_v37  ;;  %v11061_v42 = vpop.f32.mrb[5].mxu1  ;;  %v8760_v31 = vld [vmem:[%s11673_s17 + $0x3e0] ss:$16 sps:$4 sm:$0xff]   ;;  %v8763_v37 = vld [vmem:[%s11673_s17 + $0x3e8] ss:$16 sps:$4 sm:$0xff]  }
 0x979   : > { %6439 = vmatprep.subr.bf16.mxu0 %v8702_v16  ;;  %6603 = vmatprep.subr.bf16.mxu1 %v8705_v39  ;;  %v4811_v27 = vpop.f32.mrb[6].mxu1  ;;  %v8768_v16 = vld [vmem:[%s11673_s17 + $0x404] ss:$16 sps:$4 sm:$0xff]   ;;  %v8771_v39 = vld [vmem:[%s11673_s17 + $0x40c] ss:$16 sps:$4 sm:$0xff]  }
 0x97a   : > { %v4812_v33 = vpop.f32.mrb[7].mxu1  ;;  %v8790_v27 = vld [vmem:[%s11673_s17 + $0x480] ss:$16 sps:$4 sm:$0xff]  }
 0x97b   : > { %v8793_v33 = vld [vmem:[%s11673_s17 + $0x488] ss:$16 sps:$4 sm:$0xff]  }
 0x97c   : > { %6440 = vmatpush1.bf16.msra.mxu0 %v8700_v40  ;;  %6604 = vmatpush1.bf16.msra.mxu1 %v8703_v41  ;;  %v4824_v41 = vpack.c.bf16 %v4816_v36, %v4816_v36  ;;  %v8843_v36 = vld [vmem:[%s11673_s17 + $0x58c] ss:$16 sps:$4 sm:$0xff]  }
 0x97d   : > { %6441 = vmatprep.subr.bf16.mxu0 %v8708_v44  ;;  %6605 = vmatprep.subr.bf16.mxu1 %v8711_v32  ;;  %v8766_v44 = vld [vmem:[%s11673_s17 + $0x400] ss:$16 sps:$4 sm:$0xff]   ;;  %v8769_v32 = vld [vmem:[%s11673_s17 + $0x408] ss:$16 sps:$4 sm:$0xff]  }
 0x97e   : > { %v11037_v59 = vpop.f32.mrb[4].mxu0 }
 0x97f   : > { %v11039_v51 = vpop.f32.mrb[5].mxu0 }
 0x980   : > { %6442 = vmatpush1.bf16.msra.mxu0 %v8706_v45  ;;  %6606 = vmatpush1.bf16.msra.mxu1 %v8709_v48  ;;  %v4770_v60 = vpop.f32.mrb[6].mxu0  ;;  %v4769_v35 = vadd.f32 %v11039_v51, %v4313_v38  ;;  %v8774_v45 = vld [vmem:[%s11673_s17 + $0x424] ss:$16 sps:$4 sm:$0xff]   ;;  %v8777_v48 = vld [vmem:[%s11673_s17 + $0x42c] ss:$16 sps:$4 sm:$0xff]  }
 0x981   : > { %6443 = vmatprep.subr.bf16.mxu0 %v8714_v46  ;;  %6607 = vmatprep.subr.bf16.mxu1 %v8717_v52  ;;  %v4771_v57 = vpop.f32.mrb[7].mxu0  ;;  %v8772_v52 = vld [vmem:[%s11673_s17 + $0x420] ss:$16 sps:$4 sm:$0xff]   ;;  %v8775_v51 = vld [vmem:[%s11673_s17 + $0x428] ss:$16 sps:$4 sm:$0xff]  }
 0x982   : > { %v4819_v40 = vmax.f32 %v4769_v35, 0.0  ;;  %v8778_v60 = vld [vmem:[%s11673_s17 + $0x440] ss:$16 sps:$4 sm:$0xff]   ;;  %v8789_v57 = vld [vmem:[%s11673_s17 + $0x46c] ss:$16 sps:$4 sm:$0xff]  }
 0x983   : > { %v8826_v38 = vld [vmem:[%s11673_s17 + $0x540] ss:$16 sps:$4 sm:$0xff]   ;;  %v8840_v35 = vld [vmem:[%s11673_s17 + $0x584] ss:$16 sps:$4 sm:$0xff]  }
 0x984   : > { %6444 = vmatpush1.bf16.msra.mxu0 %v8712_v53  ;;  %6608 = vmatpush1.bf16.msra.mxu1 %v8715_v54  ;;  %v4827_v46 = vpack.c.bf16 %v4819_v40, %v4819_v40  ;;  %v8780_v53 = vld [vmem:[%s11673_s17 + $0x444] ss:$16 sps:$4 sm:$0xff]   ;;  %v8783_v54 = vld [vmem:[%s11673_s17 + $0x44c] ss:$16 sps:$4 sm:$0xff]  }
 0x985   : > { %6445 = vmatprep.subr.bf16.mxu0 %v8720_v55  ;;  %6609 = vmatprep.subr.bf16.mxu1 %v8723_v15  ;;  %v8781_v55 = vld [vmem:[%s11673_s17 + $0x448] ss:$16 sps:$4 sm:$0xff]   ;;  %v8786_v15 = vld [vmem:[%s11673_s17 + $0x464] ss:$16 sps:$4 sm:$0xff]   ;;  %v8849_v40 = vld [vmem:[%s11673_s17 + $0x5ac] ss:$16 sps:$4 sm:$0xff]  }
 0x988   : > { %6446 = vmatpush1.bf16.msra.mxu0 %v8718_v5  ;;  %6610 = vmatpush1.bf16.msra.mxu1 %v8721_v8  ;;  %v8784_v5 = vld [vmem:[%s11673_s17 + $0x460] ss:$16 sps:$4 sm:$0xff]   ;;  %v8787_v8 = vld [vmem:[%s11673_s17 + $0x468] ss:$16 sps:$4 sm:$0xff]  }
 0x989   : > { %6447 = vmatprep.subr.bf16.mxu0 %v8726_v56  ;;  %6611 = vmatprep.subr.bf16.mxu1 %v8729_v3  ;;  %v8792_v56 = vld [vmem:[%s11673_s17 + $0x484] ss:$16 sps:$4 sm:$0xff]   ;;  %v8795_v3 = vld [vmem:[%s11673_s17 + $0x48c] ss:$16 sps:$4 sm:$0xff]  }
 0x98c   : > { %6448 = vmatpush1.bf16.msra.mxu0 %v8724_v49  ;;  %6612 = vmatpush1.bf16.msra.mxu1 %v8727_v18  ;;  %v8798_v49 = vld [vmem:[%s11673_s17 + $0x4a4] ss:$16 sps:$4 sm:$0xff]   ;;  %v8801_v18 = vld [vmem:[%s11673_s17 + $0x4ac] ss:$16 sps:$4 sm:$0xff]  }
 0x98d   : > { %6449 = vmatprep.subr.bf16.mxu0 %v8732_v23  ;;  %6613 = vmatprep.subr.bf16.mxu1 %v8735_v17  ;;  %v8796_v23 = vld [vmem:[%s11673_s17 + $0x4a0] ss:$16 sps:$4 sm:$0xff]   ;;  %v8799_v17 = vld [vmem:[%s11673_s17 + $0x4a8] ss:$16 sps:$4 sm:$0xff]  }
 0x990   : > { %6450 = vmatpush1.bf16.msra.mxu0 %v8730_v22  ;;  %6614 = vmatpush1.bf16.msra.mxu1 %v8733_v9  ;;  %v8804_v22 = vld [vmem:[%s11673_s17 + $0x4c4] ss:$16 sps:$4 sm:$0xff]   ;;  %v8807_v9 = vld [vmem:[%s11673_s17 + $0x4cc] ss:$16 sps:$4 sm:$0xff]  }
 0x991   : > { %6451 = vmatprep.subr.bf16.mxu0 %v8738_v10  ;;  %6615 = vmatprep.subr.bf16.mxu1 %v8741_v12  ;;  %v8802_v10 = vld [vmem:[%s11673_s17 + $0x4c0] ss:$16 sps:$4 sm:$0xff]   ;;  %v8805_v12 = vld [vmem:[%s11673_s17 + $0x4c8] ss:$16 sps:$4 sm:$0xff]  }
 0x994   : > { %6452 = vmatpush1.bf16.msra.mxu0 %v8736_v13  ;;  %6616 = vmatpush1.bf16.msra.mxu1 %v8739_v14  ;;  %v8810_v13 = vld [vmem:[%s11673_s17 + $0x4e4] ss:$16 sps:$4 sm:$0xff]   ;;  %v8813_v14 = vld [vmem:[%s11673_s17 + $0x4ec] ss:$16 sps:$4 sm:$0xff]  }
 0x995   : > { %6453 = vmatprep.subr.bf16.mxu0 %v8744_v19  ;;  %6617 = vmatprep.subr.bf16.mxu1 %v8747_v20  ;;  %v8808_v19 = vld [vmem:[%s11673_s17 + $0x4e0] ss:$16 sps:$4 sm:$0xff]   ;;  %v8811_v20 = vld [vmem:[%s11673_s17 + $0x4e8] ss:$16 sps:$4 sm:$0xff]  }
 0x998   : > { %6454 = vmatpush1.bf16.msra.mxu0 %v8742_v21  ;;  %6618 = vmatpush1.bf16.msra.mxu1 %v8745_v7  ;;  %v8816_v21 = vld [vmem:[%s11673_s17 + $0x504] ss:$16 sps:$4 sm:$0xff]   ;;  %v8819_v7 = vld [vmem:[%s11673_s17 + $0x50c] ss:$16 sps:$4 sm:$0xff]  }
 0x999   : > { %6455 = vmatprep.subr.bf16.mxu0 %v8750_v1  ;;  %6619 = vmatprep.subr.bf16.mxu1 %v8753_v24  ;;  %v8814_v1 = vld [vmem:[%s11673_s17 + $0x500] ss:$16 sps:$4 sm:$0xff]   ;;  %v8817_v24 = vld [vmem:[%s11673_s17 + $0x508] ss:$16 sps:$4 sm:$0xff]  }
 0x99c   : > { %6456 = vmatpush1.bf16.msra.mxu0 %v8748_v26  ;;  %6620 = vmatpush1.bf16.msra.mxu1 %v8751_v29  ;;  %v8820_v26 = vld [vmem:[%s11673_s17 + $0x520] ss:$16 sps:$4 sm:$0xff]   ;;  %v8823_v29 = vld [vmem:[%s11673_s17 + $0x528] ss:$16 sps:$4 sm:$0xff]  }
 0x99d   : > { %6457 = vmatprep.subr.bf16.mxu0 %v8756_v6  ;;  %6621 = vmatprep.subr.bf16.mxu1 %v8759_v34  ;;  %v8828_v6 = vld [vmem:[%s11673_s17 + $0x544] ss:$16 sps:$4 sm:$0xff]   ;;  %v8831_v34 = vld [vmem:[%s11673_s17 + $0x54c] ss:$16 sps:$4 sm:$0xff]  }
 0x9a0   : > { %6458 = vmatpush1.bf16.msra.mxu0 %v8754_v61  ;;  %6622 = vmatpush1.bf16.msra.mxu1 %v8757_v43  ;;  %v8834_v61 = vld [vmem:[%s11673_s17 + $0x564] ss:$16 sps:$4 sm:$0xff]   ;;  %v8837_v43 = vld [vmem:[%s11673_s17 + $0x56c] ss:$16 sps:$4 sm:$0xff]  }
 0x9a1   : > { %6459 = vmatprep.subr.bf16.mxu0 %v8762_v28  ;;  %6623 = vmatprep.subr.bf16.mxu1 %v8765_v47  ;;  %v8832_v28 = vld [vmem:[%s11673_s17 + $0x560] ss:$16 sps:$4 sm:$0xff]   ;;  %v8835_v47 = vld [vmem:[%s11673_s17 + $0x568] ss:$16 sps:$4 sm:$0xff]  }
 0x9a4   : > { %6460 = vmatpush1.bf16.msra.mxu0 %v8760_v31  ;;  %6624 = vmatpush1.bf16.msra.mxu1 %v8763_v37  ;;  %v4308_v31 = vsub.s32 4, %v9777_v58  ;;  %v8838_v37 = vld [vmem:[%s11673_s17 + $0x580] ss:$16 sps:$4 sm:$0xff]  }
 0x9a5   : > { %6470 = vmatprep.subr.bf16.mxu0 %v8768_v16  ;;  %6634 = vmatprep.subr.bf16.mxu1 %v8771_v39  ;;  %v8841_v16 = vld [vmem:[%s11673_s17 + $0x588] ss:$16 sps:$4 sm:$0xff]   ;;  %v8846_v39 = vld [vmem:[%s11673_s17 + $0x5a4] ss:$16 sps:$4 sm:$0xff]  }
 0x9a7   : > { %6462 = vmatmul.mubr.bf16.vlgmr.msra.gmra.mrb[8].mxu0 %v4824_v41  ;;  %6626 = vmatmul.mubr.bf16.vlgmr.msra.gmra.mrb[8].mxu1 %v4824_v41  ;;  %v4320_v41 = vsub.s32 7, %v9777_v58 }
 0x9a8   : > { %6471 = vmatpush1.bf16.msra.mxu0 %v8766_v44  ;;  %6635 = vmatpush1.bf16.msra.mxu1 %v8769_v32  ;;  %v4309_v44 = vrot.slane %v10943_v62, %v4308_v31  ;;  %v8844_v32 = vld [vmem:[%s11673_s17 + $0x5a0] ss:$16 sps:$4 sm:$0xff]   ;;  %v8915_v31 = vld [vmem:[%s11673_s17 + $0x70c] ss:$16 sps:$4 sm:$0xff]  }
 0x9a9   : > { %6472 = vmatprep.subr.bf16.mxu0 %v8774_v45  ;;  %6636 = vmatprep.subr.bf16.mxu1 %v8777_v48  ;;  %v8847_v45 = vld [vmem:[%s11673_s17 + $0x5a8] ss:$16 sps:$4 sm:$0xff]   ;;  %v8852_v48 = vld [vmem:[%s11673_s17 + $0x5c4] ss:$16 sps:$4 sm:$0xff]  }
 0x9aa   : > { %6502 = vmatprep.mubr.bf16.mxu0 %v4827_v46  ;;  %6666 = vmatprep.mubr.bf16.mxu1 %v4827_v46  ;;  %v8855_v46 = vld [vmem:[%s11673_s17 + $0x5cc] ss:$16 sps:$4 sm:$0xff]  }
 0x9ac   : > { %6473 = vmatpush1.bf16.msra.mxu0 %v8772_v52  ;;  %6637 = vmatpush1.bf16.msra.mxu1 %v8775_v51  ;;  %v4321_v52 = vrot.slane %v10943_v62, %v4320_v41  ;;  %v4767_v51 = vadd.f32 %v11037_v59, %v4309_v44  ;;  %v8861_v59 = vld [vmem:[%s11673_s17 + $0x5ec] ss:$16 sps:$4 sm:$0xff]   ;;  %v8916_v41 = vld [vmem:[%s11673_s17 + $0x720] ss:$16 sps:$4 sm:$0xff]   ;;  %v8919_v44 = vld [vmem:[%s11673_s17 + $0x728] ss:$16 sps:$4 sm:$0xff]  }
 0x9ad   : > { %6474 = vmatprep.subr.bf16.mxu0 %v8780_v53  ;;  %6638 = vmatprep.subr.bf16.mxu1 %v8783_v54  ;;  %v8850_v53 = vld [vmem:[%s11673_s17 + $0x5c0] ss:$16 sps:$4 sm:$0xff]   ;;  %v8853_v54 = vld [vmem:[%s11673_s17 + $0x5c8] ss:$16 sps:$4 sm:$0xff]  }
 0x9b0   : > { %6475 = vmatpush1.bf16.msra.mxu0 %v8778_v60  ;;  %6639 = vmatpush1.bf16.msra.mxu1 %v8781_v55  ;;  %v8858_v60 = vld [vmem:[%s11673_s17 + $0x5e4] ss:$16 sps:$4 sm:$0xff]   ;;  %v4810_v55 = vadd.f32 %v11061_v42, %v4321_v52  ;;  %v8867_v42 = vld [vmem:[%s11673_s17 + $0x60c] ss:$16 sps:$4 sm:$0xff]  }
 0x9b1   : > { %6476 = vmatprep.subr.bf16.mxu0 %v8786_v15  ;;  %6640 = vmatprep.subr.bf16.mxu1 %v8789_v57  ;;  %v4818_v15 = vmax.f32 %v4767_v51, 0.0  ;;  %v8856_v57 = vld [vmem:[%s11673_s17 + $0x5e0] ss:$16 sps:$4 sm:$0xff]   ;;  %v8930_v52 = vld [vmem:[%s11673_s17 + $0x764] ss:$16 sps:$4 sm:$0xff]  }
 0x9b2   : > { %v8933_v51 = vld [vmem:[%s11673_s17 + $0x76c] ss:$16 sps:$4 sm:$0xff]  }
 0x9b4   : > { %6477 = vmatpush1.bf16.msra.mxu0 %v8784_v5  ;;  %6641 = vmatpush1.bf16.msra.mxu1 %v8787_v8  ;;  %v8859_v5 = vld [vmem:[%s11673_s17 + $0x5e8] ss:$16 sps:$4 sm:$0xff]   ;;  %v8864_v8 = vld [vmem:[%s11673_s17 + $0x604] ss:$16 sps:$4 sm:$0xff]  }
 0x9b5   : > { %6478 = vmatprep.subr.bf16.mxu0 %v8792_v56  ;;  %6642 = vmatprep.subr.bf16.mxu1 %v8795_v3  ;;  %v4821_v56 = vmax.f32 %v4810_v55, 0.0  ;;  %v4826_v3 = vpack.c.bf16 %v4818_v15, %v4818_v15  ;;  %v8934_v55 = vld [vmem:[%s11673_s17 + $0x780] ss:$16 sps:$4 sm:$0xff]   ;;  %v8937_v15 = vld [vmem:[%s11673_s17 + $0x788] ss:$16 sps:$4 sm:$0xff]  }
 0x9b8   : > { %6479 = vmatpush1.bf16.msra.mxu0 %v8790_v27  ;;  %6643 = vmatpush1.bf16.msra.mxu1 %v8793_v33  ;;  %v8862_v27 = vld [vmem:[%s11673_s17 + $0x600] ss:$16 sps:$4 sm:$0xff]   ;;  %v8865_v33 = vld [vmem:[%s11673_s17 + $0x608] ss:$16 sps:$4 sm:$0xff]  }
 0x9b9   : > { %6480 = vmatprep.subr.bf16.mxu0 %v8798_v49  ;;  %6644 = vmatprep.subr.bf16.mxu1 %v8801_v18  ;;  %v8870_v49 = vld [vmem:[%s11673_s17 + $0x624] ss:$16 sps:$4 sm:$0xff]   ;;  %v8873_v18 = vld [vmem:[%s11673_s17 + $0x62c] ss:$16 sps:$4 sm:$0xff]  }
 0x9bc   : > { %6481 = vmatpush1.bf16.msra.mxu0 %v8796_v23  ;;  %6645 = vmatpush1.bf16.msra.mxu1 %v8799_v17  ;;  %v4829_v23 = vpack.c.bf16 %v4821_v56, %v4821_v56  ;;  %v8868_v17 = vld [vmem:[%s11673_s17 + $0x620] ss:$16 sps:$4 sm:$0xff]  }
 0x9bd   : > { %6482 = vmatprep.subr.bf16.mxu0 %v8804_v22  ;;  %6646 = vmatprep.subr.bf16.mxu1 %v8807_v9  ;;  %v8871_v22 = vld [vmem:[%s11673_s17 + $0x628] ss:$16 sps:$4 sm:$0xff]   ;;  %v8876_v9 = vld [vmem:[%s11673_s17 + $0x644] ss:$16 sps:$4 sm:$0xff]  }
 0x9c0   : > { %6483 = vmatpush1.bf16.msra.mxu0 %v8802_v10  ;;  %6647 = vmatpush1.bf16.msra.mxu1 %v8805_v12  ;;  %v8879_v10 = vld [vmem:[%s11673_s17 + $0x64c] ss:$16 sps:$4 sm:$0xff]   ;;  %v8874_v12 = vld [vmem:[%s11673_s17 + $0x640] ss:$16 sps:$4 sm:$0xff]  }
 0x9c1   : > { %6484 = vmatprep.subr.bf16.mxu0 %v8810_v13  ;;  %6648 = vmatprep.subr.bf16.mxu1 %v8813_v14  ;;  %v8877_v13 = vld [vmem:[%s11673_s17 + $0x648] ss:$16 sps:$4 sm:$0xff]   ;;  %v8882_v14 = vld [vmem:[%s11673_s17 + $0x664] ss:$16 sps:$4 sm:$0xff]  }
 0x9c4   : > { %6485 = vmatpush1.bf16.msra.mxu0 %v8808_v19  ;;  %6649 = vmatpush1.bf16.msra.mxu1 %v8811_v20  ;;  %v8885_v19 = vld [vmem:[%s11673_s17 + $0x66c] ss:$16 sps:$4 sm:$0xff]   ;;  %v8880_v20 = vld [vmem:[%s11673_s17 + $0x660] ss:$16 sps:$4 sm:$0xff]  }
 0x9c5   : > { %6486 = vmatprep.subr.bf16.mxu0 %v8816_v21  ;;  %6650 = vmatprep.subr.bf16.mxu1 %v8819_v7  ;;  %v8883_v21 = vld [vmem:[%s11673_s17 + $0x668] ss:$16 sps:$4 sm:$0xff]   ;;  %v8888_v7 = vld [vmem:[%s11673_s17 + $0x684] ss:$16 sps:$4 sm:$0xff]  }
 0x9c8   : > { %6487 = vmatpush1.bf16.msra.mxu0 %v8814_v1  ;;  %6651 = vmatpush1.bf16.msra.mxu1 %v8817_v24  ;;  %v8891_v1 = vld [vmem:[%s11673_s17 + $0x68c] ss:$16 sps:$4 sm:$0xff]   ;;  %v8886_v24 = vld [vmem:[%s11673_s17 + $0x680] ss:$16 sps:$4 sm:$0xff]  }
 0x9c9   : > { %6488 = vmatprep.subr.bf16.mxu0 %v8822_v50  ;;  %6652 = vmatprep.subr.bf16.mxu1 %v8825_v25  ;;  %v8889_v50 = vld [vmem:[%s11673_s17 + $0x688] ss:$16 sps:$4 sm:$0xff]   ;;  %v8894_v25 = vld [vmem:[%s11673_s17 + $0x6a4] ss:$16 sps:$4 sm:$0xff]  }
 0x9cc   : > { %6489 = vmatpush1.bf16.msra.mxu0 %v8820_v26  ;;  %6653 = vmatpush1.bf16.msra.mxu1 %v8823_v29  ;;  %v8897_v26 = vld [vmem:[%s11673_s17 + $0x6ac] ss:$16 sps:$4 sm:$0xff]   ;;  %v8892_v29 = vld [vmem:[%s11673_s17 + $0x6a0] ss:$16 sps:$4 sm:$0xff]  }
 0x9cd   : > { %6490 = vmatprep.subr.bf16.mxu0 %v8828_v6  ;;  %6654 = vmatprep.subr.bf16.mxu1 %v8831_v34  ;;  %v8895_v6 = vld [vmem:[%s11673_s17 + $0x6a8] ss:$16 sps:$4 sm:$0xff]   ;;  %v8900_v34 = vld [vmem:[%s11673_s17 + $0x6c4] ss:$16 sps:$4 sm:$0xff]  }
 0x9d0   : > { %6491 = vmatpush1.bf16.msra.mxu0 %v8826_v38  ;;  %6655 = vmatpush1.bf16.msra.mxu1 %v8829_v30  ;;  %v8903_v38 = vld [vmem:[%s11673_s17 + $0x6cc] ss:$16 sps:$4 sm:$0xff]   ;;  %v8898_v30 = vld [vmem:[%s11673_s17 + $0x6c0] ss:$16 sps:$4 sm:$0xff]  }
 0x9d1   : > { %6492 = vmatprep.subr.bf16.mxu0 %v8834_v61  ;;  %6656 = vmatprep.subr.bf16.mxu1 %v8837_v43  ;;  %v8901_v61 = vld [vmem:[%s11673_s17 + $0x6c8] ss:$16 sps:$4 sm:$0xff]   ;;  %v8906_v43 = vld [vmem:[%s11673_s17 + $0x6e4] ss:$16 sps:$4 sm:$0xff]  }
 0x9d4   : > { %6493 = vmatpush1.bf16.msra.mxu0 %v8832_v28  ;;  %6657 = vmatpush1.bf16.msra.mxu1 %v8835_v47  ;;  %v8909_v28 = vld [vmem:[%s11673_s17 + $0x6ec] ss:$16 sps:$4 sm:$0xff]   ;;  %v8904_v47 = vld [vmem:[%s11673_s17 + $0x6e0] ss:$16 sps:$4 sm:$0xff]  }
 0x9d5   : > { %6494 = vmatprep.subr.bf16.mxu0 %v8840_v35  ;;  %6658 = vmatprep.subr.bf16.mxu1 %v8843_v36  ;;  %v8907_v35 = vld [vmem:[%s11673_s17 + $0x6e8] ss:$16 sps:$4 sm:$0xff]   ;;  %v8912_v36 = vld [vmem:[%s11673_s17 + $0x704] ss:$16 sps:$4 sm:$0xff]  }
 0x9d8   : > { %6495 = vmatpush1.bf16.msra.mxu0 %v8838_v37  ;;  %6659 = vmatpush1.bf16.msra.mxu1 %v8841_v16  ;;  %v8910_v37 = vld [vmem:[%s11673_s17 + $0x700] ss:$16 sps:$4 sm:$0xff]   ;;  %v8913_v16 = vld [vmem:[%s11673_s17 + $0x708] ss:$16 sps:$4 sm:$0xff]  }
 0x9d9   : > { %6496 = vmatprep.subr.bf16.mxu0 %v8846_v39  ;;  %6660 = vmatprep.subr.bf16.mxu1 %v8849_v40  ;;  %v8918_v39 = vld [vmem:[%s11673_s17 + $0x724] ss:$16 sps:$4 sm:$0xff]   ;;  %v8921_v40 = vld [vmem:[%s11673_s17 + $0x72c] ss:$16 sps:$4 sm:$0xff]  }
 0x9dc   : > { %6497 = vmatpush1.bf16.msra.mxu0 %v8844_v32  ;;  %6661 = vmatpush1.bf16.msra.mxu1 %v8847_v45  ;;  %v8924_v32 = vld [vmem:[%s11673_s17 + $0x744] ss:$16 sps:$4 sm:$0xff]   ;;  %v8927_v45 = vld [vmem:[%s11673_s17 + $0x74c] ss:$16 sps:$4 sm:$0xff]  }
 0x9dd   : > { %6498 = vmatprep.subr.bf16.mxu0 %v8852_v48  ;;  %6662 = vmatprep.subr.bf16.mxu1 %v8855_v46  ;;  %v8922_v48 = vld [vmem:[%s11673_s17 + $0x740] ss:$16 sps:$4 sm:$0xff]   ;;  %v8925_v46 = vld [vmem:[%s11673_s17 + $0x748] ss:$16 sps:$4 sm:$0xff]  }
 0x9e0   : > { %6499 = vmatpush1.bf16.msra.mxu0 %v8850_v53  ;;  %6663 = vmatpush1.bf16.msra.mxu1 %v8853_v54  ;;  %v8928_v53 = vld [vmem:[%s11673_s17 + $0x760] ss:$16 sps:$4 sm:$0xff]   ;;  %v8931_v54 = vld [vmem:[%s11673_s17 + $0x768] ss:$16 sps:$4 sm:$0xff]  }
 0x9e1   : > { %6500 = vmatprep.subr.bf16.mxu0 %v8858_v60  ;;  %6664 = vmatprep.subr.bf16.mxu1 %v8861_v59  ;;  %v8936_v60 = vld [vmem:[%s11673_s17 + $0x784] ss:$16 sps:$4 sm:$0xff]   ;;  %v8939_v59 = vld [vmem:[%s11673_s17 + $0x78c] ss:$16 sps:$4 sm:$0xff]  }
 0x9e4   : > { %6501 = vmatpush1.bf16.msra.mxu0 %v8856_v57  ;;  %6665 = vmatpush1.bf16.msra.mxu1 %v8859_v5  ;;  %v4316_v57 = vsub.s32 6, %v9777_v58  ;;  %v8942_v5 = vld [vmem:[%s11673_s17 + $0x7a4] ss:$16 sps:$4 sm:$0xff]   ;;  %v8943_v58 = vld [vmem:[%s11673_s17 + $0x7a8] ss:$16 sps:$4 sm:$0xff]  }
 0x9e5   : > { %6511 = vmatprep.subr.bf16.mxu0 %v8864_v8  ;;  %6675 = vmatprep.subr.bf16.mxu1 %v8867_v42  ;;  %v8945_v8 = vld [vmem:[%s11673_s17 + $0x7ac] ss:$16 sps:$4 sm:$0xff]   ;;  %v8940_v42 = vld [vmem:[%s11673_s17 + $0x7a0] ss:$16 sps:$4 sm:$0xff]  }
 0x9e6   : > { %v4317_v56 = vrot.slane %v10943_v62, %v4316_v57  ;;  %v8949_v62 = vld [vmem:[%s11673_s17 + $0x7c8] ss:$16 sps:$4 sm:$0xff]  }
 0x9e7   : > { %6503 = vmatmul.mubr.bf16.vlgmr.msra.gmra.mrb[8].mxu0 %v4826_v3  ;;  %6667 = vmatmul.mubr.bf16.vlgmr.msra.gmra.mrb[8].mxu1 %v4826_v3  ;;  %v8948_v3 = vld [vmem:[%s11673_s17 + $0x7c4] ss:$16 sps:$4 sm:$0xff]  }
 0x9e8   : > { %6512 = vmatpush1.bf16.msra.mxu0 %v8862_v27  ;;  %6676 = vmatpush1.bf16.msra.mxu1 %v8865_v33  ;;  %v8951_v27 = vld [vmem:[%s11673_s17 + $0x7cc] ss:$16 sps:$4 sm:$0xff]   ;;  %v8946_v33 = vld [vmem:[%s11673_s17 + $0x7c0] ss:$16 sps:$4 sm:$0xff]  }
 0x9e9   : > { %6513 = vmatprep.subr.bf16.mxu0 %v8870_v49  ;;  %6677 = vmatprep.subr.bf16.mxu1 %v8873_v18  ;;  %v4808_v49 = vadd.f32 %v11053_v0, %v4317_v56  ;;  %v8954_v18 = vld [vmem:[%s11673_s17 + $0x7e4] ss:$16 sps:$4 sm:$0xff]   ;;  %v8955_v0 = vld [vmem:[%s11673_s17 + $0x7e8] ss:$16 sps:$4 sm:$0xff]  }
 0x9ea   : > { %6543 = vmatprep.mubr.bf16.mxu0 %v4829_v23  ;;  %6707 = vmatprep.mubr.bf16.mxu1 %v4829_v23  ;;  %v8957_v23 = vld [vmem:[%s11673_s17 + $0x7ec] ss:$16 sps:$4 sm:$0xff]  }
 0x9ec   : > { %6514 = vmatpush1.bf16.msra.mxu0 %v8868_v17  ;;  %6678 = vmatpush1.bf16.msra.mxu1 %v8871_v22  ;;  %v8952_v17 = vld [vmem:[%s11673_s17 + $0x7e0] ss:$16 sps:$4 sm:$0xff]   ;;  %v4820_v22 = vmax.f32 %v4808_v49, 0.0 }
 0x9ed   : > { %6515 = vmatprep.subr.bf16.mxu0 %v8876_v9  ;;  %6679 = vmatprep.subr.bf16.mxu1 %v8879_v10  ;;  %v8958_v9 = vld [vmem:[%s11675_s19 + $0x40] sm:$0xff]  }
 0x9ee   : > { %v8959_v10 = vld [vmem:[%s11675_s19 + $0xc0] sm:$0xff]  }
 0x9f0   : > { %6516 = vmatpush1.bf16.msra.mxu0 %v8874_v12  ;;  %6680 = vmatpush1.bf16.msra.mxu1 %v8877_v13  ;;  %v8960_v12 = vld [vmem:[%s11675_s19] sm:$0xff]  }
 0x9f1   : > { %6517 = vmatprep.subr.bf16.mxu0 %v8882_v14  ;;  %6681 = vmatprep.subr.bf16.mxu1 %v8885_v19  ;;  %v8961_v13 = vld [vmem:[%s11675_s19 + $0x80] sm:$0xff]   ;;  %v4828_v14 = vpack.c.bf16 %v4820_v22, %v4820_v22  ;;  %v8962_v19 = vld [vmem:[%s11675_s19 + $0x48] sm:$0xff]  }
 0x9f4   : > { %6518 = vmatpush1.bf16.msra.mxu0 %v8880_v20  ;;  %6682 = vmatpush1.bf16.msra.mxu1 %v8883_v21  ;;  %v8963_v20 = vld [vmem:[%s11675_s19 + $0xc8] sm:$0xff]  }
 0x9f5   : > { %6519 = vmatprep.subr.bf16.mxu0 %v8888_v7  ;;  %6683 = vmatprep.subr.bf16.mxu1 %v8891_v1  ;;  %v8964_v21 = vld [vmem:[%s11675_s19 + $0x8] sm:$0xff]   ;;  %v8966_v1 = vld [vmem:[%s11675_s19 + $0x50] sm:$0xff]  }
 0x9f6   : > { %v8965_v7 = vld [vmem:[%s11675_s19 + $0x88] sm:$0xff]  }
 0x9f8   : > { %6520 = vmatpush1.bf16.msra.mxu0 %v8886_v24  ;;  %6684 = vmatpush1.bf16.msra.mxu1 %v8889_v50  ;;  %v8967_v24 = vld [vmem:[%s11675_s19 + $0xd0] sm:$0xff]  }
 0x9f9   : > { %6521 = vmatprep.subr.bf16.mxu0 %v8894_v25  ;;  %6685 = vmatprep.subr.bf16.mxu1 %v8897_v26  ;;  %v8968_v50 = vld [vmem:[%s11675_s19 + $0x10] sm:$0xff]   ;;  %v8970_v26 = vld [vmem:[%s11675_s19 + $0x58] sm:$0xff]  }
 0x9fa   : > { %v8969_v25 = vld [vmem:[%s11675_s19 + $0x90] sm:$0xff]  }
 0x9fc   : > { %6522 = vmatpush1.bf16.msra.mxu0 %v8892_v29  ;;  %6686 = vmatpush1.bf16.msra.mxu1 %v8895_v6  ;;  %v8971_v29 = vld [vmem:[%s11675_s19 + $0xd8] sm:$0xff]  }
 0x9fd   : > { %6523 = vmatprep.subr.bf16.mxu0 %v8900_v34  ;;  %6687 = vmatprep.subr.bf16.mxu1 %v8903_v38  ;;  %v8972_v6 = vld [vmem:[%s11675_s19 + $0x18] sm:$0xff]   ;;  %v8974_v38 = vld [vmem:[%s11675_s19 + $0x60] sm:$0xff]  }
 0x9fe   : > { %v8973_v34 = vld [vmem:[%s11675_s19 + $0x98] sm:$0xff]  }
 0xa00   : > { %6524 = vmatpush1.bf16.msra.mxu0 %v8898_v30  ;;  %6688 = vmatpush1.bf16.msra.mxu1 %v8901_v61  ;;  %v8975_v30 = vld [vmem:[%s11675_s19 + $0xe0] sm:$0xff]  }
 0xa01   : > { %6525 = vmatprep.subr.bf16.mxu0 %v8906_v43  ;;  %6689 = vmatprep.subr.bf16.mxu1 %v8909_v28  ;;  %v8976_v61 = vld [vmem:[%s11675_s19 + $0x20] sm:$0xff]   ;;  %v8978_v28 = vld [vmem:[%s11675_s19 + $0x68] sm:$0xff]  }
 0xa02   : > { %v8977_v43 = vld [vmem:[%s11675_s19 + $0xa0] sm:$0xff]  }
 0xa04   : > { %6526 = vmatpush1.bf16.msra.mxu0 %v8904_v47  ;;  %6690 = vmatpush1.bf16.msra.mxu1 %v8907_v35  ;;  %v8979_v47 = vld [vmem:[%s11675_s19 + $0xe8] sm:$0xff]  }
 0xa05   : > { %6527 = vmatprep.subr.bf16.mxu0 %v8912_v36  ;;  %6691 = vmatprep.subr.bf16.mxu1 %v8915_v31  ;;  %v8980_v35 = vld [vmem:[%s11675_s19 + $0x28] sm:$0xff]   ;;  %v8982_v31 = vld [vmem:[%s11675_s19 + $0x70] sm:$0xff]  }
 0xa06   : > { %v8981_v36 = vld [vmem:[%s11675_s19 + $0xa8] sm:$0xff]  }
 0xa08   : > { %6528 = vmatpush1.bf16.msra.mxu0 %v8910_v37  ;;  %6692 = vmatpush1.bf16.msra.mxu1 %v8913_v16  ;;  %v8983_v37 = vld [vmem:[%s11675_s19 + $0xf0] sm:$0xff]  }
 0xa09   : > { %6529 = vmatprep.subr.bf16.mxu0 %v8918_v39  ;;  %6693 = vmatprep.subr.bf16.mxu1 %v8921_v40  ;;  %v8984_v16 = vld [vmem:[%s11675_s19 + $0x30] sm:$0xff]   ;;  %v8986_v40 = vld [vmem:[%s11675_s19 + $0x78] sm:$0xff]  }
 0xa0a   : > { %v8985_v39 = vld [vmem:[%s11675_s19 + $0xb0] sm:$0xff]  }
 0xa0c   : > { %6530 = vmatpush1.bf16.msra.mxu0 %v8916_v41  ;;  %6694 = vmatpush1.bf16.msra.mxu1 %v8919_v44  ;;  %v8987_v41 = vld [vmem:[%s11675_s19 + $0xf8] sm:$0xff]  }
 0xa0d   : > { %6531 = vmatprep.subr.bf16.mxu0 %v8924_v32  ;;  %6695 = vmatprep.subr.bf16.mxu1 %v8927_v45  ;;  %v8988_v44 = vld [vmem:[%s11675_s19 + $0x38] sm:$0xff]   ;;  %v5086_v45 = vld [vmem:[%s11674_s18] sm:$0xf] }
 0xa0e   : > { %v8989_v32 = vld [vmem:[%s11675_s19 + $0xb8] sm:$0xff]  }
 0xa10   : > { %6532 = vmatpush1.bf16.msra.mxu0 %v8922_v48  ;;  %6696 = vmatpush1.bf16.msra.mxu1 %v8925_v46  ;;  %v5091_v48 = vrot.slane %v5086_v45, %v9784_v63  ;;  %v5099_v46 = vrot.slane %v5086_v45, %v10034_v2 }
 0xa11   : > { %6533 = vmatprep.subr.bf16.mxu0 %v8930_v52  ;;  %6697 = vmatprep.subr.bf16.mxu1 %v8933_v51  ;;  %v5095_v52 = vrot.slane %v5086_v45, %v9790_v4  ;;  %v5103_v51 = vrot.slane %v5086_v45, %v10038_v11 }
 0xa14   : > { %6534 = vmatpush1.bf16.msra.mxu0 %v8928_v53  ;;  %6698 = vmatpush1.bf16.msra.mxu1 %v8931_v54 }
 0xa15   : > { %6535 = vmatprep.subr.bf16.mxu0 %v8936_v60  ;;  %6699 = vmatprep.subr.bf16.mxu1 %v8939_v59 }
 0xa18   : > { %6536 = vmatpush1.bf16.msra.mxu0 %v8934_v55  ;;  %6700 = vmatpush1.bf16.msra.mxu1 %v8937_v15 }
 0xa19   : > { %6537 = vmatprep.subr.bf16.mxu0 %v8942_v5  ;;  %6701 = vmatprep.subr.bf16.mxu1 %v8945_v8 }
 0xa1c   : > { %6538 = vmatpush1.bf16.msra.mxu0 %v8940_v42  ;;  %6702 = vmatpush1.bf16.msra.mxu1 %v8943_v58 }
 0xa1d   : > { %6539 = vmatprep.subr.bf16.mxu0 %v8948_v3  ;;  %6703 = vmatprep.subr.bf16.mxu1 %v8951_v27 }
 0xa20   : > { %6540 = vmatpush1.bf16.msra.mxu0 %v8946_v33  ;;  %6704 = vmatpush1.bf16.msra.mxu1 %v8949_v62 }
 0xa21   : > { %6541 = vmatprep.subr.bf16.mxu0 %v8954_v18  ;;  %6705 = vmatprep.subr.bf16.mxu1 %v8957_v23  ;;  %v7768_v23 = vld [vmem:[%s11676_s20] ss:$0 sm:$0xff] }
 0xa24   : > { %6542 = vmatpush1.bf16.msra.mxu0 %v8952_v17  ;;  %6706 = vmatpush1.bf16.msra.mxu1 %v8955_v0 }
 0xa25   : > { %7865 = vmatprep.subr.bf16.mxu0 %v8958_v9  ;;  %7887 = vmatprep.subr.bf16.mxu1 %v8959_v10 }
 0xa27   : > { %6544 = vmatmul.mubr.bf16.vlgmr.msra.gmra.mrb[8].mxu0 %v4828_v14  ;;  %6708 = vmatmul.mubr.bf16.vlgmr.msra.gmra.mrb[8].mxu1 %v4828_v14 }
 0xa28   : > { %7866 = vmatpush3.bf16.msra.mxu0 %v8960_v12  ;;  %7888 = vmatpush3.bf16.msra.mxu1 %v8961_v13 }
 0xa29   : > { %7867 = vmatprep.subr.bf16.mxu0 %v8962_v19  ;;  %7889 = vmatprep.subr.bf16.mxu1 %v8963_v20 }
 0xa2c   : > { %7868 = vmatpush3.bf16.msra.mxu0 %v8964_v21  ;;  %7890 = vmatpush3.bf16.msra.mxu1 %v8965_v7 }
 0xa2d   : > { %7869 = vmatprep.subr.bf16.mxu0 %v8966_v1  ;;  %7891 = vmatprep.subr.bf16.mxu1 %v8967_v24 }
 0xa30   : > { %7870 = vmatpush3.bf16.msra.mxu0 %v8968_v50  ;;  %7892 = vmatpush3.bf16.msra.mxu1 %v8969_v25 }
 0xa31   : > { %7871 = vmatprep.subr.bf16.mxu0 %v8970_v26  ;;  %7893 = vmatprep.subr.bf16.mxu1 %v8971_v29 }
 0xa34   : > { %7872 = vmatpush3.bf16.msra.mxu0 %v8972_v6  ;;  %7894 = vmatpush3.bf16.msra.mxu1 %v8973_v34 }
 0xa35   : > { %7873 = vmatprep.subr.bf16.mxu0 %v8974_v38  ;;  %7895 = vmatprep.subr.bf16.mxu1 %v8975_v30 }
 0xa38   : > { %7874 = vmatpush3.bf16.msra.mxu0 %v8976_v61  ;;  %7896 = vmatpush3.bf16.msra.mxu1 %v8977_v43 }
 0xa39   : > { %7875 = vmatprep.subr.bf16.mxu0 %v8978_v28  ;;  %7897 = vmatprep.subr.bf16.mxu1 %v8979_v47 }
 0xa3c   : > { %7876 = vmatpush3.bf16.msra.mxu0 %v8980_v35  ;;  %7898 = vmatpush3.bf16.msra.mxu1 %v8981_v36 }
 0xa3d   : > { %7877 = vmatprep.subr.bf16.mxu0 %v8982_v31  ;;  %7899 = vmatprep.subr.bf16.mxu1 %v8983_v37 }
 0xa40   : > { %7878 = vmatpush3.bf16.msra.mxu0 %v8984_v16  ;;  %7900 = vmatpush3.bf16.msra.mxu1 %v8985_v39 }
 0xa41   : > { %7879 = vmatprep.subr.bf16.mxu0 %v8986_v40  ;;  %7901 = vmatprep.subr.bf16.mxu1 %v8987_v41 }
 0xa44   : > { %7880 = vmatpush3.bf16.msra.mxu0 %v8988_v44  ;;  %7902 = vmatpush3.bf16.msra.mxu1 %v8989_v32 }
 0xafa   : > { %v6545_v53 = vpop.f32.mrb[8].mxu0  ;;  %v6709_v54 = vpop.f32.mrb[8].mxu1 }
 0xafb   : > { %v8137_v60 = vadd.f32 %v6545_v53, %v5091_v48  ;;  %v8139_v59 = vadd.f32 %v6709_v54, %v5099_v46  ;;  %v6547_v55 = vpop.f32.mrb[9].mxu0  ;;  %v6711_v15 = vpop.f32.mrb[9].mxu1 }
 0xafc   : > { %v8138_v57 = vadd.f32 %v6547_v55, %v5095_v52  ;;  %v8140_v5 = vadd.f32 %v6711_v15, %v5103_v51  ;;  %v6549_v8 = vpop.f32.mrb[10].mxu0  ;;  %v6713_v42 = vpop.f32.mrb[10].mxu1 }
 0xafd   : > { %v6716_v58 = vmax.f32 %v8137_v60, 0.0  ;;  %v6718_v56 = vmax.f32 %v8139_v59, 0.0  ;;  %v6550_v3 = vpop.f32.mrb[11].mxu0  ;;  %v6714_v63 = vpop.f32.mrb[11].mxu1 }
 0xafe   : > { %v6717_v27 = vmax.f32 %v8138_v57, 0.0  ;;  %v6719_v2 = vmax.f32 %v8140_v5, 0.0 }
 0xaff   : > { %v6720_v62 = vpack.c.bf16 %v6716_v58, %v6716_v58  ;;  %v6722_v11 = vpack.c.bf16 %v6718_v56, %v6718_v56 }
 0xb00   : > { %v6721_v33 = vpack.c.bf16 %v6717_v27, %v6717_v27  ;;  %v6723_v4 = vpack.c.bf16 %v6719_v2, %v6719_v2 }
 0xb02   : > { %7019 = vmatprep.mubr.bf16.mxu0 %v6721_v33  ;;  %7059 = vmatprep.mubr.bf16.mxu1 %v6723_v4 }
 0xb03   : > { %7020 = vmatmul.mubr.bf16.vlgmr.msra.gmra.mrb[12].mxu0 %v6720_v62  ;;  %7060 = vmatmul.mubr.bf16.vlgmr.msra.gmra.mrb[12].mxu1 %v6722_v11 }
 0xbd6   : > { %v7881_v49 = vpop.f32.mrb[12].mxu0  ;;  %v7903_v18 = vpop.f32.mrb[12].mxu1 }
 0xbd7   : > { %v7882_v17 = vpop.f32.mrb[13].mxu0  ;;  %v7904_v0 = vpop.f32.mrb[13].mxu1 }
 0xbd8   : > { %v7883_v22 = vadd.f32 %v7882_v17, %v7881_v49  ;;  %v7905_v9 = vadd.f32 %v7904_v0, %v7903_v18  ;;  %v7884_v10 = vpop.f32.mrb[14].mxu0  ;;  %v7906_v12 = vpop.f32.mrb[14].mxu1 }
 0xbd9   : > { %v7885_v13 = vpop.f32.mrb[15].mxu0  ;;  %v7907_v14 = vpop.f32.mrb[15].mxu1 }
 0xbda   : > { %v7022_v19 = vadd.f32 %v7883_v22, %v7768_v23 }
 0xbdc   : > { %v7062_v20 = vadd.f32 %v7905_v9, %v7022_v19 }
 0xbde   : > { %7067 = vst [vmem:[%s9184_s22] sm:$0xff] %v7062_v20 }
 0xbdf PF: > { %s31_s2 = sadd.s32 1, %s9020_s2  }
 0xbe0   : > { %p28_p6 = scmp.ge.s32.totalorder %s31_s2, 4  }
 0xbe2   :  { %30 = sbr.rel (!%p28_p6) target bundleno = 7 (0x7), region = 177 }

</bundles_post_ra>
